<compile_context>
chip_gen: v7x
topology: tpu7x:2x2x1
jax: 0.10.0
libtpu: 0.0.40
codegen_flags: <defaults>
</compile_context>

<pallas_src>
import jax
import jax.numpy as jnp
from jax import lax
from jax.experimental import pallas as pl
from jax.experimental.pallas import tpu as pltpu

EPS = 1e-5
LANE = 128


def _round_up(x, m):
    return ((x + m - 1) // m) * m


# ----------------------------- in-kernel helpers -----------------------------
def _conv3x3_fused(pad_ref, w9, H, W, Cp):
    """3x3 'same' conv from a zero-padded (H+2, W+2, Cp) VMEM scratch as a
    single im2col matmul: [H*W, 9*Cp] @ [9*Cp, Cp] -> (H*W, Cp) float32."""
    taps = [pad_ref[ky:ky + H, kx:kx + W, :].reshape(H * W, Cp)
            for ky in range(3) for kx in range(3)]
    slab = jnp.concatenate(taps, axis=-1)          # (H*W, 9*Cp), lane-aligned
    return jnp.dot(slab, w9, preferred_element_type=jnp.float32)


def _stats(h):
    """Per-channel (sum, sum_of_squares) of an (M, Cp) slab -> (2, Cp)."""
    return jnp.concatenate(
        [jnp.sum(h, axis=0, keepdims=True),
         jnp.sum(h * h, axis=0, keepdims=True)], axis=0)


# --------------------------------- kernels -----------------------------------
def conv1_kernel(x_ref, w_ref, h_ref, st_ref, pad_ref):
    """conv1 (no bias: cancelled by BN) + per-batch BN1 partial stats."""
    _, H, W, Cp = x_ref.shape
    pad_ref[...] = jnp.zeros(pad_ref.shape, pad_ref.dtype)     # halo must be 0
    pad_ref[1:H + 1, 1:W + 1, :] = x_ref[0]
    h = _conv3x3_fused(pad_ref, w_ref[...], H, W, Cp)          # (H*W, Cp)
    h_ref[0] = h.reshape(H, W, Cp)
    st_ref[0] = _stats(h)


def bn1_prelu_conv2_kernel(h1_ref, sc_ref, sh_ref, alpha_ref, w_ref,
                           h2_ref, st_ref, pad_ref):
    """Folded BN1 (scale*x + shift) + PReLU + conv2 + per-batch BN2 stats."""
    _, H, W, Cp = h1_ref.shape
    a = h1_ref[0].reshape(H * W, Cp) * sc_ref[...] + sh_ref[...]
    alpha = alpha_ref[0, 0]                                    # scalar (SMEM)
    a = jnp.where(a >= 0, a, alpha * a)
    pad_ref[...] = jnp.zeros(pad_ref.shape, pad_ref.dtype)
    pad_ref[1:H + 1, 1:W + 1, :] = a.reshape(H, W, Cp)
    h2 = _conv3x3_fused(pad_ref, w_ref[...], H, W, Cp)
    h2_ref[0] = h2.reshape(H, W, Cp)
    st_ref[0] = _stats(h2)


def bn2_add_kernel(x_ref, h2_ref, sc_ref, sh_ref, o_ref):
    """Folded BN2 + residual add."""
    _, H, W, Cp = x_ref.shape
    sc = sc_ref[...].reshape(1, 1, 1, Cp)
    sh = sh_ref[...].reshape(1, 1, 1, Cp)
    o_ref[...] = x_ref[...] + h2_ref[...] * sc + sh


# --------------------------------- wrapper ------------------------------------
def _fold_bn(st, gamma, beta, count):
    """Reduce per-batch (sum, sumsq) and fold BN into per-channel scale/shift."""
    s = jnp.sum(st, axis=0)                                    # (2, Cp)
    mean = s[0] / count
    var = s[1] / count - mean * mean                           # biased variance
    scale = gamma[0] * lax.rsqrt(var + EPS)
    shift = beta[0] - mean * scale
    return scale.reshape(1, -1), shift.reshape(1, -1)


def residual_block(x_nchw, params):
    N, C, H, W = x_nchw.shape
    Cp = _round_up(max(C, LANE), LANE)                         # lane-dense channels

    x = jnp.transpose(x_nchw, (0, 2, 3, 1)).astype(jnp.float32)   # NHWC
    x_p = jnp.pad(x, ((0, 0), (0, 0), (0, 0), (0, Cp - C)))

    def prep_w(w):  # (Cout, Cin, 3, 3) -> tap-major (9*Cp, Cp)
        wt = jnp.transpose(w, (2, 3, 1, 0)).astype(jnp.float32)
        wt = jnp.pad(wt, ((0, 0), (0, 0), (0, Cp - C), (0, Cp - C)))
        return wt.reshape(9 * Cp, Cp)

    def prep_c(v):  # per-channel vector -> (1, Cp)
        return jnp.pad(v.astype(jnp.float32), (0, Cp - C)).reshape(1, Cp)

    w1, w2 = prep_w(params["w1"]), prep_w(params["w2"])
    g1, be1 = prep_c(params["g1"]), prep_c(params["be1"])
    g2, be2 = prep_c(params["g2"]), prep_c(params["be2"])
    alpha = params["a"].astype(jnp.float32).reshape(1, 1)
    # NOTE: conv biases b1/b2 are intentionally unused in-kernel: they are
    # exactly cancelled by the training-mode BatchNorm mean subtraction.

    cparams = pltpu.CompilerParams(dimension_semantics=("parallel",),
                                   vmem_limit_bytes=32 * 1024 * 1024)

    act_spec = pl.BlockSpec((1, H, W, Cp), lambda n: (n, 0, 0, 0))
    w_spec = pl.BlockSpec((9 * Cp, Cp), lambda n: (0, 0))
    vec_spec = pl.BlockSpec((1, Cp), lambda n: (0, 0))
    st_spec = pl.BlockSpec((1, 2, Cp), lambda n: (n, 0, 0))
    smem_spec = pl.BlockSpec(memory_space=pltpu.MemorySpace.SMEM)
    pad_scratch = pltpu.VMEM((H + 2, W + 2, Cp), jnp.float32)

    # ---- kernel 1: conv1 + BN1 partial stats ---------------------------------
    h1, st1 = pl.pallas_call(
        conv1_kernel,
        grid=(N,),
        in_specs=[act_spec, w_spec],
        out_specs=(act_spec, st_spec),
        out_shape=(jax.ShapeDtypeStruct((N, H, W, Cp), jnp.float32),
                   jax.ShapeDtypeStruct((N, 2, Cp), jnp.float32)),
        scratch_shapes=[pad_scratch],
        compiler_params=cparams,
    )(x_p, w1)

    count = N * H * W
    sc1, sh1 = _fold_bn(st1, g1, be1, count)

    # ---- kernel 2: BN1 + PReLU + conv2 + BN2 partial stats -------------------
    h2, st2 = pl.pallas_call(
        bn1_prelu_conv2_kernel,
        grid=(N,),
        in_specs=[act_spec, vec_spec, vec_spec, smem_spec, w_spec],
        out_specs=(act_spec, st_spec),
        out_shape=(jax.ShapeDtypeStruct((N, H, W, Cp), jnp.float32),
                   jax.ShapeDtypeStruct((N, 2, Cp), jnp.float32)),
        scratch_shapes=[pad_scratch],
        compiler_params=cparams,
    )(h1, sc1, sh1, alpha, w2)

    sc2, sh2 = _fold_bn(st2, g2, be2, count)

    # ---- kernel 3: BN2 + skip add --------------------------------------------
    y_p = pl.pallas_call(
        bn2_add_kernel,
        grid=(N,),
        in_specs=[act_spec, act_spec, vec_spec, vec_spec],
        out_specs=act_spec,
        out_shape=jax.ShapeDtypeStruct((N, H, W, Cp), jnp.float32),
        compiler_params=cparams,
    )(x_p, h2, sc2, sh2)

    return jnp.transpose(y_p[..., :C], (0, 3, 1, 2))               # back to NCHW


# ---------------- pure-JAX reference (for correctness check) ----------------
def residual_block_ref(x, params):
    def conv(h, w, b):
        out = lax.conv_general_dilated(
            h, w, window_strides=(1, 1), padding=((1, 1), (1, 1)),
            dimension_numbers=("NCHW", "OIHW", "NCHW"),
            precision=lax.Precision.HIGHEST)
        return out + b.reshape(1, -1, 1, 1)

    def bn(h, g, bt):
        mean = h.mean(axis=(0, 2, 3), keepdims=True)
        var = ((h - mean) ** 2).mean(axis=(0, 2, 3), keepdims=True)
        return (h - mean) * lax.rsqrt(var + EPS) * g.reshape(1, -1, 1, 1) \
            + bt.reshape(1, -1, 1, 1)

    r = conv(x, params["w1"], params["b1"])
    r = bn(r, params["g1"], params["be1"])
    r = jnp.where(r >= 0, r, params["a"] * r)
    r = conv(r, params["w2"], params["b2"])
    r = bn(r, params["g2"], params["be2"])
    return x + r


def init_params(key, channels):
    """Deterministic init mirroring PyTorch default shapes/scales."""
    k1, k2, k3, k4 = jax.random.split(key, 4)
    fan_in = channels * 9
    bound = 1.0 / jnp.sqrt(fan_in)
    return {
        "w1": jax.random.uniform(k1, (channels, channels, 3, 3),
                                 jnp.float32, -bound, bound),
        "b1": jax.random.uniform(k2, (channels,), jnp.float32, -bound, bound),
        "g1": jnp.ones((channels,), jnp.float32),
        "be1": jnp.zeros((channels,), jnp.float32),
        "a": jnp.full((1,), 0.25, jnp.float32),       # nn.PReLU() default
        "w2": jax.random.uniform(k3, (channels, channels, 3, 3),
                                 jnp.float32, -bound, bound),
        "b2": jax.random.uniform(k4, (channels,), jnp.float32, -bound, bound),
        "g2": jnp.ones((channels,), jnp.float32),
        "be2": jnp.zeros((channels,), jnp.float32),
    }


if __name__ == "__main__":
    N, C, H, W = 2, 4, 16, 16
    key = jax.random.PRNGKey(0)
    kx, kp = jax.random.split(key)
    x = jax.random.normal(kx, (N, C, H, W), jnp.float32)
    params = init_params(kp, C)

    y = jax.block_until_ready(jax.jit(residual_block)(x, params))
    y_ref = jax.block_until_ready(residual_block_ref(x, params))

    assert y.shape == (N, C, H, W)
    err = jnp.max(jnp.abs(y - y_ref))
    assert jnp.allclose(y, y_ref, atol=2e-3, rtol=2e-3), f"max abs err {err}"
    print("KERNEL_OK")
</pallas_src>

<mosaic_0001>
module attributes {stable_mosaic.version = 11 : i64} {
  func.func @conv1_kernel(%arg0: i32, %arg1: memref<1x16x16x128xf32, #tpu.memory_space<vmem>>, %arg2: memref<1152x128xf32, #tpu.memory_space<vmem>>, %arg3: memref<1x16x16x128xf32, #tpu.memory_space<vmem>>, %arg4: memref<1x2x128xf32, #tpu.memory_space<vmem>>, %arg5: memref<18x18x128xf32, #tpu.memory_space<vmem>>) attributes {dimension_semantics = [#tpu.dimension_semantics<parallel>], iteration_bounds = array<i64: 2>, scalar_prefetch = 0 : i64, scratch_operands = 1 : i64, tpu.core_type = #tpu.core_type<tc>, window_params = [{transform_indices = @transform_0, window_bounds = array<i64: 1, 16, 16, 128>}, {pipeline_mode = #tpu.pipeline_mode<synchronous>, transform_indices = @transform_1, window_bounds = array<i64: 1152, 128>}, {transform_indices = @transform_2, window_bounds = array<i64: 1, 16, 16, 128>}, {transform_indices = @transform_3, window_bounds = array<i64: 1, 2, 128>}]} {
    %cst = arith.constant 0.000000e+00 : f32
    %0 = vector.broadcast %cst : f32 to vector<18x18x128xf32>
    %c0 = arith.constant 0 : index
    %c0_0 = arith.constant 0 : index
    %c0_1 = arith.constant 0 : index
    %1 = vector.load %arg5[%c0, %c0_0, %c0_1] : memref<18x18x128xf32, #tpu.memory_space<vmem>>, vector<18x18x128xf32>
    tpu.vector_store %arg5[%c0, %c0_0, %c0_1], %0 {strides = array<i32>} : memref<18x18x128xf32, #tpu.memory_space<vmem>>, vector<18x18x128xf32>,
    %c0_2 = arith.constant 0 : index
    %c0_3 = arith.constant 0 : index
    %c0_4 = arith.constant 0 : index
    %c0_5 = arith.constant 0 : index
    %2 = vector.load %arg1[%c0_2, %c0_3, %c0_4, %c0_5] : memref<1x16x16x128xf32, #tpu.memory_space<vmem>>, vector<1x16x16x128xf32>
    %3 = vector.shape_cast %2 : vector<1x16x16x128xf32> to vector<16x16x128xf32>
    %c1 = arith.constant 1 : index
    %c1_6 = arith.constant 1 : index
    %c0_7 = arith.constant 0 : index
    %4 = vector.load %arg5[%c1, %c1_6, %c0_7] : memref<18x18x128xf32, #tpu.memory_space<vmem>>, vector<16x16x128xf32>
    tpu.vector_store %arg5[%c1, %c1_6, %c0_7], %3 {strides = array<i32>} : memref<18x18x128xf32, #tpu.memory_space<vmem>>, vector<16x16x128xf32>,
    %c0_8 = arith.constant 0 : index
    %c0_9 = arith.constant 0 : index
    %5 = vector.load %arg2[%c0_8, %c0_9] : memref<1152x128xf32, #tpu.memory_space<vmem>>, vector<1152x128xf32>
    %c0_10 = arith.constant 0 : index
    %c0_11 = arith.constant 0 : index
    %c0_12 = arith.constant 0 : index
    %6 = vector.load %arg5[%c0_10, %c0_11, %c0_12] : memref<18x18x128xf32, #tpu.memory_space<vmem>>, vector<16x16x128xf32>
    %7 = vector.shape_cast %6 : vector<16x16x128xf32> to vector<256x128xf32>
    %c0_13 = arith.constant 0 : index
    %c1_14 = arith.constant 1 : index
    %c0_15 = arith.constant 0 : index
    %8 = vector.load %arg5[%c0_13, %c1_14, %c0_15] : memref<18x18x128xf32, #tpu.memory_space<vmem>>, vector<16x16x128xf32>
    %9 = vector.shape_cast %8 : vector<16x16x128xf32> to vector<256x128xf32>
    %c0_16 = arith.constant 0 : index
    %c2 = arith.constant 2 : index
    %c0_17 = arith.constant 0 : index
    %10 = vector.load %arg5[%c0_16, %c2, %c0_17] : memref<18x18x128xf32, #tpu.memory_space<vmem>>, vector<16x16x128xf32>
    %11 = vector.shape_cast %10 : vector<16x16x128xf32> to vector<256x128xf32>
    %c1_18 = arith.constant 1 : index
    %c0_19 = arith.constant 0 : index
    %c0_20 = arith.constant 0 : index
    %12 = vector.load %arg5[%c1_18, %c0_19, %c0_20] : memref<18x18x128xf32, #tpu.memory_space<vmem>>, vector<16x16x128xf32>
    %13 = vector.shape_cast %12 : vector<16x16x128xf32> to vector<256x128xf32>
    %c1_21 = arith.constant 1 : index
    %c1_22 = arith.constant 1 : index
    %c0_23 = arith.constant 0 : index
    %14 = vector.load %arg5[%c1_21, %c1_22, %c0_23] : memref<18x18x128xf32, #tpu.memory_space<vmem>>, vector<16x16x128xf32>
    %15 = vector.shape_cast %14 : vector<16x16x128xf32> to vector<256x128xf32>
    %c1_24 = arith.constant 1 : index
    %c2_25 = arith.constant 2 : index
    %c0_26 = arith.constant 0 : index
    %16 = vector.load %arg5[%c1_24, %c2_25, %c0_26] : memref<18x18x128xf32, #tpu.memory_space<vmem>>, vector<16x16x128xf32>
    %17 = vector.shape_cast %16 : vector<16x16x128xf32> to vector<256x128xf32>
    %c2_27 = arith.constant 2 : index
    %c0_28 = arith.constant 0 : index
    %c0_29 = arith.constant 0 : index
    %18 = vector.load %arg5[%c2_27, %c0_28, %c0_29] : memref<18x18x128xf32, #tpu.memory_space<vmem>>, vector<16x16x128xf32>
    %19 = vector.shape_cast %18 : vector<16x16x128xf32> to vector<256x128xf32>
    %c2_30 = arith.constant 2 : index
    %c1_31 = arith.constant 1 : index
    %c0_32 = arith.constant 0 : index
    %20 = vector.load %arg5[%c2_30, %c1_31, %c0_32] : memref<18x18x128xf32, #tpu.memory_space<vmem>>, vector<16x16x128xf32>
    %21 = vector.shape_cast %20 : vector<16x16x128xf32> to vector<256x128xf32>
    %c2_33 = arith.constant 2 : index
    %c2_34 = arith.constant 2 : index
    %c0_35 = arith.constant 0 : index
    %22 = vector.load %arg5[%c2_33, %c2_34, %c0_35] : memref<18x18x128xf32, #tpu.memory_space<vmem>>, vector<16x16x128xf32>
    %23 = vector.shape_cast %22 : vector<16x16x128xf32> to vector<256x128xf32>
    %24 = tpu.concatenate %7, %9, %11, %13, %15, %17, %19, %21, %23 in 1 : vector<256x128xf32>, vector<256x128xf32>, vector<256x128xf32>, vector<256x128xf32>, vector<256x128xf32>, vector<256x128xf32>, vector<256x128xf32>, vector<256x128xf32>, vector<256x128xf32> -> vector<256x1152xf32>
    %cst_36 = arith.constant dense<0.000000e+00> : vector<256x128xf32>
    %25 = tpu.matmul %24, %5, %cst_36 {dimension_numbers = #tpu.dot_dimension_numbers<[1], [0], [0], [1], [0, 0, 1, 1], [], []>} : vector<256x1152xf32>, vector<1152x128xf32>, vector<256x128xf32> -> vector<256x128xf32>
    %26 = vector.shape_cast %25 : vector<256x128xf32> to vector<16x16x128xf32>
    %c0_37 = arith.constant 0 : index
    %c0_38 = arith.constant 0 : index
    %c0_39 = arith.constant 0 : index
    %c0_40 = arith.constant 0 : index
    %27 = vector.load %arg3[%c0_37, %c0_38, %c0_39, %c0_40] : memref<1x16x16x128xf32, #tpu.memory_space<vmem>>, vector<1x16x16x128xf32>
    %28 = vector.shape_cast %27 : vector<1x16x16x128xf32> to vector<16x16x128xf32>
    %29 = vector.shape_cast %26 : vector<16x16x128xf32> to vector<1x16x16x128xf32>
    tpu.vector_store %arg3[%c0_37, %c0_38, %c0_39, %c0_40], %29 {strides = array<i32>} : memref<1x16x16x128xf32, #tpu.memory_space<vmem>>, vector<1x16x16x128xf32>,
    %cst_41 = arith.constant dense<0.000000e+00> : vector<128xf32>
    %30 = vector.multi_reduction <add>, %25, %cst_41 [0] : vector<256x128xf32> to vector<128xf32>
    %31 = vector.shape_cast %30 : vector<128xf32> to vector<1x128xf32>
    %32 = arith.mulf %25, %25 : vector<256x128xf32>
    %cst_42 = arith.constant dense<0.000000e+00> : vector<128xf32>
    %33 = vector.multi_reduction <add>, %32, %cst_42 [0] : vector<256x128xf32> to vector<128xf32>
    %34 = vector.shape_cast %33 : vector<128xf32> to vector<1x128xf32>
    %35 = tpu.concatenate %31, %34 in 0 : vector<1x128xf32>, vector<1x128xf32> -> vector<2x128xf32>
    %c0_43 = arith.constant 0 : index
    %c0_44 = arith.constant 0 : index
    %c0_45 = arith.constant 0 : index
    %36 = vector.load %arg4[%c0_43, %c0_44, %c0_45] : memref<1x2x128xf32, #tpu.memory_space<vmem>>, vector<1x2x128xf32>
    %37 = vector.shape_cast %36 : vector<1x2x128xf32> to vector<2x128xf32>
    %38 = vector.shape_cast %35 : vector<2x128xf32> to vector<1x2x128xf32>
    tpu.vector_store %arg4[%c0_43, %c0_44, %c0_45], %38 {strides = array<i32>} : memref<1x2x128xf32, #tpu.memory_space<vmem>>, vector<1x2x128xf32>,
    return
  }
  func.func @transform_0(%arg0: i32) -> (i32, i32, i32, i32) {
    %c0_i32 = arith.constant 0 : i32
    %c0_i32_0 = arith.constant 0 : i32
    %c0_i32_1 = arith.constant 0 : i32
    %c0_i32_2 = arith.constant 0 : i32
    return %arg0, %c0_i32, %c0_i32_0, %c0_i32_1 : i32, i32, i32, i32
  }
  func.func @transform_1(%arg0: i32) -> (i32, i32) {
    %c0_i32 = arith.constant 0 : i32
    %c0_i32_0 = arith.constant 0 : i32
    %c0_i32_1 = arith.constant 0 : i32
    return %c0_i32, %c0_i32_0 : i32, i32
  }
  func.func @transform_2(%arg0: i32) -> (i32, i32, i32, i32) {
    %c0_i32 = arith.constant 0 : i32
    %c0_i32_0 = arith.constant 0 : i32
    %c0_i32_1 = arith.constant 0 : i32
    %c0_i32_2 = arith.constant 0 : i32
    return %arg0, %c0_i32, %c0_i32_0, %c0_i32_1 : i32, i32, i32, i32
  }
  func.func @transform_3(%arg0: i32) -> (i32, i32, i32) {
    %c0_i32 = arith.constant 0 : i32
    %c0_i32_0 = arith.constant 0 : i32
    %c0_i32_1 = arith.constant 0 : i32
    return %arg0, %c0_i32, %c0_i32_0 : i32, i32, i32
  }
}

module attributes {stable_mosaic.version = 11 : i64} {
  func.func @bn2_add_kernel(%arg0: i32, %arg1: memref<1x16x16x128xf32, #tpu.memory_space<vmem>>, %arg2: memref<1x16x16x128xf32, #tpu.memory_space<vmem>>, %arg3: memref<1x128xf32, #tpu.memory_space<vmem>>, %arg4: memref<1x128xf32, #tpu.memory_space<vmem>>, %arg5: memref<1x16x16x128xf32, #tpu.memory_space<vmem>>) attributes {dimension_semantics = [#tpu.dimension_semantics<parallel>], iteration_bounds = array<i64: 2>, scalar_prefetch = 0 : i64, scratch_operands = 0 : i64, tpu.core_type = #tpu.core_type<tc>, window_params = [{transform_indices = @transform_0, window_bounds = array<i64: 1, 16, 16, 128>}, {transform_indices = @transform_1, window_bounds = array<i64: 1, 16, 16, 128>}, {pipeline_mode = #tpu.pipeline_mode<synchronous>, transform_indices = @transform_2, window_bounds = array<i64: 1, 128>}, {pipeline_mode = #tpu.pipeline_mode<synchronous>, transform_indices = @transform_3, window_bounds = array<i64: 1, 128>}, {transform_indices = @transform_4, window_bounds = array<i64: 1, 16, 16, 128>}]} {
    %c0 = arith.constant 0 : index
    %c0_0 = arith.constant 0 : index
    %0 = vector.load %arg3[%c0, %c0_0] : memref<1x128xf32, #tpu.memory_space<vmem>>, vector<1x128xf32>
    %1 = vector.shape_cast %0 : vector<1x128xf32> to vector<1x1x1x128xf32>
    %c0_1 = arith.constant 0 : index
    %c0_2 = arith.constant 0 : index
    %2 = vector.load %arg4[%c0_1, %c0_2] : memref<1x128xf32, #tpu.memory_space<vmem>>, vector<1x128xf32>
    %3 = vector.shape_cast %2 : vector<1x128xf32> to vector<1x1x1x128xf32>
    %c0_3 = arith.constant 0 : index
    %c0_4 = arith.constant 0 : index
    %c0_5 = arith.constant 0 : index
    %c0_6 = arith.constant 0 : index
    %4 = vector.load %arg1[%c0_3, %c0_4, %c0_5, %c0_6] : memref<1x16x16x128xf32, #tpu.memory_space<vmem>>, vector<1x16x16x128xf32>
    %c0_7 = arith.constant 0 : index
    %c0_8 = arith.constant 0 : index
    %c0_9 = arith.constant 0 : index
    %c0_10 = arith.constant 0 : index
    %5 = vector.load %arg2[%c0_7, %c0_8, %c0_9, %c0_10] : memref<1x16x16x128xf32, #tpu.memory_space<vmem>>, vector<1x16x16x128xf32>
    %6 = vector.broadcast %1 : vector<1x1x1x128xf32> to vector<1x16x16x128xf32>
    %7 = arith.mulf %5, %6 : vector<1x16x16x128xf32>
    %8 = arith.addf %4, %7 : vector<1x16x16x128xf32>
    %9 = vector.broadcast %3 : vector<1x1x1x128xf32> to vector<1x16x16x128xf32>
    %10 = arith.addf %8, %9 : vector<1x16x16x128xf32>
    %c0_11 = arith.constant 0 : index
    %c0_12 = arith.constant 0 : index
    %c0_13 = arith.constant 0 : index
    %c0_14 = arith.constant 0 : index
    %11 = vector.load %arg5[%c0_11, %c0_12, %c0_13, %c0_14] : memref<1x16x16x128xf32, #tpu.memory_space<vmem>>, vector<1x16x16x128xf32>
    tpu.vector_store %arg5[%c0_11, %c0_12, %c0_13, %c0_14], %10 {strides = array<i32>} : memref<1x16x16x128xf32, #tpu.memory_space<vmem>>, vector<1x16x16x128xf32>,
    return
  }
  func.func @transform_0(%arg0: i32) -> (i32, i32, i32, i32) {
    %c0_i32 = arith.constant 0 : i32
    %c0_i32_0 = arith.constant 0 : i32
    %c0_i32_1 = arith.constant 0 : i32
    %c0_i32_2 = arith.constant 0 : i32
    return %arg0, %c0_i32, %c0_i32_0, %c0_i32_1 : i32, i32, i32, i32
  }
  func.func @transform_1(%arg0: i32) -> (i32, i32, i32, i32) {
    %c0_i32 = arith.constant 0 : i32
    %c0_i32_0 = arith.constant 0 : i32
    %c0_i32_1 = arith.constant 0 : i32
    %c0_i32_2 = arith.constant 0 : i32
    return %arg0, %c0_i32, %c0_i32_0, %c0_i32_1 : i32, i32, i32, i32
  }
  func.func @transform_2(%arg0: i32) -> (i32, i32) {
    %c0_i32 = arith.constant 0 : i32
    %c0_i32_0 = arith.constant 0 : i32
    %c0_i32_1 = arith.constant 0 : i32
    return %c0_i32, %c0_i32_0 : i32, i32
  }
  func.func @transform_3(%arg0: i32) -> (i32, i32) {
    %c0_i32 = arith.constant 0 : i32
    %c0_i32_0 = arith.constant 0 : i32
    %c0_i32_1 = arith.constant 0 : i32
    return %c0_i32, %c0_i32_0 : i32, i32
  }
  func.func @transform_4(%arg0: i32) -> (i32, i32, i32, i32) {
    %c0_i32 = arith.constant 0 : i32
    %c0_i32_0 = arith.constant 0 : i32
    %c0_i32_1 = arith.constant 0 : i32
    %c0_i32_2 = arith.constant 0 : i32
    return %arg0, %c0_i32, %c0_i32_0, %c0_i32_1 : i32, i32, i32, i32
  }
}

module attributes {stable_mosaic.version = 11 : i64} {
  func.func @bn1_prelu_conv2_kernel(%arg0: i32, %arg1: memref<1x16x16x128xf32, #tpu.memory_space<vmem>>, %arg2: memref<1x128xf32, #tpu.memory_space<vmem>>, %arg3: memref<1x128xf32, #tpu.memory_space<vmem>>, %arg4: memref<1x1xf32, #tpu.memory_space<smem>>, %arg5: memref<1152x128xf32, #tpu.memory_space<vmem>>, %arg6: memref<1x16x16x128xf32, #tpu.memory_space<vmem>>, %arg7: memref<1x2x128xf32, #tpu.memory_space<vmem>>, %arg8: memref<18x18x128xf32, #tpu.memory_space<vmem>>) attributes {dimension_semantics = [#tpu.dimension_semantics<parallel>], iteration_bounds = array<i64: 2>, scalar_prefetch = 0 : i64, scratch_operands = 1 : i64, tpu.core_type = #tpu.core_type<tc>, window_params = [{transform_indices = @transform_0, window_bounds = array<i64: 1, 16, 16, 128>}, {pipeline_mode = #tpu.pipeline_mode<synchronous>, transform_indices = @transform_1, window_bounds = array<i64: 1, 128>}, {pipeline_mode = #tpu.pipeline_mode<synchronous>, transform_indices = @transform_2, window_bounds = array<i64: 1, 128>}, {transform_indices = @transform_3, window_bounds = array<i64: 1, 1>}, {pipeline_mode = #tpu.pipeline_mode<synchronous>, transform_indices = @transform_4, window_bounds = array<i64: 1152, 128>}, {transform_indices = @transform_5, window_bounds = array<i64: 1, 16, 16, 128>}, {transform_indices = @transform_6, window_bounds = array<i64: 1, 2, 128>}]} {
    %c0 = arith.constant 0 : index
    %c0_0 = arith.constant 0 : index
    %c0_1 = arith.constant 0 : index
    %c0_2 = arith.constant 0 : index
    %0 = vector.load %arg1[%c0, %c0_0, %c0_1, %c0_2] : memref<1x16x16x128xf32, #tpu.memory_space<vmem>>, vector<1x16x16x128xf32>
    %1 = vector.shape_cast %0 : vector<1x16x16x128xf32> to vector<16x16x128xf32>
    %2 = vector.shape_cast %1 : vector<16x16x128xf32> to vector<256x128xf32>
    %c0_3 = arith.constant 0 : index
    %c0_4 = arith.constant 0 : index
    %3 = vector.load %arg2[%c0_3, %c0_4] : memref<1x128xf32, #tpu.memory_space<vmem>>, vector<1x128xf32>
    %4 = vector.broadcast %3 : vector<1x128xf32> to vector<256x128xf32>
    %5 = arith.mulf %2, %4 : vector<256x128xf32>
    %c0_5 = arith.constant 0 : index
    %c0_6 = arith.constant 0 : index
    %6 = vector.load %arg3[%c0_5, %c0_6] : memref<1x128xf32, #tpu.memory_space<vmem>>, vector<1x128xf32>
    %7 = vector.broadcast %6 : vector<1x128xf32> to vector<256x128xf32>
    %8 = arith.addf %5, %7 : vector<256x128xf32>
    %c0_7 = arith.constant 0 : index
    %c0_8 = arith.constant 0 : index
    %9 = memref.load %arg4[%c0_7, %c0_8] : memref<1x1xf32, #tpu.memory_space<smem>>
    %cst = arith.constant 0.000000e+00 : f32
    %10 = vector.broadcast %cst : f32 to vector<256x128xf32>
    %11 = arith.cmpf oge, %8, %10 : vector<256x128xf32>
    %12 = vector.broadcast %9 : f32 to vector<256x128xf32>
    %13 = arith.mulf %12, %8 : vector<256x128xf32>
    %14 = arith.select %11, %8, %13 : vector<256x128xi1>, vector<256x128xf32>
    %cst_9 = arith.constant 0.000000e+00 : f32
    %15 = vector.broadcast %cst_9 : f32 to vector<18x18x128xf32>
    %c0_10 = arith.constant 0 : index
    %c0_11 = arith.constant 0 : index
    %c0_12 = arith.constant 0 : index
    %16 = vector.load %arg8[%c0_10, %c0_11, %c0_12] : memref<18x18x128xf32, #tpu.memory_space<vmem>>, vector<18x18x128xf32>
    tpu.vector_store %arg8[%c0_10, %c0_11, %c0_12], %15 {strides = array<i32>} : memref<18x18x128xf32, #tpu.memory_space<vmem>>, vector<18x18x128xf32>,
    %17 = vector.shape_cast %14 : vector<256x128xf32> to vector<16x16x128xf32>
    %c1 = arith.constant 1 : index
    %c1_13 = arith.constant 1 : index
    %c0_14 = arith.constant 0 : index
    %18 = vector.load %arg8[%c1, %c1_13, %c0_14] : memref<18x18x128xf32, #tpu.memory_space<vmem>>, vector<16x16x128xf32>
    tpu.vector_store %arg8[%c1, %c1_13, %c0_14], %17 {strides = array<i32>} : memref<18x18x128xf32, #tpu.memory_space<vmem>>, vector<16x16x128xf32>,
    %c0_15 = arith.constant 0 : index
    %c0_16 = arith.constant 0 : index
    %19 = vector.load %arg5[%c0_15, %c0_16] : memref<1152x128xf32, #tpu.memory_space<vmem>>, vector<1152x128xf32>
    %c0_17 = arith.constant 0 : index
    %c0_18 = arith.constant 0 : index
    %c0_19 = arith.constant 0 : index
    %20 = vector.load %arg8[%c0_17, %c0_18, %c0_19] : memref<18x18x128xf32, #tpu.memory_space<vmem>>, vector<16x16x128xf32>
    %21 = vector.shape_cast %20 : vector<16x16x128xf32> to vector<256x128xf32>
    %c0_20 = arith.constant 0 : index
    %c1_21 = arith.constant 1 : index
    %c0_22 = arith.constant 0 : index
    %22 = vector.load %arg8[%c0_20, %c1_21, %c0_22] : memref<18x18x128xf32, #tpu.memory_space<vmem>>, vector<16x16x128xf32>
    %23 = vector.shape_cast %22 : vector<16x16x128xf32> to vector<256x128xf32>
    %c0_23 = arith.constant 0 : index
    %c2 = arith.constant 2 : index
    %c0_24 = arith.constant 0 : index
    %24 = vector.load %arg8[%c0_23, %c2, %c0_24] : memref<18x18x128xf32, #tpu.memory_space<vmem>>, vector<16x16x128xf32>
    %25 = vector.shape_cast %24 : vector<16x16x128xf32> to vector<256x128xf32>
    %c1_25 = arith.constant 1 : index
    %c0_26 = arith.constant 0 : index
    %c0_27 = arith.constant 0 : index
    %26 = vector.load %arg8[%c1_25, %c0_26, %c0_27] : memref<18x18x128xf32, #tpu.memory_space<vmem>>, vector<16x16x128xf32>
    %27 = vector.shape_cast %26 : vector<16x16x128xf32> to vector<256x128xf32>
    %c1_28 = arith.constant 1 : index
    %c1_29 = arith.constant 1 : index
    %c0_30 = arith.constant 0 : index
    %28 = vector.load %arg8[%c1_28, %c1_29, %c0_30] : memref<18x18x128xf32, #tpu.memory_space<vmem>>, vector<16x16x128xf32>
    %29 = vector.shape_cast %28 : vector<16x16x128xf32> to vector<256x128xf32>
    %c1_31 = arith.constant 1 : index
    %c2_32 = arith.constant 2 : index
    %c0_33 = arith.constant 0 : index
    %30 = vector.load %arg8[%c1_31, %c2_32, %c0_33] : memref<18x18x128xf32, #tpu.memory_space<vmem>>, vector<16x16x128xf32>
    %31 = vector.shape_cast %30 : vector<16x16x128xf32> to vector<256x128xf32>
    %c2_34 = arith.constant 2 : index
    %c0_35 = arith.constant 0 : index
    %c0_36 = arith.constant 0 : index
    %32 = vector.load %arg8[%c2_34, %c0_35, %c0_36] : memref<18x18x128xf32, #tpu.memory_space<vmem>>, vector<16x16x128xf32>
    %33 = vector.shape_cast %32 : vector<16x16x128xf32> to vector<256x128xf32>
    %c2_37 = arith.constant 2 : index
    %c1_38 = arith.constant 1 : index
    %c0_39 = arith.constant 0 : index
    %34 = vector.load %arg8[%c2_37, %c1_38, %c0_39] : memref<18x18x128xf32, #tpu.memory_space<vmem>>, vector<16x16x128xf32>
    %35 = vector.shape_cast %34 : vector<16x16x128xf32> to vector<256x128xf32>
    %c2_40 = arith.constant 2 : index
    %c2_41 = arith.constant 2 : index
    %c0_42 = arith.constant 0 : index
    %36 = vector.load %arg8[%c2_40, %c2_41, %c0_42] : memref<18x18x128xf32, #tpu.memory_space<vmem>>, vector<16x16x128xf32>
    %37 = vector.shape_cast %36 : vector<16x16x128xf32> to vector<256x128xf32>
    %38 = tpu.concatenate %21, %23, %25, %27, %29, %31, %33, %35, %37 in 1 : vector<256x128xf32>, vector<256x128xf32>, vector<256x128xf32>, vector<256x128xf32>, vector<256x128xf32>, vector<256x128xf32>, vector<256x128xf32>, vector<256x128xf32>, vector<256x128xf32> -> vector<256x1152xf32>
    %cst_43 = arith.constant dense<0.000000e+00> : vector<256x128xf32>
    %39 = tpu.matmul %38, %19, %cst_43 {dimension_numbers = #tpu.dot_dimension_numbers<[1], [0], [0], [1], [0, 0, 1, 1], [], []>} : vector<256x1152xf32>, vector<1152x128xf32>, vector<256x128xf32> -> vector<256x128xf32>
    %40 = vector.shape_cast %39 : vector<256x128xf32> to vector<16x16x128xf32>
    %c0_44 = arith.constant 0 : index
    %c0_45 = arith.constant 0 : index
    %c0_46 = arith.constant 0 : index
    %c0_47 = arith.constant 0 : index
    %41 = vector.load %arg6[%c0_44, %c0_45, %c0_46, %c0_47] : memref<1x16x16x128xf32, #tpu.memory_space<vmem>>, vector<1x16x16x128xf32>
    %42 = vector.shape_cast %41 : vector<1x16x16x128xf32> to vector<16x16x128xf32>
    %43 = vector.shape_cast %40 : vector<16x16x128xf32> to vector<1x16x16x128xf32>
    tpu.vector_store %arg6[%c0_44, %c0_45, %c0_46, %c0_47], %43 {strides = array<i32>} : memref<1x16x16x128xf32, #tpu.memory_space<vmem>>, vector<1x16x16x128xf32>,
    %cst_48 = arith.constant dense<0.000000e+00> : vector<128xf32>
    %44 = vector.multi_reduction <add>, %39, %cst_48 [0] : vector<256x128xf32> to vector<128xf32>
    %45 = vector.shape_cast %44 : vector<128xf32> to vector<1x128xf32>
    %46 = arith.mulf %39, %39 : vector<256x128xf32>
    %cst_49 = arith.constant dense<0.000000e+00> : vector<128xf32>
    %47 = vector.multi_reduction <add>, %46, %cst_49 [0] : vector<256x128xf32> to vector<128xf32>
    %48 = vector.shape_cast %47 : vector<128xf32> to vector<1x128xf32>
    %49 = tpu.concatenate %45, %48 in 0 : vector<1x128xf32>, vector<1x128xf32> -> vector<2x128xf32>
    %c0_50 = arith.constant 0 : index
    %c0_51 = arith.constant 0 : index
    %c0_52 = arith.constant 0 : index
    %50 = vector.load %arg7[%c0_50, %c0_51, %c0_52] : memref<1x2x128xf32, #tpu.memory_space<vmem>>, vector<1x2x128xf32>
    %51 = vector.shape_cast %50 : vector<1x2x128xf32> to vector<2x128xf32>
    %52 = vector.shape_cast %49 : vector<2x128xf32> to vector<1x2x128xf32>
    tpu.vector_store %arg7[%c0_50, %c0_51, %c0_52], %52 {strides = array<i32>} : memref<1x2x128xf32, #tpu.memory_space<vmem>>, vector<1x2x128xf32>,
    return
  }
  func.func @transform_0(%arg0: i32) -> (i32, i32, i32, i32) {
    %c0_i32 = arith.constant 0 : i32
    %c0_i32_0 = arith.constant 0 : i32
    %c0_i32_1 = arith.constant 0 : i32
    %c0_i32_2 = arith.constant 0 : i32
    return %arg0, %c0_i32, %c0_i32_0, %c0_i32_1 : i32, i32, i32, i32
  }
  func.func @transform_1(%arg0: i32) -> (i32, i32) {
    %c0_i32 = arith.constant 0 : i32
    %c0_i32_0 = arith.constant 0 : i32
    %c0_i32_1 = arith.constant 0 : i32
    return %c0_i32, %c0_i32_0 : i32, i32
  }
  func.func @transform_2(%arg0: i32) -> (i32, i32) {
    %c0_i32 = arith.constant 0 : i32
    %c0_i32_0 = arith.constant 0 : i32
    %c0_i32_1 = arith.constant 0 : i32
    return %c0_i32, %c0_i32_0 : i32, i32
  }
  func.func @transform_3(%arg0: i32) -> (i32, i32) {
    %c0_i32 = arith.constant 0 : i32
    %c0_i32_0 = arith.constant 0 : i32
    %c0_i32_1 = arith.constant 0 : i32
    return %c0_i32, %c0_i32_0 : i32, i32
  }
  func.func @transform_4(%arg0: i32) -> (i32, i32) {
    %c0_i32 = arith.constant 0 : i32
    %c0_i32_0 = arith.constant 0 : i32
    %c0_i32_1 = arith.constant 0 : i32
    return %c0_i32, %c0_i32_0 : i32, i32
  }
  func.func @transform_5(%arg0: i32) -> (i32, i32, i32, i32) {
    %c0_i32 = arith.constant 0 : i32
    %c0_i32_0 = arith.constant 0 : i32
    %c0_i32_1 = arith.constant 0 : i32
    %c0_i32_2 = arith.constant 0 : i32
    return %arg0, %c0_i32, %c0_i32_0, %c0_i32_1 : i32, i32, i32, i32
  }
  func.func @transform_6(%arg0: i32) -> (i32, i32, i32) {
    %c0_i32 = arith.constant 0 : i32
    %c0_i32_0 = arith.constant 0 : i32
    %c0_i32_1 = arith.constant 0 : i32
    return %arg0, %c0_i32, %c0_i32_0 : i32, i32, i32
  }
}

</mosaic_0001>

<bundles_post_ra>
// kernel: residual_block.5
= control target key start
LH: loop header
LB: loop body
LE: loop exit
PB: predicated region body
PF: predicated region fallthrough
CT: control target
= control target key end

     0   :  { %s550_s15 = smov 0   ;;  %s746_s0 = inlined_call_operand.vmem [shape: f32[2,16,16,128], index: 0, kind: input, shape index: {}]   ;;  %s747_s1 = inlined_call_operand.vmem [shape: f32[2,16,16,128], index: 1, kind: input, shape index: {}]   ;;  %s748_s2 = inlined_call_operand.vmem [shape: f32[1,128], index: 2, kind: input, shape index: {}]   ;;  %s749_s3 = inlined_call_operand.vmem [shape: f32[1,128], index: 3, kind: input, shape index: {}]   ;;  %s750_s4 = inlined_call_operand.vmem [shape: f32[2,16,16,128], index: 4, kind: output, shape index: {}]  }
   0x1 LB: > { %s491_s16 = sadd.s32 4294967295, %s523_s15   ;;  %p495_p0 = scmp.ge.s32.totalorder %s523_s15, 1  ;;  %s523_s15 = sphi %s550_s15, %s14_s15  }
   0x2   : > { %p172_p1 = scmp.lt.s32.totalorder %s523_s15, 3 }
   0x4   : > { %p173_p2 = pnand %p495_p0, %p172_p1 }
   0x5   : > { %p203_p3 = scmp.lt.s32.totalorder (!%p173_p2), %s491_s16, 1  ;;  %v561_v0 = vld [vmem:[%s748_s2] ss:$0 sm:$0xff] (!%p173_p2) }
   0x6   : > { %176 = sbr.rel (%p173_p2) target bundleno = 50 (0x32), region = 36  ;;  %v576_v1 = vld [vmem:[%s749_s3] ss:$0 sm:$0xff] (!%p173_p2) }
   0xd   : > { %s752_s16 = smov (!%p203_p3, %s491_s16), 1 }
   0xe   : > { %s506_s17 = sshll.u32 %s752_s16, 8 }
   0xf   : > { %s566_s22 = scalar_lea.vmem %s746_s0, %s506_s17  ;;  %s571_s25 = scalar_lea.vmem %s747_s1, %s506_s17 }
  0x10   : > { %v220_v2 = vld [vmem:[%s566_s22] sm:$0xff]  ;;  %v221_v4 = vld [vmem:[%s566_s22 + $0x8] sm:$0xff]  ;;  %v222_v7 = vld [vmem:[%s566_s22 + $0x10] sm:$0xff]  ;;  %s597_s30 = scalar_lea.vmem %s750_s4, %s506_s17 }
  0x11   : > { %v252_v3 = vld [vmem:[%s571_s25] sm:$0xff]  ;;  %v253_v6 = vld [vmem:[%s571_s25 + $0x8] sm:$0xff]  ;;  %v254_v8 = vld [vmem:[%s571_s25 + $0x10] sm:$0xff] }
  0x12   : > { %v290_v5 = vmul.f32 %v561_v0, %v252_v3  ;;  %v291_v9 = vmul.f32 %v561_v0, %v253_v6  ;;  %v292_v10 = vmul.f32 %v561_v0, %v254_v8  ;;  %v223_v11 = vld [vmem:[%s566_s22 + $0x18] sm:$0xff]  ;;  %v224_v13 = vld [vmem:[%s566_s22 + $0x20] sm:$0xff]  ;;  %v225_v17 = vld [vmem:[%s566_s22 + $0x28] sm:$0xff] }
  0x13   : > { %v255_v12 = vld [vmem:[%s571_s25 + $0x18] sm:$0xff]  ;;  %v256_v16 = vld [vmem:[%s571_s25 + $0x20] sm:$0xff]  ;;  %v257_v18 = vld [vmem:[%s571_s25 + $0x28] sm:$0xff] }
  0x14   : > { %v322_v14 = vadd.f32 %v290_v5, %v220_v2  ;;  %v293_v15 = vmul.f32 %v561_v0, %v255_v12  ;;  %v323_v19 = vadd.f32 %v291_v9, %v221_v4  ;;  %v324_v20 = vadd.f32 %v292_v10, %v222_v7  ;;  %v226_v23 = vld [vmem:[%s566_s22 + $0x30] sm:$0xff]  ;;  %v227_v28 = vld [vmem:[%s566_s22 + $0x38] sm:$0xff]  ;;  %v260_v30 = vld [vmem:[%s571_s25 + $0x40] sm:$0xff] }
  0x15   : > { %v294_v21 = vmul.f32 %v561_v0, %v256_v16  ;;  %v295_v22 = vmul.f32 %v561_v0, %v257_v18  ;;  %v258_v24 = vld [vmem:[%s571_s25 + $0x30] sm:$0xff]  ;;  %v259_v29 = vld [vmem:[%s571_s25 + $0x38] sm:$0xff]  ;;  %v228_v35 = vld [vmem:[%s566_s22 + $0x40] sm:$0xff]  ;;  %v298_v41 = vmul.f32 %v561_v0, %v260_v30 }
  0x16   : > { %v360_v25 = vadd.f32 %v576_v1, %v322_v14  ;;  %v325_v26 = vadd.f32 %v293_v15, %v223_v11  ;;  %v296_v27 = vmul.f32 %v561_v0, %v258_v24  ;;  %v361_v31 = vadd.f32 %v576_v1, %v323_v19  ;;  %v229_v36 = vld [vmem:[%s566_s22 + $0x48] sm:$0xff]  ;;  %v230_v42 = vld [vmem:[%s566_s22 + $0x50] sm:$0xff]  ;;  %v263_v44 = vld [vmem:[%s571_s25 + $0x58] sm:$0xff] }
  0x17   : > { %v362_v32 = vadd.f32 %v576_v1, %v324_v20  ;;  %v326_v33 = vadd.f32 %v294_v21, %v224_v13  ;;  %v327_v34 = vadd.f32 %v295_v22, %v225_v17  ;;  %v261_v37 = vld [vmem:[%s571_s25 + $0x48] sm:$0xff]  ;;  %v297_v40 = vmul.f32 %v561_v0, %v259_v29  ;;  %v262_v43 = vld [vmem:[%s571_s25 + $0x50] sm:$0xff]  ;;  %v231_v49 = vld [vmem:[%s566_s22 + $0x58] sm:$0xff] }
  0x18   : > { %392 = vst [vmem:[%s597_s30] sm:$0xff] %v360_v25  ;;  %v363_v38 = vadd.f32 %v576_v1, %v325_v26  ;;  %v328_v39 = vadd.f32 %v296_v27, %v226_v23  ;;  %393 = vst [vmem:[%s597_s30 + $0x8] sm:$0xff] %v361_v31  ;;  %v299_v47 = vmul.f32 %v561_v0, %v261_v37  ;;  %v232_v50 = vld [vmem:[%s566_s22 + $0x60] sm:$0xff]  ;;  %v233_v56 = vld [vmem:[%s566_s22 + $0x68] sm:$0xff] }
  0x19   : > { %394 = vst [vmem:[%s597_s30 + $0x10] sm:$0xff] %v362_v32  ;;  %v364_v45 = vadd.f32 %v576_v1, %v326_v33  ;;  %v365_v46 = vadd.f32 %v576_v1, %v327_v34  ;;  %v300_v48 = vmul.f32 %v561_v0, %v262_v43  ;;  %v264_v51 = vld [vmem:[%s571_s25 + $0x60] sm:$0xff]  ;;  %v329_v53 = vadd.f32 %v297_v40, %v227_v28  ;;  %v265_v57 = vld [vmem:[%s571_s25 + $0x68] sm:$0xff]  ;;  %v266_v58 = vld [vmem:[%s571_s25 + $0x70] sm:$0xff] }
  0x1a   : > { %395 = vst [vmem:[%s597_s30 + $0x18] sm:$0xff] %v363_v38  ;;  %v366_v52 = vadd.f32 %v576_v1, %v328_v39  ;;  %v330_v54 = vadd.f32 %v298_v41, %v228_v35  ;;  %v301_v55 = vmul.f32 %v561_v0, %v263_v44  ;;  %v331_v59 = vadd.f32 %v299_v47, %v229_v36  ;;  %v234_v63 = vld [vmem:[%s566_s22 + $0x70] sm:$0xff]  ;;  %v267_v2 = vld [vmem:[%s571_s25 + $0x78] sm:$0xff]  ;;  %v268_v8 = vld [vmem:[%s571_s25 + $0x80] sm:$0xff] }
  0x1b   : > { %396 = vst [vmem:[%s597_s30 + $0x20] sm:$0xff] %v364_v45  ;;  %397 = vst [vmem:[%s597_s30 + $0x28] sm:$0xff] %v365_v46  ;;  %v332_v60 = vadd.f32 %v300_v48, %v230_v42  ;;  %v302_v61 = vmul.f32 %v561_v0, %v264_v51  ;;  %v303_v62 = vmul.f32 %v561_v0, %v265_v57  ;;  %v235_v7 = vld [vmem:[%s566_s22 + $0x78] sm:$0xff]  ;;  %v269_v9 = vld [vmem:[%s571_s25 + $0x88] sm:$0xff] }
  0x1c   : > { %398 = vst [vmem:[%s597_s30 + $0x30] sm:$0xff] %v366_v52  ;;  %v367_v3 = vadd.f32 %v576_v1, %v329_v53  ;;  %v368_v4 = vadd.f32 %v576_v1, %v330_v54  ;;  %v333_v5 = vadd.f32 %v301_v55, %v231_v49  ;;  %v304_v6 = vmul.f32 %v561_v0, %v266_v58  ;;  %v236_v14 = vld [vmem:[%s566_s22 + $0x80] sm:$0xff]  ;;  %v237_v15 = vld [vmem:[%s566_s22 + $0x88] sm:$0xff]  ;;  %v270_v16 = vld [vmem:[%s571_s25 + $0x90] sm:$0xff] }
  0x1d   : > { %v369_v10 = vadd.f32 %v576_v1, %v331_v59  ;;  %v370_v11 = vadd.f32 %v576_v1, %v332_v60  ;;  %v334_v12 = vadd.f32 %v302_v61, %v232_v50  ;;  %v335_v13 = vadd.f32 %v303_v62, %v233_v56  ;;  %v238_v21 = vld [vmem:[%s566_s22 + $0x90] sm:$0xff]  ;;  %v271_v22 = vld [vmem:[%s571_s25 + $0x98] sm:$0xff]  ;;  %v272_v23 = vld [vmem:[%s571_s25 + $0xa0] sm:$0xff] }
  0x1e   : > { %399 = vst [vmem:[%s597_s30 + $0x38] sm:$0xff] %v367_v3  ;;  %400 = vst [vmem:[%s597_s30 + $0x40] sm:$0xff] %v368_v4  ;;  %v371_v17 = vadd.f32 %v576_v1, %v333_v5  ;;  %v336_v18 = vadd.f32 %v304_v6, %v234_v63  ;;  %v305_v19 = vmul.f32 %v561_v0, %v267_v2  ;;  %v239_v28 = vld [vmem:[%s566_s22 + $0x98] sm:$0xff]  ;;  %v273_v29 = vld [vmem:[%s571_s25 + $0xa8] sm:$0xff] }
  0x1f   : > { %v306_v20 = vmul.f32 %v561_v0, %v268_v8  ;;  %401 = vst [vmem:[%s597_s30 + $0x48] sm:$0xff] %v369_v10  ;;  %402 = vst [vmem:[%s597_s30 + $0x50] sm:$0xff] %v370_v11  ;;  %v372_v24 = vadd.f32 %v576_v1, %v334_v12  ;;  %v373_v25 = vadd.f32 %v576_v1, %v335_v13  ;;  %v240_v34 = vld [vmem:[%s566_s22 + $0xa0] sm:$0xff]  ;;  %v241_v35 = vld [vmem:[%s566_s22 + $0xa8] sm:$0xff] }
  0x20   : > { %v307_v26 = vmul.f32 %v561_v0, %v269_v9  ;;  %v308_v27 = vmul.f32 %v561_v0, %v270_v16  ;;  %403 = vst [vmem:[%s597_s30 + $0x58] sm:$0xff] %v371_v17  ;;  %v374_v30 = vadd.f32 %v576_v1, %v336_v18  ;;  %v337_v31 = vadd.f32 %v305_v19, %v235_v7  ;;  %v274_v36 = vld [vmem:[%s571_s25 + $0xb0] sm:$0xff]  ;;  %v275_v42 = vld [vmem:[%s571_s25 + $0xb8] sm:$0xff]  ;;  %v276_v43 = vld [vmem:[%s571_s25 + $0xc0] sm:$0xff] }
  0x21   : > { %v338_v32 = vadd.f32 %v306_v20, %v236_v14  ;;  %v309_v33 = vmul.f32 %v561_v0, %v271_v22  ;;  %404 = vst [vmem:[%s597_s30 + $0x60] sm:$0xff] %v372_v24  ;;  %405 = vst [vmem:[%s597_s30 + $0x68] sm:$0xff] %v373_v25  ;;  %v310_v39 = vmul.f32 %v561_v0, %v272_v23  ;;  %v242_v41 = vld [vmem:[%s566_s22 + $0xb0] sm:$0xff]  ;;  %v243_v48 = vld [vmem:[%s566_s22 + $0xb8] sm:$0xff] }
  0x22   : > { %v339_v37 = vadd.f32 %v307_v26, %v237_v15  ;;  %v340_v38 = vadd.f32 %v308_v27, %v238_v21  ;;  %v311_v40 = vmul.f32 %v561_v0, %v273_v29  ;;  %406 = vst [vmem:[%s597_s30 + $0x70] sm:$0xff] %v374_v30  ;;  %v375_v44 = vadd.f32 %v576_v1, %v337_v31  ;;  %v277_v49 = vld [vmem:[%s571_s25 + $0xc8] sm:$0xff]  ;;  %v278_v50 = vld [vmem:[%s571_s25 + $0xd0] sm:$0xff]  ;;  %v244_v55 = vld [vmem:[%s566_s22 + $0xc0] sm:$0xff] }
  0x23   : > { %v376_v45 = vadd.f32 %v576_v1, %v338_v32  ;;  %v341_v46 = vadd.f32 %v309_v33, %v239_v28  ;;  %v312_v47 = vmul.f32 %v561_v0, %v274_v36  ;;  %v342_v53 = vadd.f32 %v310_v39, %v240_v34  ;;  %v245_v56 = vld [vmem:[%s566_s22 + $0xc8] sm:$0xff]  ;;  %v279_v57 = vld [vmem:[%s571_s25 + $0xd8] sm:$0xff]  ;;  %v246_v62 = vld [vmem:[%s566_s22 + $0xd0] sm:$0xff] }
  0x24   : > { %v377_v51 = vadd.f32 %v576_v1, %v339_v37  ;;  %v378_v52 = vadd.f32 %v576_v1, %v340_v38  ;;  %v343_v54 = vadd.f32 %v311_v40, %v241_v35  ;;  %407 = vst [vmem:[%s597_s30 + $0x78] sm:$0xff] %v375_v44  ;;  %v313_v60 = vmul.f32 %v561_v0, %v275_v42  ;;  %v280_v63 = vld [vmem:[%s571_s25 + $0xe0] sm:$0xff]  ;;  %v281_v2 = vld [vmem:[%s571_s25 + $0xe8] sm:$0xff]  ;;  %v247_v7 = vld [vmem:[%s566_s22 + $0xd8] sm:$0xff] }
  0x25   : > { %408 = vst [vmem:[%s597_s30 + $0x80] sm:$0xff] %v376_v45  ;;  %v379_v58 = vadd.f32 %v576_v1, %v341_v46  ;;  %v344_v59 = vadd.f32 %v312_v47, %v242_v41  ;;  %v314_v61 = vmul.f32 %v561_v0, %v276_v43  ;;  %v380_v3 = vadd.f32 %v576_v1, %v342_v53  ;;  %v282_v8 = vld [vmem:[%s571_s25 + $0xf0] sm:$0xff]  ;;  %v248_v13 = vld [vmem:[%s566_s22 + $0xe0] sm:$0xff]  ;;  %v249_v14 = vld [vmem:[%s566_s22 + $0xe8] sm:$0xff] }
  0x26   : > { %409 = vst [vmem:[%s597_s30 + $0x88] sm:$0xff] %v377_v51  ;;  %410 = vst [vmem:[%s597_s30 + $0x90] sm:$0xff] %v378_v52  ;;  %v381_v4 = vadd.f32 %v576_v1, %v343_v54  ;;  %v315_v5 = vmul.f32 %v561_v0, %v277_v49  ;;  %v316_v6 = vmul.f32 %v561_v0, %v278_v50  ;;  %v250_v19 = vld [vmem:[%s566_s22 + $0xf0] sm:$0xff]  ;;  %v283_v20 = vld [vmem:[%s571_s25 + $0xf8] sm:$0xff] }
  0x27   : > { %411 = vst [vmem:[%s597_s30 + $0x98] sm:$0xff] %v379_v58  ;;  %v382_v9 = vadd.f32 %v576_v1, %v344_v59  ;;  %v345_v10 = vadd.f32 %v313_v60, %v243_v48  ;;  %v346_v11 = vadd.f32 %v314_v61, %v244_v55  ;;  %v317_v12 = vmul.f32 %v561_v0, %v279_v57  ;;  %v251_v29 = vld [vmem:[%s566_s22 + $0xf8] sm:$0xff] }
  0x28   : > { %412 = vst [vmem:[%s597_s30 + $0xa0] sm:$0xff] %v380_v3  ;;  %413 = vst [vmem:[%s597_s30 + $0xa8] sm:$0xff] %v381_v4  ;;  %v347_v15 = vadd.f32 %v315_v5, %v245_v56  ;;  %v348_v16 = vadd.f32 %v316_v6, %v246_v62  ;;  %v318_v17 = vmul.f32 %v561_v0, %v280_v63 }
  0x29   : > { %v319_v18 = vmul.f32 %v561_v0, %v281_v2  ;;  %414 = vst [vmem:[%s597_s30 + $0xb0] sm:$0xff] %v382_v9  ;;  %v383_v21 = vadd.f32 %v576_v1, %v345_v10  ;;  %v384_v22 = vadd.f32 %v576_v1, %v346_v11  ;;  %v349_v23 = vadd.f32 %v317_v12, %v247_v7 }
  0x2a   : > { %v320_v24 = vmul.f32 %v561_v0, %v282_v8  ;;  %v385_v25 = vadd.f32 %v576_v1, %v347_v15  ;;  %v386_v26 = vadd.f32 %v576_v1, %v348_v16  ;;  %v350_v27 = vadd.f32 %v318_v17, %v248_v13 }
  0x2b   : > { %v351_v28 = vadd.f32 %v319_v18, %v249_v14  ;;  %415 = vst [vmem:[%s597_s30 + $0xb8] sm:$0xff] %v383_v21  ;;  %416 = vst [vmem:[%s597_s30 + $0xc0] sm:$0xff] %v384_v22  ;;  %v387_v30 = vadd.f32 %v576_v1, %v349_v23  ;;  %v321_v32 = vmul.f32 %v561_v0, %v283_v20 }
  0x2c   : > { %v352_v31 = vadd.f32 %v320_v24, %v250_v19  ;;  %417 = vst [vmem:[%s597_s30 + $0xc8] sm:$0xff] %v385_v25  ;;  %418 = vst [vmem:[%s597_s30 + $0xd0] sm:$0xff] %v386_v26  ;;  %v388_v33 = vadd.f32 %v576_v1, %v350_v27 }
  0x2d   : > { %v389_v34 = vadd.f32 %v576_v1, %v351_v28  ;;  %419 = vst [vmem:[%s597_s30 + $0xd8] sm:$0xff] %v387_v30  ;;  %v353_v36 = vadd.f32 %v321_v32, %v251_v29 }
  0x2e   : > { %v390_v35 = vadd.f32 %v576_v1, %v352_v31  ;;  %420 = vst [vmem:[%s597_s30 + $0xe0] sm:$0xff] %v388_v33 }
  0x2f   : > { %421 = vst [vmem:[%s597_s30 + $0xe8] sm:$0xff] %v389_v34  ;;  %v391_v37 = vadd.f32 %v576_v1, %v353_v36 }
  0x30   : > { %422 = vst [vmem:[%s597_s30 + $0xf0] sm:$0xff] %v390_v35 }
  0x31   : > { %423 = vst [vmem:[%s597_s30 + $0xf8] sm:$0xff] %v391_v37 }
  0x32 PF: > { %s14_s15 = sadd.s32 1, %s523_s15  }
  0x33   : > { %p11_p4 = scmp.ge.s32.totalorder %s14_s15, 4  }
  0x35   :  { %13 = sbr.rel (!%p11_p4) target bundleno = 1 (0x1), region = 69 }

// kernel: residual_block.3
= control target key start
LH: loop header
LB: loop body
LE: loop exit
PB: predicated region body
PF: predicated region fallthrough
CT: control target
= control target key end

     0   :  { %s2693_s12 = smov 0   ;;  %s4190_s0 = inlined_call_operand.vmem [shape: f32[2,16,16,128], index: 0, kind: input, shape index: {}]   ;;  %s4191_s1 = inlined_call_operand.vmem [shape: f32[1152,128], index: 1, kind: input, shape index: {}]   ;;  %s4192_s2 = inlined_call_operand.vmem [shape: f32[2,16,16,128], index: 2, kind: output, shape index: {0}]   ;;  %s4193_s3 = inlined_call_operand.vmem [shape: f32[2,2,128], index: 3, kind: output, shape index: {1}]  }
   0x1 LB: > { %s2086_s13 = sadd.s32 4294967295, %s2669_s12   ;;  %p2090_p0 = scmp.ge.s32.totalorder %s2669_s12, 1  ;;  %s2669_s12 = sphi %s2693_s12, %s14_s12  }
   0x2   : > { %p140_p1 = scmp.lt.s32.totalorder %s2669_s12, 3 }
   0x4   : > { %p141_p2 = pnand %p2090_p0, %p140_p1 }
   0x6   : > { %144 = sbr.rel (%p141_p2) target bundleno = 646 (0x286), region = 28 }
   0xd   : > { %v2704_v0 = vld [vmem:[%s4191_s1] sm:$0xff]  ;;  %v2709_v1 = vld [vmem:[%s4191_s1 + $0x8] sm:$0xff]  ;;  %v4195_v3 = vmov 0.0|0.0   ;;  %v2728_v6 = vld [vmem:[%s4191_s1 + $0x10] sm:$0xff]  ;;  %v2672_v8 = vmov 0.0   ;;  %p168_p3 = scmp.lt.s32.totalorder %s2086_s13, 1 }
   0xe   : > { %v2714_v2 = vld [vmem:[%s4191_s1 + $0x100] sm:$0xff]  ;;  %2228 = vmatprep.subr.bf16.mxu1 %v4195_v3  ;;  %2276 = vmatprep.subr.bf16.mxu0 %v4195_v3  ;;  %v2229_v4 = vpack.c.bf16 %v2709_v1, %v2704_v0  ;;  %v2723_v5 = vld [vmem:[%s4191_s1 + $0x108] sm:$0xff]  ;;  %v2733_v7 = vld [vmem:[%s4191_s1 + $0x18] sm:$0xff]  ;;  %182 = vst [vmem:[#allocation2] sm:$0xff] %v2672_v8  ;;  %vm1997_vm0 = vcmask 1040384  }
   0xf   : > { %183 = vst [vmem:[#allocation2 + $0x8] sm:$0xff] %v2672_v8  ;;  %184 = vst [vmem:[#allocation2 + $0x10] sm:$0x3] %v2672_v8  ;;  %v2277_v9 = vpack.c.bf16 %v2723_v5, %v2714_v2  ;;  %v335_v10 = vld [vmem:[%s4191_s1 + $0x110] sm:$0xff]  ;;  %v336_v11 = vld [vmem:[%s4191_s1 + $0x118] sm:$0xff]  ;;  %v2232_v12 = vpack.c.bf16 %v2733_v7, %v2728_v6  ;;  %s4307_s13 = smov (!%p168_p3, %s2086_s13), 1 }
  0x10   : > { %185 = vst [vmem:[#allocation2 + $0x18] sm:$0xff] %v2672_v8  ;;  %186 = vst [vmem:[#allocation2 + $0x20] sm:$0xff] %v2672_v8  ;;  %2230 = vmatpush1.bf16.msra.mxu1 %v2229_v4  ;;  %v2280_v13 = vpack.c.bf16 %v336_v11, %v335_v10  ;;  %v305_v14 = vld [vmem:[%s4191_s1 + $0x20] sm:$0xff]  ;;  %v306_v15 = vld [vmem:[%s4191_s1 + $0x28] sm:$0xff]  ;;  %s2098_s29 = sshll.u32 %s4307_s13, 8 }
  0x11   : > { %187 = vst [vmem:[#allocation2 + $0x28] sm:$0x3] %v2672_v8  ;;  %188 = vst [vmem:[#allocation2 + $0x30] sm:$0xff] %v2672_v8  ;;  %2278 = vmatpush1.bf16.msra.mxu0 %v2277_v9  ;;  %2231 = vmatprep.subr.bf16.mxu1 %v4195_v3  ;;  %v337_v16 = vld [vmem:[%s4191_s1 + $0x120] sm:$0xff]  ;;  %v338_v17 = vld [vmem:[%s4191_s1 + $0x128] sm:$0xff]  ;;  %v2235_v18 = vpack.c.bf16 %v306_v15, %v305_v14  ;;  %s2867_s15 = scalar_lea.vmem %s4190_s0, %s2098_s29  ;;  %s3948_s22 = scalar_lea.vmem %s4192_s2, %s2098_s29 }
  0x12   : > { %189 = vst [vmem:[#allocation2 + $0x38] sm:$0xff] %v2672_v8  ;;  %190 = vst [vmem:[#allocation2 + $0x40] sm:$0x3] %v2672_v8  ;;  %2279 = vmatprep.subr.bf16.mxu0 %v4195_v3  ;;  %v2283_v19 = vpack.c.bf16 %v338_v17, %v337_v16  ;;  %v307_v20 = vld [vmem:[%s4191_s1 + $0x30] sm:$0xff]  ;;  %v308_v21 = vld [vmem:[%s4191_s1 + $0x38] sm:$0xff]  ;;  %s2095_s29 = sshll.u32 %s4307_s13, 1 }
  0x13   : > { %191 = vst [vmem:[#allocation2 + $0x48] sm:$0xff] %v2672_v8  ;;  %192 = vst [vmem:[#allocation2 + $0x50] sm:$0xff] %v2672_v8  ;;  %v339_v22 = vld [vmem:[%s4191_s1 + $0x130] sm:$0xff]  ;;  %v340_v23 = vld [vmem:[%s4191_s1 + $0x138] sm:$0xff]  ;;  %v2238_v24 = vpack.c.bf16 %v308_v21, %v307_v20  ;;  %s181_s25 = scalar_lea.vmem %s4193_s3, %s2095_s29 }
  0x14   : > { %193 = vst [vmem:[#allocation2 + $0x58] sm:$0x3] %v2672_v8  ;;  %194 = vst [vmem:[#allocation2 + $0x60] sm:$0xff] %v2672_v8  ;;  %2233 = vmatpush1.bf16.msra.mxu1 %v2232_v12  ;;  %v2286_v25 = vpack.c.bf16 %v340_v23, %v339_v22  ;;  %v309_v26 = vld [vmem:[%s4191_s1 + $0x40] sm:$0xff]  ;;  %v310_v27 = vld [vmem:[%s4191_s1 + $0x48] sm:$0xff] }
  0x15   : > { %195 = vst [vmem:[#allocation2 + $0x68] sm:$0xff] %v2672_v8  ;;  %196 = vst [vmem:[#allocation2 + $0x70] sm:$0x3] %v2672_v8  ;;  %2281 = vmatpush1.bf16.msra.mxu0 %v2280_v13  ;;  %2234 = vmatprep.subr.bf16.mxu1 %v4195_v3  ;;  %v341_v28 = vld [vmem:[%s4191_s1 + $0x140] sm:$0xff]  ;;  %v342_v29 = vld [vmem:[%s4191_s1 + $0x148] sm:$0xff]  ;;  %v2241_v30 = vpack.c.bf16 %v310_v27, %v309_v26 }
  0x16   : > { %197 = vst [vmem:[#allocation2 + $0x78] sm:$0xff] %v2672_v8  ;;  %198 = vst [vmem:[#allocation2 + $0x80] sm:$0xff] %v2672_v8  ;;  %2282 = vmatprep.subr.bf16.mxu0 %v4195_v3  ;;  %v2289_v31 = vpack.c.bf16 %v342_v29, %v341_v28  ;;  %v311_v32 = vld [vmem:[%s4191_s1 + $0x50] sm:$0xff]  ;;  %v312_v33 = vld [vmem:[%s4191_s1 + $0x58] sm:$0xff] }
  0x17   : > { %199 = vst [vmem:[#allocation2 + $0x88] sm:$0x3] %v2672_v8  ;;  %200 = vst [vmem:[#allocation2 + $0x90] sm:$0xff] %v2672_v8  ;;  %v343_v34 = vld [vmem:[%s4191_s1 + $0x150] sm:$0xff]  ;;  %v344_v35 = vld [vmem:[%s4191_s1 + $0x158] sm:$0xff]  ;;  %v2244_v36 = vpack.c.bf16 %v312_v33, %v311_v32 }
  0x18   : > { %201 = vst [vmem:[#allocation2 + $0x98] sm:$0xff] %v2672_v8  ;;  %202 = vst [vmem:[#allocation2 + $0xa0] sm:$0x3] %v2672_v8  ;;  %2236 = vmatpush1.bf16.msra.mxu1 %v2235_v18  ;;  %v2292_v37 = vpack.c.bf16 %v344_v35, %v343_v34  ;;  %v313_v38 = vld [vmem:[%s4191_s1 + $0x60] sm:$0xff]  ;;  %v314_v39 = vld [vmem:[%s4191_s1 + $0x68] sm:$0xff] }
  0x19   : > { %203 = vst [vmem:[#allocation2 + $0xa8] sm:$0xff] %v2672_v8  ;;  %204 = vst [vmem:[#allocation2 + $0xb0] sm:$0xff] %v2672_v8  ;;  %2284 = vmatpush1.bf16.msra.mxu0 %v2283_v19  ;;  %2237 = vmatprep.subr.bf16.mxu1 %v4195_v3  ;;  %v345_v40 = vld [vmem:[%s4191_s1 + $0x160] sm:$0xff]  ;;  %v346_v41 = vld [vmem:[%s4191_s1 + $0x168] sm:$0xff]  ;;  %v2247_v44 = vpack.c.bf16 %v314_v39, %v313_v38 }
  0x1a   : > { %205 = vst [vmem:[#allocation2 + $0xb8] sm:$0x3] %v2672_v8  ;;  %206 = vst [vmem:[#allocation2 + $0xc0] sm:$0xff] %v2672_v8  ;;  %2285 = vmatprep.subr.bf16.mxu0 %v4195_v3  ;;  %v477_v42 = vld [vmem:[#allocation2 + $0x1] sm:$0xff]  ;;  %v315_v45 = vld [vmem:[%s4191_s1 + $0x70] sm:$0xff]  ;;  %v2295_v47 = vpack.c.bf16 %v346_v41, %v345_v40 }
  0x1b   : > { %207 = vst [vmem:[#allocation2 + $0xc8] sm:$0xff] %v2672_v8  ;;  %208 = vst [vmem:[#allocation2 + $0xd0] sm:$0x3] %v2672_v8  ;;  %v2884_v43 = vld [vmem:[%s2867_s15] sm:$0xff]  ;;  %798 = vmatprep.mubr.f32.mxu1 %v477_v42  ;;  %v2891_v46 = vld [vmem:[%s2867_s15 + $0x8] sm:$0xff] }
  0x1c   : > { %209 = vst [vmem:[#allocation2 + $0xd8] sm:$0xff] %v2672_v8  ;;  %210 = vst [vmem:[#allocation2 + $0xe0] sm:$0xff] %v2672_v8  ;;  %2239 = vmatpush1.bf16.msra.mxu1 %v2238_v24  ;;  %v316_v48 = vld [vmem:[%s4191_s1 + $0x78] sm:$0xff]  ;;  %v347_v49 = vld [vmem:[%s4191_s1 + $0x170] sm:$0xff] }
  0x1d   : > { %211 = vst [vmem:[#allocation2 + $0xe8] sm:$0x3] %v2672_v8  ;;  %212 = vst [vmem:[#allocation2 + $0xf0] sm:$0xff] %v2672_v8  ;;  %2287 = vmatpush1.bf16.msra.mxu0 %v2286_v25  ;;  %2240 = vmatprep.subr.bf16.mxu1 %v4195_v3  ;;  %v2902_v50 = vld [vmem:[%s2867_s15 + $0x10] sm:$0xff]  ;;  %v348_v51 = vld [vmem:[%s4191_s1 + $0x178] sm:$0xff]  ;;  %v2250_v56 = vpack.c.bf16 %v316_v48, %v315_v45 }
  0x1e   : > { %213 = vst [vmem:[#allocation2 + $0xf8] sm:$0xff] %v2672_v8  ;;  %214 = vst [vmem:[#allocation2 + $0x100] sm:$0x3] %v2672_v8  ;;  %2288 = vmatprep.subr.bf16.mxu0 %v4195_v3  ;;  %v2910_v52 = vld [vmem:[%s2867_s15 + $0x18] sm:$0xff]  ;;  %v2913_v53 = vld [vmem:[%s2867_s15 + $0x20] sm:$0xff]  ;;  %v2298_v60 = vpack.c.bf16 %v348_v51, %v347_v49 }
  0x1f   : > { %215 = vst [vmem:[#allocation2 + $0x108] sm:$0xff] %v2672_v8  ;;  %216 = vst [vmem:[#allocation2 + $0x110] sm:$0xff] %v2672_v8  ;;  %v2918_v54 = vld [vmem:[%s2867_s15 + $0x28] sm:$0xff]  ;;  %v2921_v55 = vld [vmem:[%s2867_s15 + $0x30] sm:$0xff] }
  0x20   : > { %217 = vst [vmem:[#allocation2 + $0x118] sm:$0x3] %v2672_v8  ;;  %218 = vst [vmem:[#allocation2 + $0x120] sm:$0xff] %v2672_v8  ;;  %2242 = vmatpush1.bf16.msra.mxu1 %v2241_v30  ;;  %v317_v57 = vld [vmem:[%s4191_s1 + $0x80] sm:$0xff]  ;;  %v318_v58 = vld [vmem:[%s4191_s1 + $0x88] sm:$0xff] }
  0x21   : > { %219 = vst [vmem:[#allocation2 + $0x128] sm:$0xff] %v2672_v8  ;;  %220 = vst [vmem:[#allocation2 + $0x130] sm:$0x3] %v2672_v8  ;;  %2290 = vmatpush1.bf16.msra.mxu0 %v2289_v31  ;;  %2243 = vmatprep.subr.bf16.mxu1 %v4195_v3  ;;  %v2932_v59 = vld [vmem:[%s2867_s15 + $0x38] sm:$0xff]  ;;  %v349_v61 = vld [vmem:[%s4191_s1 + $0x180] sm:$0xff]  ;;  %v2253_v5 = vpack.c.bf16 %v318_v58, %v317_v57 }
  0x22   : > { %221 = vst [vmem:[#allocation2 + $0x138] sm:$0xff] %v2672_v8  ;;  %222 = vst [vmem:[#allocation2 + $0x140] sm:$0xff] %v2672_v8  ;;  %2291 = vmatprep.subr.bf16.mxu0 %v4195_v3  ;;  %v350_v62 = vld [vmem:[%s4191_s1 + $0x188] sm:$0xff]  ;;  %v2943_v63 = vld [vmem:[%s2867_s15 + $0x40] sm:$0xff] }
  0x23   : > { %223 = vst [vmem:[#allocation2 + $0x148] sm:$0x3] %v2672_v8  ;;  %224 = vst [vmem:[#allocation2 + $0x150] sm:$0xff] %v2672_v8  ;;  %v2950_v1 = vld [vmem:[%s2867_s15 + $0x48] sm:$0xff]  ;;  %v2953_v2 = vld [vmem:[%s2867_s15 + $0x50] sm:$0xff]  ;;  %v2301_v6 = vpack.c.bf16 %v350_v62, %v349_v61 }
  0x24   : > { %225 = vst [vmem:[#allocation2 + $0x158] sm:$0xff] %v2672_v8  ;;  %226 = vst [vmem:[#allocation2 + $0x160] sm:$0x3] %v2672_v8  ;;  %2245 = vmatpush1.bf16.msra.mxu1 %v2244_v36  ;;  %v2959_v4 = vld [vmem:[%s2867_s15 + $0x58] sm:$0xff]  ;;  %v319_v7 = vld [vmem:[%s4191_s1 + $0x90] sm:$0xff] }
  0x25   : > { %227 = vst [vmem:[#allocation2 + $0x168] sm:$0xff] %v2672_v8  ;;  %228 = vst [vmem:[#allocation2 + $0x170] sm:$0xff] %v2672_v8  ;;  %2293 = vmatpush1.bf16.msra.mxu0 %v2292_v37  ;;  %2246 = vmatprep.subr.bf16.mxu1 %v4195_v3  ;;  %v320_v9 = vld [vmem:[%s4191_s1 + $0x98] sm:$0xff]  ;;  %v2970_v10 = vld [vmem:[%s2867_s15 + $0x60] sm:$0xff] }
  0x26   : > { %229 = vst [vmem:[#allocation2 + $0x178] sm:$0x3] %v2672_v8  ;;  %230 = vst [vmem:[#allocation2 + $0x180] sm:$0xff] %v2672_v8  ;;  %2294 = vmatprep.subr.bf16.mxu0 %v4195_v3  ;;  %v351_v11 = vld [vmem:[%s4191_s1 + $0x190] sm:$0xff]  ;;  %v352_v12 = vld [vmem:[%s4191_s1 + $0x198] sm:$0xff]  ;;  %v2256_v13 = vpack.c.bf16 %v320_v9, %v319_v7 }
  0x27   : > { %231 = vst [vmem:[#allocation2 + $0x188] sm:$0xff] %v2672_v8  ;;  %232 = vst [vmem:[#allocation2 + $0x190] sm:$0x3] %v2672_v8  ;;  %v2304_v14 = vpack.c.bf16 %v352_v12, %v351_v11  ;;  %v321_v15 = vld [vmem:[%s4191_s1 + $0xa0] sm:$0xff]  ;;  %v322_v16 = vld [vmem:[%s4191_s1 + $0xa8] sm:$0xff] }
  0x28   : > { %233 = vst [vmem:[#allocation2 + $0x198] sm:$0xff] %v2672_v8  ;;  %234 = vst [vmem:[#allocation2 + $0x1a0] sm:$0xff] %v2672_v8  ;;  %2248 = vmatpush1.bf16.msra.mxu1 %v2247_v44  ;;  %v353_v17 = vld [vmem:[%s4191_s1 + $0x1a0] sm:$0xff]  ;;  %v354_v18 = vld [vmem:[%s4191_s1 + $0x1a8] sm:$0xff]  ;;  %v2259_v19 = vpack.c.bf16 %v322_v16, %v321_v15 }
  0x29   : > { %235 = vst [vmem:[#allocation2 + $0x1a8] sm:$0x3] %v2672_v8  ;;  %269 = vst [vmem:[#allocation2 + $0x19] sm:$0xff] %v2884_v43  ;;  %2296 = vmatpush1.bf16.msra.mxu0 %v2295_v47  ;;  %2249 = vmatprep.subr.bf16.mxu1 %v4195_v3  ;;  %v2307_v20 = vpack.c.bf16 %v354_v18, %v353_v17  ;;  %v323_v21 = vld [vmem:[%s4191_s1 + $0xb0] sm:$0xff]  ;;  %v324_v22 = vld [vmem:[%s4191_s1 + $0xb8] sm:$0xff] }
  0x2a   : > { %270 = vst [vmem:[#allocation2 + $0x21] sm:$0xff] %v2891_v46  ;;  %271 = vst [vmem:[#allocation2 + $0x31] sm:$0xff] %v2902_v50  ;;  %2297 = vmatprep.subr.bf16.mxu0 %v4195_v3  ;;  %v3002_v23 = vld [vmem:[%s2867_s15 + $0x68] sm:$0xff]  ;;  %v355_v24 = vld [vmem:[%s4191_s1 + $0x1b0] sm:$0xff]  ;;  %v2262_v28 = vpack.c.bf16 %v324_v22, %v323_v21 }
  0x2b   : > { %272 = vst [vmem:[#allocation2 + $0x39] sm:$0xff] %v2910_v52  ;;  %273 = vst [vmem:[#allocation2 + $0x49] sm:$0xff] %v2913_v53  ;;  %v356_v25 = vld [vmem:[%s4191_s1 + $0x1b8] sm:$0xff]  ;;  %v3013_v26 = vld [vmem:[%s2867_s15 + $0x70] sm:$0xff] }
  0x2c   : > { %274 = vst [vmem:[#allocation2 + $0x51] sm:$0xff] %v2918_v54  ;;  %275 = vst [vmem:[#allocation2 + $0x61] sm:$0xff] %v2921_v55  ;;  %2251 = vmatpush1.bf16.msra.mxu1 %v2250_v56  ;;  %v3017_v27 = vld [vmem:[%s2867_s15 + $0x78] sm:$0xff]  ;;  %v3021_v29 = vld [vmem:[%s2867_s15 + $0x80] sm:$0xff]  ;;  %v2310_v30 = vpack.c.bf16 %v356_v25, %v355_v24 }
  0x2d   : > { %276 = vst [vmem:[#allocation2 + $0x69] sm:$0xff] %v2932_v59  ;;  %277 = vst [vmem:[#allocation2 + $0x79] sm:$0xff] %v2943_v63  ;;  %2299 = vmatpush1.bf16.msra.mxu0 %v2298_v60  ;;  %2252 = vmatprep.subr.bf16.mxu1 %v4195_v3  ;;  %v325_v31 = vld [vmem:[%s4191_s1 + $0xc0] sm:$0xff]  ;;  %v326_v32 = vld [vmem:[%s4191_s1 + $0xc8] sm:$0xff] }
  0x2e   : > { %278 = vst [vmem:[#allocation2 + $0x81] sm:$0xff] %v2950_v1  ;;  %279 = vst [vmem:[#allocation2 + $0x91] sm:$0xff] %v2953_v2  ;;  %2300 = vmatprep.subr.bf16.mxu0 %v4195_v3  ;;  %v3032_v33 = vld [vmem:[%s2867_s15 + $0x88] sm:$0xff]  ;;  %v357_v34 = vld [vmem:[%s4191_s1 + $0x1c0] sm:$0xff]  ;;  %v2265_v38 = vpack.c.bf16 %v326_v32, %v325_v31 }
  0x2f   : > { %280 = vst [vmem:[#allocation2 + $0x99] sm:$0xff] %v2959_v4  ;;  %281 = vst [vmem:[#allocation2 + $0xa9] sm:$0xff] %v2970_v10  ;;  %v358_v35 = vld [vmem:[%s4191_s1 + $0x1c8] sm:$0xff]  ;;  %v3043_v36 = vld [vmem:[%s2867_s15 + $0x90] sm:$0xff] }
  0x30   : > { %v2946_v0 = vld [vmem:[#allocation2 + $0x18] sm:$0xff]  ;;  %2254 = vmatpush1.bf16.msra.mxu1 %v2253_v5  ;;  %282 = vst [vmem:[#allocation2 + $0xb1] sm:$0xff] %v3002_v23  ;;  %283 = vst [vmem:[#allocation2 + $0xc1] sm:$0xff] %v3013_v26  ;;  %v3051_v39 = vld [vmem:[%s2867_s15 + $0xa0] sm:$0xff]  ;;  %v2313_v40 = vpack.c.bf16 %v358_v35, %v357_v34 }
  0x31   : > { %1023 = vmatprep.mubr.f32.mxu0 %v2946_v0  ;;  %2302 = vmatpush1.bf16.msra.mxu0 %v2301_v6  ;;  %284 = vst [vmem:[#allocation2 + $0xc9] sm:$0xff] %v3017_v27  ;;  %285 = vst [vmem:[#allocation2 + $0xd9] sm:$0xff] %v3021_v29  ;;  %v3047_v37 = vld [vmem:[%s2867_s15 + $0x98] sm:$0xff]  ;;  %v327_v41 = vld [vmem:[%s4191_s1 + $0xd0] sm:$0xff] }
  0x32   : > { %2255 = vmatprep.subr.bf16.mxu1 %v4195_v3  ;;  %2303 = vmatprep.subr.bf16.mxu0 %v4195_v3  ;;  %286 = vst [vmem:[#allocation2 + $0xe1] sm:$0xff] %v3032_v33  ;;  %287 = vst [vmem:[#allocation2 + $0xf1] sm:$0xff] %v3043_v36  ;;  %v328_v42 = vld [vmem:[%s4191_s1 + $0xd8] sm:$0xff]  ;;  %v359_v44 = vld [vmem:[%s4191_s1 + $0x1d0] sm:$0xff] }
  0x33   : > { %288 = vst [vmem:[#allocation2 + $0xf9] sm:$0xff] %v3047_v37  ;;  %289 = vst [vmem:[#allocation2 + $0x109] sm:$0xff] %v3051_v39  ;;  %v360_v45 = vld [vmem:[%s4191_s1 + $0x1d8] sm:$0xff]  ;;  %v2268_v47 = vpack.c.bf16 %v328_v42, %v327_v41  ;;  %v3069_v48 = vld [vmem:[%s2867_s15 + $0xa8] sm:$0xff] }
  0x34   : > { %2257 = vmatpush1.bf16.msra.mxu1 %v2256_v13  ;;  %v2316_v49 = vpack.c.bf16 %v360_v45, %v359_v44  ;;  %v329_v51 = vld [vmem:[%s4191_s1 + $0xe0] sm:$0xff]  ;;  %v330_v56 = vld [vmem:[%s4191_s1 + $0xe8] sm:$0xff]  ;;  %290 = vst [vmem:[#allocation2 + $0x111] sm:$0xff] %v3069_v48  ;;  %v3087_v60 = vld [vmem:[%s2867_s15 + $0xb0] sm:$0xff] }
  0x35   : > { %2305 = vmatpush1.bf16.msra.mxu0 %v2304_v14  ;;  %2258 = vmatprep.subr.bf16.mxu1 %v4195_v3  ;;  %v361_v57 = vld [vmem:[%s4191_s1 + $0x1e0] sm:$0xff]  ;;  %v362_v58 = vld [vmem:[%s4191_s1 + $0x1e8] sm:$0xff]  ;;  %291 = vst [vmem:[#allocation2 + $0x121] sm:$0xff] %v3087_v60  ;;  %v2271_v61 = vpack.c.bf16 %v330_v56, %v329_v51  ;;  %v331_v5 = vld [vmem:[%s4191_s1 + $0xf0] sm:$0xff] }
  0x36   : > { %2306 = vmatprep.subr.bf16.mxu0 %v4195_v3  ;;  %v2319_v62 = vpack.c.bf16 %v362_v58, %v361_v57  ;;  %v332_v6 = vld [vmem:[%s4191_s1 + $0xf8] sm:$0xff]  ;;  %v363_v9 = vld [vmem:[%s4191_s1 + $0x1f0] sm:$0xff]  ;;  %v3109_v12 = vld [vmem:[%s2867_s15 + $0xc0] sm:$0xff] }
  0x37   : > { %v3098_v7 = vld [vmem:[%s2867_s15 + $0xb8] sm:$0xff]  ;;  %293 = vst [vmem:[#allocation2 + $0x139] sm:$0xff] %v3109_v12  ;;  %v2274_v13 = vpack.c.bf16 %v332_v6, %v331_v5  ;;  %v3114_v15 = vld [vmem:[%s2867_s15 + $0xc8] sm:$0xff]  ;;  %v365_v16 = vld [vmem:[%s4191_s1 + $0x200] sm:$0xff] }
  0x38   : > { %2260 = vmatpush1.bf16.msra.mxu1 %v2259_v19  ;;  %v364_v11 = vld [vmem:[%s4191_s1 + $0x1f8] sm:$0xff]  ;;  %292 = vst [vmem:[#allocation2 + $0x129] sm:$0xff] %v3098_v7  ;;  %v366_v17 = vld [vmem:[%s4191_s1 + $0x208] sm:$0xff]  ;;  %294 = vst [vmem:[#allocation2 + $0x141] sm:$0xff] %v3114_v15 }
  0x39   : > { %2308 = vmatpush1.bf16.msra.mxu0 %v2307_v20  ;;  %2261 = vmatprep.subr.bf16.mxu1 %v4195_v3  ;;  %v2322_v14 = vpack.c.bf16 %v364_v11, %v363_v9  ;;  %v3125_v18 = vld [vmem:[%s2867_s15 + $0xd0] sm:$0xff]  ;;  %v397_v19 = vld [vmem:[%s4191_s1 + $0x300] sm:$0xff]  ;;  %v398_v20 = vld [vmem:[%s4191_s1 + $0x308] sm:$0xff]  ;;  %v2325_v24 = vpack.c.bf16 %v366_v17, %v365_v16 }
  0x3a   : > { %2309 = vmatprep.subr.bf16.mxu0 %v4195_v3  ;;  %295 = vst [vmem:[#allocation2 + $0x151] sm:$0xff] %v3125_v18  ;;  %v3135_v21 = vld [vmem:[%s2867_s15 + $0xd8] sm:$0xff]  ;;  %v509_v22 = vld [vmem:[#allocation2 + $0x2] sm:$0xff]  ;;  %v3146_v32 = vpack.c.bf16 %v398_v20, %v397_v19  ;;  %v399_v35 = vld [vmem:[%s4191_s1 + $0x310] sm:$0xff] }
  0x3b   : > { %v478_v25 = vld [vmem:[#allocation2 + $0x9] sm:$0xff]  ;;  %296 = vst [vmem:[#allocation2 + $0x159] sm:$0xff] %v3135_v21  ;;  %v368_v31 = vld [vmem:[%s4191_s1 + $0x218] sm:$0xff]  ;;  %v3149_v34 = vld [vmem:[%s2867_s15 + $0xe0] sm:$0xff] }
  0x3c   : > { %2263 = vmatpush1.bf16.msra.mxu1 %v2262_v28  ;;  %v367_v28 = vld [vmem:[%s4191_s1 + $0x210] sm:$0xff]  ;;  %297 = vst [vmem:[#allocation2 + $0x169] sm:$0xff] %v3149_v34  ;;  %v369_v44 = vld [vmem:[%s4191_s1 + $0x220] sm:$0xff]  ;;  %v402_v57 = vld [vmem:[%s4191_s1 + $0x328] sm:$0xff] }
  0x3d   : > { %2311 = vmatpush1.bf16.msra.mxu0 %v2310_v30  ;;  %2264 = vmatprep.subr.bf16.mxu1 %v4195_v3  ;;  %v542_v30 = vld [vmem:[#allocation2 + $0x20] sm:$0xff]  ;;  %v510_v41 = vld [vmem:[#allocation2 + $0xa] sm:$0xff]  ;;  %v2328_v42 = vpack.c.bf16 %v368_v31, %v367_v28  ;;  %v372_v6 = vld [vmem:[%s4191_s1 + $0x238] sm:$0xff] }
  0x3e   : > { %2312 = vmatprep.subr.bf16.mxu0 %v4195_v3  ;;  %v543_v45 = vld [vmem:[#allocation2 + $0x30] sm:$0xff]  ;;  %v401_v56 = vld [vmem:[%s4191_s1 + $0x320] sm:$0xff]  ;;  %v404_v11 = vld [vmem:[%s4191_s1 + $0x338] sm:$0xff] }
  0x3f   : > { %v3174_v51 = vld [vmem:[%s2867_s15 + $0xf0] sm:$0xff]  ;;  %v3186_v58 = vld [vmem:[#allocation2 + $0x1a] sm:$0xff]  ;;  %v374_v17 = vld [vmem:[%s4191_s1 + $0x248] sm:$0xff] }
  0x40   : > { %2266 = vmatpush1.bf16.msra.mxu1 %v2265_v38  ;;  %v400_v38 = vld [vmem:[%s4191_s1 + $0x318] sm:$0xff]  ;;  %4239 = vst [vmem:[#allocation3_spill] sm:$0xff] %v3174_v51  ;;  %299 = vst [vmem:[#allocation2 + $0x181] sm:$0xff] %v3174_v51  ;;  %v371_v5 = vld [vmem:[%s4191_s1 + $0x230] sm:$0xff] }
  0x41   : > { %2314 = vmatpush1.bf16.msra.mxu0 %v2313_v40  ;;  %2267 = vmatprep.subr.bf16.mxu1 %v4195_v3  ;;  %v3160_v40 = vld [vmem:[%s2867_s15 + $0xe8] sm:$0xff]  ;;  %v403_v9 = vld [vmem:[%s4191_s1 + $0x330] sm:$0xff]  ;;  %v373_v16 = vld [vmem:[%s4191_s1 + $0x240] sm:$0xff] }
  0x42   : > { %2315 = vmatprep.subr.bf16.mxu0 %v4195_v3  ;;  %298 = vst [vmem:[#allocation2 + $0x171] sm:$0xff] %v3160_v40  ;;  %v3222_v19 = vpack.c.bf16 %v404_v11, %v403_v9  ;;  %v406_v20 = vld [vmem:[%s4191_s1 + $0x348] sm:$0xff]  ;;  %v375_v28 = vld [vmem:[%s4191_s1 + $0x250] sm:$0xff]  ;;  %v412_v11 = vld [vmem:[%s4191_s1 + $0x378] sm:$0xff] }
  0x43   : > { %v3493_v51 = vld [vmem:[#allocation2 + $0xd8] sm:$0xff] }
  0x44   : > { %2269 = vmatpush1.bf16.msra.mxu1 %v2268_v47  ;;  %v370_v47 = vld [vmem:[%s4191_s1 + $0x228] sm:$0xff] }
  0x45   : > { %2317 = vmatpush1.bf16.msra.mxu0 %v2316_v49  ;;  %2270 = vmatprep.subr.bf16.mxu1 %v4195_v3  ;;  %v3171_v49 = vpack.c.bf16 %v400_v38, %v399_v35  ;;  %v408_v35 = vld [vmem:[%s4191_s1 + $0x358] sm:$0xff] }
  0x46   : > { %2318 = vmatprep.subr.bf16.mxu0 %v4195_v3  ;;  %v3254_v38 = vld [vmem:[#allocation2 + $0x3a] sm:$0xff] }
  0x48   : > { %2272 = vmatpush1.bf16.msra.mxu1 %v2271_v61  ;;  %v3189_v61 = vld [vmem:[%s2867_s15 + $0xf8] sm:$0xff] }
  0x49   : > { %2320 = vmatpush1.bf16.msra.mxu0 %v2319_v62  ;;  %2273 = vmatprep.subr.bf16.mxu1 %v4195_v3  ;;  %4240 = vst [vmem:[#allocation4_spill] sm:$0xff] %v3189_v61  ;;  %v544_v62 = vld [vmem:[#allocation2 + $0x38] sm:$0xff]  ;;  %300 = vst [vmem:[#allocation2 + $0x189] sm:$0xff] %v3189_v61 }
  0x4a   : > { %2321 = vmatprep.subr.bf16.mxu0 %v4195_v3 }
  0x4c   : > { %2275 = vmatpush1.bf16.msra.mxu1 %v2274_v13  ;;  %v3212_v13 = vld [vmem:[#allocation2 + $0x22] sm:$0xff] }
  0x4d   : > { %2323 = vmatpush1.bf16.msra.mxu0 %v2322_v14  ;;  %2452 = vmatprep.subr.bf16.mxu1 %v4195_v3  ;;  %v2334_v14 = vpack.c.bf16 %v372_v6, %v371_v5  ;;  %v379_v5 = vld [vmem:[%s4191_s1 + $0x270] sm:$0xff]  ;;  %v380_v6 = vld [vmem:[%s4191_s1 + $0x278] sm:$0xff] }
  0x4e   : > { %2324 = vmatprep.subr.bf16.mxu0 %v4195_v3 }
  0x4f   : > { %799 = vmatmul.mubr.f32.vlgmr.msra.gmra.mrb[0].mxu1 %v2672_v8 }
  0x50   : > { %1024 = vmatmul.mubr.f32.vlgmr.msra.gmra.mrb[0].mxu0 %v509_v22  ;;  %803 = vmatprep.mubr.f32.mxu1 %v478_v25  ;;  %v3233_v22 = vld [vmem:[#allocation2 + $0x32] sm:$0xff] }
  0x51   : > { %2326 = vmatpush1.bf16.msra.mxu0 %v2325_v24  ;;  %1028 = vmatprep.mubr.f32.mxu0 %v542_v30  ;;  %v2337_v24 = vpack.c.bf16 %v374_v17, %v373_v16  ;;  %v546_v25 = vld [vmem:[#allocation2 + $0x50] sm:$0xff]  ;;  %v2346_v16 = vpack.c.bf16 %v380_v6, %v379_v5  ;;  %v381_v17 = vld [vmem:[%s4191_s1 + $0x280] sm:$0xff]  ;;  %v418_v6 = vld [vmem:[%s4191_s1 + $0x3a8] sm:$0xff] }
  0x52   : > { %2327 = vmatprep.subr.bf16.mxu0 %v4195_v3  ;;  %2468 = vmatpush1.bf16.msra.mxu1 %v3146_v32  ;;  %v417_v5 = vld [vmem:[%s4191_s1 + $0x3a0] sm:$0xff] }
  0x53   : > { %804 = vmatmul.mubr.f32.gmra.mrb[2].mxu1 %v2672_v8  ;;  %2453 = vmatprep.subr.bf16.mxu1 %v4195_v3  ;;  %v2331_v8 = vpack.c.bf16 %v370_v47, %v369_v44  ;;  %v377_v44 = vld [vmem:[%s4191_s1 + $0x260] sm:$0xff] }
  0x54   : > { %1029 = vmatmul.mubr.f32.gmra.mrb[2].mxu0 %v510_v41  ;;  %808 = vmatprep.mubr.f32.mxu1 %v2884_v43  ;;  %v3199_v43 = vpack.c.bf16 %v402_v57, %v401_v56  ;;  %v410_v56 = vld [vmem:[%s4191_s1 + $0x368] sm:$0xff] }
  0x55   : > { %1033 = vmatprep.mubr.f32.mxu0 %v543_v45  ;;  %2329 = vmatpush1.bf16.msra.mxu0 %v2328_v42  ;;  %v547_v42 = vld [vmem:[#allocation2 + $0x60] sm:$0xff]  ;;  %v3275_v57 = vld [vmem:[#allocation2 + $0x4a] sm:$0xff] }
  0x56   : > { %2330 = vmatprep.subr.bf16.mxu0 %v4195_v3  ;;  %2469 = vmatpush1.bf16.msra.mxu1 %v3171_v49 }
  0x57   : > { %809 = vmatmul.mubr.f32.gmra.mrb[4].mxu1 %v2946_v0  ;;  %2454 = vmatprep.subr.bf16.mxu1 %v4195_v3  ;;  %v545_v0 = vld [vmem:[#allocation2 + $0x48] sm:$0xff] }
  0x58   : > { %1034 = vmatmul.mubr.f32.gmra.mrb[4].mxu0 %v3186_v58  ;;  %813 = vmatprep.mubr.f32.mxu1 %v2891_v46  ;;  %v405_v46 = vld [vmem:[%s4191_s1 + $0x340] sm:$0xff] }
  0x59   : > { %1038 = vmatprep.mubr.f32.mxu0 %v544_v62  ;;  %2332 = vmatpush1.bf16.msra.mxu0 %v2331_v8  ;;  %v3243_v31 = vpack.c.bf16 %v406_v20, %v405_v46  ;;  %v382_v46 = vld [vmem:[%s4191_s1 + $0x288] sm:$0xff] }
  0x5a   : > { %2333 = vmatprep.subr.bf16.mxu0 %v4195_v3  ;;  %2470 = vmatpush1.bf16.msra.mxu1 %v3199_v43 }
  0x5b   : > { %814 = vmatmul.mubr.f32.gmra.mrb[6].mxu1 %v542_v30  ;;  %2455 = vmatprep.subr.bf16.mxu1 %v4195_v3  ;;  %v376_v30 = vld [vmem:[%s4191_s1 + $0x258] sm:$0xff] }
  0x5c   : > { %1039 = vmatmul.mubr.f32.gmra.mrb[6].mxu0 %v3212_v13  ;;  %818 = vmatprep.mubr.f32.mxu1 %v2902_v50  ;;  %v407_v50 = vld [vmem:[%s4191_s1 + $0x350] sm:$0xff]  ;;  %v2340_v41 = vpack.c.bf16 %v376_v30, %v375_v28  ;;  %v3317_v28 = vld [vmem:[#allocation2 + $0x62] sm:$0xff]  ;;  %v2349_v30 = vpack.c.bf16 %v382_v46, %v381_v17  ;;  %v388_v17 = vld [vmem:[%s4191_s1 + $0x2b8] sm:$0xff] }
  0x5d   : > { %1043 = vmatprep.mubr.f32.mxu0 %v545_v0  ;;  %2335 = vmatpush1.bf16.msra.mxu0 %v2334_v14  ;;  %v3264_v47 = vpack.c.bf16 %v408_v35, %v407_v50  ;;  %v3296_v14 = vld [vmem:[#allocation2 + $0x52] sm:$0xff] }
  0x5e   : > { %2336 = vmatprep.subr.bf16.mxu0 %v4195_v3  ;;  %2471 = vmatpush1.bf16.msra.mxu1 %v3222_v19  ;;  %v383_v50 = vld [vmem:[%s4191_s1 + $0x290] sm:$0xff]  ;;  %v384_v35 = vld [vmem:[%s4191_s1 + $0x298] sm:$0xff] }
  0x5f   : > { %819 = vmatmul.mubr.f32.gmra.mrb[8].mxu1 %v543_v45  ;;  %2456 = vmatprep.subr.bf16.mxu1 %v4195_v3  ;;  %v378_v45 = vld [vmem:[%s4191_s1 + $0x268] sm:$0xff]  ;;  %v419_v46 = vld [vmem:[%s4191_s1 + $0x3b0] sm:$0xff] }
  0x60   : > { %1044 = vmatmul.mubr.f32.gmra.mrb[8].mxu0 %v3233_v22  ;;  %823 = vmatprep.mubr.f32.mxu1 %v2910_v52  ;;  %v409_v52 = vld [vmem:[%s4191_s1 + $0x360] sm:$0xff]  ;;  %v2343_v8 = vpack.c.bf16 %v378_v45, %v377_v44  ;;  %v416_v44 = vld [vmem:[%s4191_s1 + $0x398] sm:$0xff]  ;;  %v3338_v45 = vld [vmem:[#allocation2 + $0x6a] sm:$0xff] }
  0x61   : > { %1048 = vmatprep.mubr.f32.mxu0 %v546_v25  ;;  %2338 = vmatpush1.bf16.msra.mxu0 %v2337_v24  ;;  %v3285_v9 = vpack.c.bf16 %v410_v56, %v409_v52  ;;  %v414_v24 = vld [vmem:[%s4191_s1 + $0x388] sm:$0xff]  ;;  %v2352_v52 = vpack.c.bf16 %v384_v35, %v383_v50  ;;  %v385_v56 = vld [vmem:[%s4191_s1 + $0x2a0] sm:$0xff] }
  0x62   : > { %2339 = vmatprep.subr.bf16.mxu0 %v4195_v3  ;;  %2472 = vmatpush1.bf16.msra.mxu1 %v3243_v31  ;;  %v389_v50 = vld [vmem:[%s4191_s1 + $0x2c0] sm:$0xff]  ;;  %v390_v35 = vld [vmem:[%s4191_s1 + $0x2c8] sm:$0xff] }
  0x63   : > { %824 = vmatmul.mubr.f32.gmra.mrb[10].mxu1 %v544_v62  ;;  %2457 = vmatprep.subr.bf16.mxu1 %v4195_v3  ;;  %v548_v62 = vld [vmem:[#allocation2 + $0x68] sm:$0xff] }
  0x64   : > { %1049 = vmatmul.mubr.f32.gmra.mrb[10].mxu0 %v3254_v38  ;;  %828 = vmatprep.mubr.f32.mxu1 %v2913_v53  ;;  %v411_v53 = vld [vmem:[%s4191_s1 + $0x370] sm:$0xff] }
  0x65   : > { %1053 = vmatprep.mubr.f32.mxu0 %v547_v42  ;;  %2341 = vmatpush1.bf16.msra.mxu0 %v2340_v41  ;;  %v3306_v20 = vpack.c.bf16 %v412_v11, %v411_v53  ;;  %v3362_v53 = vld [vmem:[#allocation2 + $0x7a] sm:$0xff] }
  0x66   : > { %2342 = vmatprep.subr.bf16.mxu0 %v4195_v3  ;;  %2473 = vmatpush1.bf16.msra.mxu1 %v3264_v47  ;;  %v3364_v11 = vld [vmem:[#allocation2 + $0x98] sm:$0xff] }
  0x67   : > { %829 = vmatmul.mubr.f32.gmra.mrb[12].mxu1 %v545_v0  ;;  %2458 = vmatprep.subr.bf16.mxu1 %v4195_v3  ;;  %v549_v0 = vld [vmem:[#allocation2 + $0x78] sm:$0xff] }
  0x68   : > { %1054 = vmatmul.mubr.f32.gmra.mrb[12].mxu0 %v3275_v57  ;;  %833 = vmatprep.mubr.f32.mxu1 %v2918_v54  ;;  %v413_v54 = vld [vmem:[%s4191_s1 + $0x380] sm:$0xff] }
  0x69   : > { %1058 = vmatprep.mubr.f32.mxu0 %v548_v62  ;;  %2344 = vmatpush1.bf16.msra.mxu0 %v2343_v8  ;;  %v3327_v41 = vpack.c.bf16 %v414_v24, %v413_v54  ;;  %v386_v8 = vld [vmem:[%s4191_s1 + $0x2a8] sm:$0xff]  ;;  %v420_v54 = vld [vmem:[%s4191_s1 + $0x3b8] sm:$0xff] }
  0x6a   : > { %2345 = vmatprep.subr.bf16.mxu0 %v4195_v3  ;;  %2474 = vmatpush1.bf16.msra.mxu1 %v3285_v9  ;;  %v3386_v24 = vld [vmem:[#allocation2 + $0x82] sm:$0xff] }
  0x6b   : > { %834 = vmatmul.mubr.f32.gmra.mrb[14].mxu1 %v546_v25  ;;  %2459 = vmatprep.subr.bf16.mxu1 %v4195_v3  ;;  %v550_v25 = vld [vmem:[#allocation2 + $0x80] sm:$0xff] }
  0x6c   : > { %1059 = vmatmul.mubr.f32.gmra.mrb[14].mxu0 %v3296_v14  ;;  %838 = vmatprep.mubr.f32.mxu1 %v2921_v55  ;;  %v415_v55 = vld [vmem:[%s4191_s1 + $0x390] sm:$0xff] }
  0x6d   : > { %1063 = vmatprep.mubr.f32.mxu0 %v549_v0  ;;  %2347 = vmatpush1.bf16.msra.mxu0 %v2346_v16  ;;  %v387_v16 = vld [vmem:[%s4191_s1 + $0x2b0] sm:$0xff] }
  0x6e   : > { %2348 = vmatprep.subr.bf16.mxu0 %v4195_v3  ;;  %2475 = vmatpush1.bf16.msra.mxu1 %v3306_v20 }
  0x6f   : > { %839 = vmatmul.mubr.f32.gmra.mrb[16].mxu1 %v547_v42  ;;  %2460 = vmatprep.subr.bf16.mxu1 %v4195_v3  ;;  %v3340_v42 = vld [vmem:[#allocation2 + $0x90] sm:$0xff] }
  0x70   : > { %1064 = vmatmul.mubr.f32.gmra.mrb[16].mxu0 %v3317_v28  ;;  %843 = vmatprep.mubr.f32.mxu1 %v2932_v59  ;;  %v3350_v59 = vpack.c.bf16 %v416_v44, %v415_v55  ;;  %v421_v55 = vld [vmem:[%s4191_s1 + $0x3c0] sm:$0xff]  ;;  %v422_v44 = vld [vmem:[%s4191_s1 + $0x3c8] sm:$0xff] }
  0x71   : > { %1068 = vmatprep.mubr.f32.mxu0 %v550_v25  ;;  %2350 = vmatpush1.bf16.msra.mxu0 %v2349_v30  ;;  %v3388_v30 = vld [vmem:[#allocation2 + $0xa8] sm:$0xff] }
  0x72   : > { %2351 = vmatprep.subr.bf16.mxu0 %v4195_v3  ;;  %2476 = vmatpush1.bf16.msra.mxu1 %v3327_v41 }
  0x73   : > { %844 = vmatmul.mubr.f32.gmra.mrb[18].mxu1 %v548_v62  ;;  %2461 = vmatprep.subr.bf16.mxu1 %v4195_v3  ;;  %v2355_v62 = vpack.c.bf16 %v386_v8, %v385_v56  ;;  %v3412_v56 = vld [vmem:[#allocation2 + $0xb0] sm:$0xff] }
  0x74   : > { %1069 = vmatmul.mubr.f32.gmra.mrb[18].mxu0 %v3338_v45  ;;  %848 = vmatprep.mubr.f32.mxu1 %v2943_v63  ;;  %v3374_v63 = vpack.c.bf16 %v418_v6, %v417_v5  ;;  %v391_v8 = vld [vmem:[%s4191_s1 + $0x2d0] sm:$0xff]  ;;  %v392_v5 = vld [vmem:[%s4191_s1 + $0x2d8] sm:$0xff]  ;;  %v3422_v6 = vpack.c.bf16 %v422_v44, %v421_v55  ;;  %v425_v55 = vld [vmem:[%s4191_s1 + $0x3e0] sm:$0xff] }
  0x75   : > { %1073 = vmatprep.mubr.f32.mxu0 %v3340_v42  ;;  %2353 = vmatpush1.bf16.msra.mxu0 %v2352_v52  ;;  %v3410_v52 = vld [vmem:[#allocation2 + $0x92] sm:$0xff]  ;;  %v426_v44 = vld [vmem:[%s4191_s1 + $0x3e8] sm:$0xff] }
  0x76   : > { %2354 = vmatprep.subr.bf16.mxu0 %v4195_v3  ;;  %2477 = vmatpush1.bf16.msra.mxu1 %v3350_v59  ;;  %4242 = vst [vmem:[#allocation6_spill] sm:$0xff] %v3422_v6  ;;  %v3472_v61 = vpack.c.bf16 %v426_v44, %v425_v55  ;;  %v430_v55 = vld [vmem:[%s4191_s1 + $0x408] sm:$0xff]  ;;  %v3491_v44 = vld [vmem:[#allocation2 + $0xb2] sm:$0xff] }
  0x77   : > { %849 = vmatmul.mubr.f32.gmra.mrb[20].mxu1 %v549_v0  ;;  %2462 = vmatprep.subr.bf16.mxu1 %v4195_v3  ;;  %v2358_v0 = vpack.c.bf16 %v388_v17, %v387_v16  ;;  %v424_v16 = vld [vmem:[%s4191_s1 + $0x3d8] sm:$0xff]  ;;  %4246 = vst [vmem:[#allocation10_spill] sm:$0xff] %v3491_v44 }
  0x78   : > { %1074 = vmatmul.mubr.f32.gmra.mrb[20].mxu0 %v3362_v53  ;;  %853 = vmatprep.mubr.f32.mxu1 %v2950_v1  ;;  %v3398_v1 = vpack.c.bf16 %v420_v54, %v419_v46  ;;  %v3435_v17 = vld [vmem:[#allocation2 + $0x9a] sm:$0xff]  ;;  %v2364_v46 = vpack.c.bf16 %v392_v5, %v391_v8  ;;  %v3462_v5 = vld [vmem:[#allocation2 + $0xc8] sm:$0xff]  ;;  %4245 = vst [vmem:[#allocation9_spill] sm:$0xff] %v3472_v61 }
  0x79   : > { %1078 = vmatprep.mubr.f32.mxu0 %v3364_v11  ;;  %2356 = vmatpush1.bf16.msra.mxu0 %v2355_v62  ;;  %v423_v62 = vld [vmem:[%s4191_s1 + $0x3d0] sm:$0xff]  ;;  %v3437_v54 = vld [vmem:[#allocation2 + $0xc0] sm:$0xff] }
  0x7a   : > { %2357 = vmatprep.subr.bf16.mxu0 %v4195_v3  ;;  %2478 = vmatpush1.bf16.msra.mxu1 %v3374_v63  ;;  %4241 = vst [vmem:[#allocation5_spill] sm:$0xff] %v3398_v1 }
  0x7b   : > { %854 = vmatmul.mubr.f32.gmra.mrb[22].mxu1 %v550_v25  ;;  %2463 = vmatprep.subr.bf16.mxu1 %v4195_v3  ;;  %v2361_v25 = vpack.c.bf16 %v390_v35, %v389_v50  ;;  %v394_v50 = vld [vmem:[%s4191_s1 + $0x2e8] sm:$0xff]  ;;  %v3447_v35 = vpack.c.bf16 %v424_v16, %v423_v62  ;;  %v395_v62 = vld [vmem:[%s4191_s1 + $0x2f0] sm:$0xff]  ;;  %v396_v16 = vld [vmem:[%s4191_s1 + $0x2f8] sm:$0xff] }
  0x7c   : > { %1079 = vmatmul.mubr.f32.gmra.mrb[22].mxu0 %v3386_v24  ;;  %858 = vmatprep.mubr.f32.mxu1 %v2953_v2 }
  0x7d   : > { %1083 = vmatprep.mubr.f32.mxu0 %v3388_v30  ;;  %2359 = vmatpush1.bf16.msra.mxu0 %v2358_v0  ;;  %v393_v0 = vld [vmem:[%s4191_s1 + $0x2e0] sm:$0xff]  ;;  %4243 = vst [vmem:[#allocation7_spill] sm:$0xff] %v3447_v35 }
  0x7e   : > { %2360 = vmatprep.subr.bf16.mxu0 %v4195_v3  ;;  %2479 = vmatpush1.bf16.msra.mxu1 %v3398_v1  ;;  %v2367_v8 = vpack.c.bf16 %v394_v50, %v393_v0  ;;  %v428_v0 = vld [vmem:[%s4191_s1 + $0x3f8] sm:$0xff]  ;;  %v429_v50 = vld [vmem:[%s4191_s1 + $0x400] sm:$0xff] }
  0x7f   : > { %859 = vmatmul.mubr.f32.gmra.mrb[24].mxu1 %v3340_v42  ;;  %2464 = vmatprep.subr.bf16.mxu1 %v4195_v3  ;;  %v3501_v1 = vpack.c.bf16 %v430_v55, %v429_v50  ;;  %v3533_v50 = vld [vmem:[#allocation2 + $0xe2] sm:$0xff] }
  0x80   : > { %1084 = vmatmul.mubr.f32.gmra.mrb[24].mxu0 %v3410_v52  ;;  %863 = vmatprep.mubr.f32.mxu1 %v2959_v4  ;;  %4252 = vst [vmem:[#allocation15_spill] sm:$0xff] %v3533_v50  ;;  %v3535_v55 = vld [vmem:[#allocation2 + $0x108] sm:$0xff] }
  0x81   : > { %1088 = vmatprep.mubr.f32.mxu0 %v3412_v56  ;;  %2362 = vmatpush1.bf16.msra.mxu0 %v2361_v25  ;;  %v3460_v25 = vld [vmem:[#allocation2 + $0xaa] sm:$0xff] }
  0x82   : > { %2363 = vmatprep.subr.bf16.mxu0 %v4195_v3  ;;  %2480 = vmatpush1.bf16.msra.mxu1 %v3422_v6  ;;  %4244 = vst [vmem:[#allocation8_spill] sm:$0xff] %v3460_v25 }
  0x83   : > { %864 = vmatmul.mubr.f32.gmra.mrb[26].mxu1 %v3364_v11  ;;  %2465 = vmatprep.subr.bf16.mxu1 %v4195_v3 }
  0x84   : > { %1089 = vmatmul.mubr.f32.gmra.mrb[26].mxu0 %v3435_v17  ;;  %868 = vmatprep.mubr.f32.mxu1 %v2970_v10 }
  0x85   : > { %1093 = vmatprep.mubr.f32.mxu0 %v3437_v54  ;;  %2365 = vmatpush1.bf16.msra.mxu0 %v2364_v46  ;;  %v427_v46 = vld [vmem:[%s4191_s1 + $0x3f0] sm:$0xff] }
  0x86   : > { %2366 = vmatprep.subr.bf16.mxu0 %v4195_v3  ;;  %2481 = vmatpush1.bf16.msra.mxu1 %v3447_v35  ;;  %v4247_v35 = vmov 0.0|0.0   ;;  %v3497_v6 = vpack.c.bf16 %v428_v0, %v427_v46  ;;  %v3519_v46 = vld [vmem:[#allocation2 + $0xf0] sm:$0xff]  ;;  %v3527_v0 = vld [vmem:[#allocation2 + $0xf8] sm:$0xff] }
  0x87   : > { %869 = vmatmul.mubr.f32.gmra.mrb[28].mxu1 %v3388_v30  ;;  %2466 = vmatprep.subr.bf16.mxu1 %v4195_v3  ;;  %v2370_v3 = vpack.c.bf16 %v396_v16, %v395_v62  ;;  %v3508_v62 = vld [vmem:[#allocation2 + $0xe0] sm:$0xff]  ;;  %v3517_v16 = vld [vmem:[#allocation2 + $0xca] sm:$0xff] }
  0x88   : > { %1094 = vmatmul.mubr.f32.gmra.mrb[28].mxu0 %v3460_v25  ;;  %873 = vmatprep.mubr.f32.mxu1 %v3002_v23  ;;  %4248 = vst [vmem:[#allocation11_spill] sm:$0xff] %v3497_v6  ;;  %4250 = vst [vmem:[#allocation13_spill] sm:$0xff] %v3517_v16  ;;  %v3575_v25 = vld [vmem:[#allocation2 + $0x140] sm:$0xff] }
  0x89   : > { %1098 = vmatprep.mubr.f32.mxu0 %v3462_v5  ;;  %2368 = vmatpush1.bf16.msra.mxu0 %v2367_v8  ;;  %v3506_v8 = vld [vmem:[#allocation2 + $0xc2] sm:$0xff]  ;;  %4262 = vst [vmem:[#allocation25_spill] sm:$0xff] %v3575_v25 }
  0x8a   : > { %2369 = vmatprep.subr.bf16.mxu0 %v4247_v35  ;;  %2482 = vmatpush1.bf16.msra.mxu1 %v3472_v61  ;;  %4249 = vst [vmem:[#allocation12_spill] sm:$0xff] %v3506_v8  ;;  %v3543_v61 = vld [vmem:[#allocation2 + $0x110] sm:$0xff] }
  0x8b   : > { %874 = vmatmul.mubr.f32.gmra.mrb[30].mxu1 %v3412_v56  ;;  %2467 = vmatprep.subr.bf16.mxu1 %v4247_v35  ;;  %4254 = vst [vmem:[#allocation17_spill] sm:$0xff] %v3543_v61 }
  0x8c   : > { %1099 = vmatmul.mubr.f32.gmra.mrb[30].mxu0 %v3491_v44  ;;  %878 = vmatprep.mubr.f32.mxu1 %v3013_v26  ;;  %v3567_v44 = vld [vmem:[#allocation2 + $0x138] sm:$0xff] }
  0x8d   : > { %1103 = vmatprep.mubr.f32.mxu0 %v3493_v51  ;;  %2371 = vmatpush1.bf16.msra.mxu0 %v2370_v3  ;;  %v3525_v3 = vld [vmem:[#allocation2 + $0xda] sm:$0xff]  ;;  %4260 = vst [vmem:[#allocation23_spill] sm:$0xff] %v3567_v44 }
  0x8e   : > { %2483 = vmatpush1.bf16.msra.mxu1 %v3497_v6  ;;  %2372 = vmatprep.subr.bf16.mxu0 %v4247_v35  ;;  %4251 = vst [vmem:[#allocation14_spill] sm:$0xff] %v3525_v3  ;;  %v3541_v6 = vld [vmem:[#allocation2 + $0xf2] sm:$0xff] }
  0x8f   : > { %879 = vmatmul.mubr.f32.gmra.mrb[32].mxu1 %v3437_v54  ;;  %2421 = vmatprep.subr.bf16.mxu1 %v3501_v1  ;;  %4253 = vst [vmem:[#allocation16_spill] sm:$0xff] %v3541_v6 }
  0x90   : > { %1104 = vmatmul.mubr.f32.gmra.mrb[32].mxu0 %v3506_v8  ;;  %883 = vmatprep.mubr.f32.mxu1 %v3017_v27  ;;  %v3559_v8 = vld [vmem:[#allocation2 + $0x128] sm:$0xff] }
  0x91   : > { %1108 = vmatprep.mubr.f32.mxu0 %v3508_v62  ;;  %4258 = vst [vmem:[#allocation21_spill] sm:$0xff] %v3559_v8 }
  0x93   : > { %884 = vmatmul.mubr.f32.gmra.mrb[34].mxu1 %v3462_v5 }
  0x94   : > { %1109 = vmatmul.mubr.f32.gmra.mrb[34].mxu0 %v3517_v16  ;;  %888 = vmatprep.mubr.f32.mxu1 %v3021_v29  ;;  %v3551_v16 = vld [vmem:[#allocation2 + $0x120] sm:$0xff] }
  0x95   : > { %1113 = vmatprep.mubr.f32.mxu0 %v3519_v46  ;;  %4256 = vst [vmem:[#allocation19_spill] sm:$0xff] %v3551_v16 }
  0x97   : > { %889 = vmatmul.mubr.f32.gmra.mrb[36].mxu1 %v3493_v51 }
  0x98   : > { %1114 = vmatmul.mubr.f32.gmra.mrb[36].mxu0 %v3525_v3  ;;  %893 = vmatprep.mubr.f32.mxu1 %v3032_v33  ;;  %v3549_v3 = vld [vmem:[#allocation2 + $0xfa] sm:$0xff] }
  0x99   : > { %1118 = vmatprep.mubr.f32.mxu0 %v3527_v0  ;;  %4255 = vst [vmem:[#allocation18_spill] sm:$0xff] %v3549_v3 }
  0x9b   : > { %894 = vmatmul.mubr.f32.gmra.mrb[38].mxu1 %v3508_v62 }
  0x9c   : > { %1119 = vmatmul.mubr.f32.gmra.mrb[38].mxu0 %v3533_v50  ;;  %898 = vmatprep.mubr.f32.mxu1 %v3043_v36  ;;  %v3557_v50 = vld [vmem:[#allocation2 + $0x10a] sm:$0xff] }
  0x9d   : > { %1123 = vmatprep.mubr.f32.mxu0 %v3535_v55  ;;  %4257 = vst [vmem:[#allocation20_spill] sm:$0xff] %v3557_v50 }
  0x9f   : > { %899 = vmatmul.mubr.f32.gmra.mrb[40].mxu1 %v3519_v46 }
  0xa0   : > { %1124 = vmatmul.mubr.f32.gmra.mrb[40].mxu0 %v3541_v6  ;;  %903 = vmatprep.mubr.f32.mxu1 %v3047_v37  ;;  %v3565_v6 = vld [vmem:[#allocation2 + $0x112] sm:$0xff] }
  0xa1   : > { %1128 = vmatprep.mubr.f32.mxu0 %v3543_v61  ;;  %4259 = vst [vmem:[#allocation22_spill] sm:$0xff] %v3565_v6 }
  0xa3   : > { %904 = vmatmul.mubr.f32.gmra.mrb[42].mxu1 %v3527_v0 }
  0xa4   : > { %1129 = vmatmul.mubr.f32.gmra.mrb[42].mxu0 %v3549_v3  ;;  %908 = vmatprep.mubr.f32.mxu1 %v3051_v39  ;;  %v3573_v3 = vld [vmem:[#allocation2 + $0x122] sm:$0xff] }
  0xa5   : > { %1133 = vmatprep.mubr.f32.mxu0 %v3551_v16  ;;  %4261 = vst [vmem:[#allocation24_spill] sm:$0xff] %v3573_v3 }
  0xa7   : > { %909 = vmatmul.mubr.f32.gmra.mrb[44].mxu1 %v3535_v55 }
  0xa8   : > { %1134 = vmatmul.mubr.f32.gmra.mrb[44].mxu0 %v3557_v50  ;;  %913 = vmatprep.mubr.f32.mxu1 %v3069_v48  ;;  %v3581_v50 = vld [vmem:[#allocation2 + $0x12a] sm:$0xff] }
  0xa9   : > { %1138 = vmatprep.mubr.f32.mxu0 %v3559_v8  ;;  %4263 = vst [vmem:[#allocation26_spill] sm:$0xff] %v3581_v50 }
  0xab   : > { %914 = vmatmul.mubr.f32.gmra.mrb[46].mxu1 %v3543_v61  ;;  %v3583_v61 = vld [vmem:[#allocation2 + $0x150] sm:$0xff] }
  0xac   : > { %1139 = vmatmul.mubr.f32.gmra.mrb[46].mxu0 %v3565_v6  ;;  %918 = vmatprep.mubr.f32.mxu1 %v3087_v60  ;;  %4264 = vst [vmem:[#allocation27_spill] sm:$0xff] %v3583_v61  ;;  %v3589_v6 = vld [vmem:[#allocation2 + $0x13a] sm:$0xff] }
  0xad   : > { %1143 = vmatprep.mubr.f32.mxu0 %v3567_v44  ;;  %4265 = vst [vmem:[#allocation28_spill] sm:$0xff] %v3589_v6 }
  0xaf   : > { %919 = vmatmul.mubr.f32.gmra.mrb[48].mxu1 %v3551_v16  ;;  %v3591_v16 = vld [vmem:[#allocation2 + $0x158] sm:$0xff] }
  0xb0   : > { %1144 = vmatmul.mubr.f32.gmra.mrb[48].mxu0 %v3573_v3  ;;  %923 = vmatprep.mubr.f32.mxu1 %v3098_v7  ;;  %v3597_v3 = vld [vmem:[#allocation2 + $0x142] sm:$0xff] }
  0xb1   : > { %1148 = vmatprep.mubr.f32.mxu0 %v3575_v25  ;;  %4266 = vst [vmem:[#allocation29_spill] sm:$0xff] %v3597_v3 }
  0xb3   : > { %924 = vmatmul.mubr.f32.gmra.mrb[50].mxu1 %v3559_v8  ;;  %v3599_v8 = vld [vmem:[#allocation2 + $0x168] sm:$0xff] }
  0xb4   : > { %1149 = vmatmul.mubr.f32.gmra.mrb[50].mxu0 %v3581_v50  ;;  %928 = vmatprep.mubr.f32.mxu1 %v3109_v12  ;;  %v3605_v50 = vld [vmem:[#allocation2 + $0x152] sm:$0xff] }
  0xb5   : > { %1153 = vmatprep.mubr.f32.mxu0 %v3583_v61  ;;  %4267 = vst [vmem:[#allocation30_spill] sm:$0xff] %v3605_v50 }
  0xb7   : > { %929 = vmatmul.mubr.f32.gmra.mrb[52].mxu1 %v3567_v44  ;;  %v3607_v44 = vld [vmem:[#allocation2 + $0x170] sm:$0xff] }
  0xb8   : > { %1154 = vmatmul.mubr.f32.gmra.mrb[52].mxu0 %v3589_v6  ;;  %933 = vmatprep.mubr.f32.mxu1 %v3114_v15  ;;  %v3613_v6 = vld [vmem:[#allocation2 + $0x15a] sm:$0xff] }
  0xb9   : > { %1158 = vmatprep.mubr.f32.mxu0 %v3591_v16  ;;  %4268 = vst [vmem:[#allocation31_spill] sm:$0xff] %v3613_v6 }
  0xbb   : > { %934 = vmatmul.mubr.f32.gmra.mrb[54].mxu1 %v3575_v25  ;;  %v3615_v25 = vld [vmem:[#allocation2 + $0x180] sm:$0xff] }
  0xbc   : > { %1159 = vmatmul.mubr.f32.gmra.mrb[54].mxu0 %v3597_v3  ;;  %938 = vmatprep.mubr.f32.mxu1 %v3125_v18  ;;  %4269 = vst [vmem:[#allocation32_spill] sm:$0xff] %v3615_v25  ;;  %v3621_v3 = vld [vmem:[#allocation2 + $0x16a] sm:$0xff] }
  0xbd   : > { %1163 = vmatprep.mubr.f32.mxu0 %v3599_v8  ;;  %4270 = vst [vmem:[#allocation33_spill] sm:$0xff] %v3621_v3 }
  0xbf   : > { %939 = vmatmul.mubr.f32.gmra.mrb[56].mxu1 %v3583_v61  ;;  %v3623_v61 = vld [vmem:[#allocation2 + $0x188] sm:$0xff] }
  0xc0   : > { %1164 = vmatmul.mubr.f32.gmra.mrb[56].mxu0 %v3605_v50  ;;  %943 = vmatprep.mubr.f32.mxu1 %v3135_v21  ;;  %4271 = vst [vmem:[#allocation34_spill] sm:$0xff] %v3623_v61  ;;  %v3629_v50 = vld [vmem:[#allocation2 + $0x172] sm:$0xff] }
  0xc1   : > { %1168 = vmatprep.mubr.f32.mxu0 %v3607_v44  ;;  %4272 = vst [vmem:[#allocation35_spill] sm:$0xff] %v3629_v50 }
  0xc3   : > { %944 = vmatmul.mubr.f32.gmra.mrb[58].mxu1 %v3591_v16 }
  0xc4   : > { %1169 = vmatmul.mubr.f32.gmra.mrb[58].mxu0 %v3613_v6  ;;  %948 = vmatprep.mubr.f32.mxu1 %v3149_v34  ;;  %v431_v6 = vld [vmem:[%s4191_s1 + $0x410] sm:$0xff] }
  0xc5   : > { %1173 = vmatprep.mubr.f32.mxu0 %v3615_v25  ;;  %v2630_v25 = vld [vmem:[#allocation2 + $0x19] sm:$0xff] }
  0xc7   : > { %949 = vmatmul.mubr.f32.gmra.mrb[60].mxu1 %v3599_v8 }
  0xc8   : > { %1174 = vmatmul.mubr.f32.gmra.mrb[60].mxu0 %v3621_v3  ;;  %953 = vmatprep.mubr.f32.mxu1 %v3160_v40  ;;  %v432_v3 = vld [vmem:[%s4191_s1 + $0x418] sm:$0xff] }
  0xc9   : > { %1178 = vmatprep.mubr.f32.mxu0 %v3623_v61  ;;  %v2424_v61 = vpack.c.bf16 %v432_v3, %v431_v6  ;;  %v4285_v6 = vld [vmem:[#allocation25_spill] sm:$0xff]  ;;  %v4292_v3 = vld [vmem:[#allocation3_spill] sm:$0xff] }
  0xcb   : > { %954 = vmatmul.mubr.f32.gmra.mrb[62].mxu1 %v3607_v44 }
  0xcc   : > { %1179 = vmatmul.mubr.f32.gmra.mrb[62].mxu0 %v3629_v50  ;;  %1513 = vmatprep.mubr.f32.mxu1 %v2953_v2  ;;  %v433_v2 = vld [vmem:[%s4191_s1 + $0x420] sm:$0xff]  ;;  %v434_v50 = vld [vmem:[%s4191_s1 + $0x428] sm:$0xff] }
  0xcd   : > { %1248 = vmatprep.mubr.f32.mxu0 %v3186_v58  ;;  %v2631_v58 = vld [vmem:[#allocation2 + $0x21] sm:$0xff] }
  0xcf   : > { %1514 = vmatmul.mubr.f32.vlgmr.msra.gmra.mrb[64].mxu1 %v3340_v42  ;;  %v435_v42 = vld [vmem:[%s4191_s1 + $0x430] sm:$0xff] }
  0xd0   : > { %1249 = vmatmul.mubr.f32.vlgmr.msra.gmra.mrb[0].mxu0 %v2630_v25  ;;  %1518 = vmatprep.mubr.f32.mxu1 %v2959_v4  ;;  %v2428_v4 = vpack.c.bf16 %v434_v50, %v433_v2  ;;  %v4288_v25 = vld [vmem:[#allocation27_spill] sm:$0xff]  ;;  %v4295_v50 = vld [vmem:[#allocation4_spill] sm:$0xff]  ;;  %v4297_v2 = vld [vmem:[#allocation34_spill] sm:$0xff] }
  0xd1   : > { %2374 = vmatpush1.bf16.msra.mxu0 %v3146_v32  ;;  %1253 = vmatprep.mubr.f32.mxu0 %v3212_v13  ;;  %v436_v32 = vld [vmem:[%s4191_s1 + $0x438] sm:$0xff] }
  0xd2   : > { %2375 = vmatprep.subr.bf16.mxu0 %v4247_v35  ;;  %2423 = vmatpush3.bf16.msra.mxu1 %v3501_v1  ;;  %v2432_v13 = vpack.c.bf16 %v436_v32, %v435_v42  ;;  %v443_v1 = vld [vmem:[%s4191_s1 + $0x470] sm:$0xff]  ;;  %v701_v42 = vld [vmem:[#allocation2 + $0x1a1] sm:$0xff] }
  0xd3   : > { %1519 = vmatmul.mubr.f32.gmra.mrb[66].mxu1 %v3364_v11  ;;  %2425 = vmatprep.subr.bf16.mxu1 %v2424_v61  ;;  %v437_v11 = vld [vmem:[%s4191_s1 + $0x440] sm:$0xff] }
  0xd4   : > { %1254 = vmatmul.mubr.f32.gmra.mrb[2].mxu0 %v2631_v58  ;;  %1523 = vmatprep.mubr.f32.mxu1 %v2970_v10  ;;  %v2632_v10 = vld [vmem:[#allocation2 + $0x31] sm:$0xff] }
  0xd5   : > { %1258 = vmatprep.mubr.f32.mxu0 %v3233_v22  ;;  %2377 = vmatpush1.bf16.msra.mxu0 %v3171_v49  ;;  %v438_v22 = vld [vmem:[%s4191_s1 + $0x448] sm:$0xff]  ;;  %v4298_v58 = vld [vmem:[#allocation24_spill] sm:$0xff] }
  0xd6   : > { %2378 = vmatprep.subr.bf16.mxu0 %v4247_v35  ;;  %2427 = vmatpush3.bf16.msra.mxu1 %v2424_v61  ;;  %v2436_v49 = vpack.c.bf16 %v438_v22, %v437_v11  ;;  %v439_v61 = vld [vmem:[%s4191_s1 + $0x450] sm:$0xff]  ;;  %v2653_v11 = vld [vmem:[#allocation2 + $0x121] sm:$0xff] }
  0xd7   : > { %1524 = vmatmul.mubr.f32.gmra.mrb[68].mxu1 %v3388_v30  ;;  %2429 = vmatprep.subr.bf16.mxu1 %v2428_v4  ;;  %v441_v30 = vld [vmem:[%s4191_s1 + $0x460] sm:$0xff]  ;;  %v4299_v22 = vld [vmem:[#allocation26_spill] sm:$0xff] }
  0xd8   : > { %1259 = vmatmul.mubr.f32.gmra.mrb[4].mxu0 %v2632_v10  ;;  %1528 = vmatprep.mubr.f32.mxu1 %v3002_v23  ;;  %v2633_v23 = vld [vmem:[#allocation2 + $0x39] sm:$0xff] }
  0xd9   : > { %1263 = vmatprep.mubr.f32.mxu0 %v3254_v38  ;;  %2380 = vmatpush1.bf16.msra.mxu0 %v3199_v43  ;;  %v440_v38 = vld [vmem:[%s4191_s1 + $0x458] sm:$0xff] }
  0xda   : > { %2381 = vmatprep.subr.bf16.mxu0 %v4247_v35  ;;  %2431 = vmatpush3.bf16.msra.mxu1 %v2428_v4  ;;  %v2440_v43 = vpack.c.bf16 %v440_v38, %v439_v61  ;;  %v2651_v4 = vld [vmem:[#allocation2 + $0x111] sm:$0xff]  ;;  %v2654_v38 = vld [vmem:[#allocation2 + $0x129] sm:$0xff] }
  0xdb   : > { %1529 = vmatmul.mubr.f32.gmra.mrb[70].mxu1 %v3412_v56  ;;  %2433 = vmatprep.subr.bf16.mxu1 %v2432_v13  ;;  %v4284_v56 = vld [vmem:[#allocation9_spill] sm:$0xff] }
  0xdc   : > { %1264 = vmatmul.mubr.f32.gmra.mrb[6].mxu0 %v2633_v23  ;;  %1533 = vmatprep.mubr.f32.mxu1 %v3013_v26  ;;  %v2634_v26 = vld [vmem:[#allocation2 + $0x49] sm:$0xff] }
  0xdd   : > { %1268 = vmatprep.mubr.f32.mxu0 %v3275_v57  ;;  %2383 = vmatpush1.bf16.msra.mxu0 %v3222_v19  ;;  %v442_v57 = vld [vmem:[%s4191_s1 + $0x468] sm:$0xff] }
  0xde   : > { %2384 = vmatprep.subr.bf16.mxu0 %v4247_v35  ;;  %2435 = vmatpush3.bf16.msra.mxu1 %v2432_v13  ;;  %v2444_v19 = vpack.c.bf16 %v442_v57, %v441_v30  ;;  %v2652_v13 = vld [vmem:[#allocation2] sm:$0xff]  ;;  %v704_v30 = vld [vmem:[#allocation2 + $0x4a] sm:$0xff] }
  0xdf   : > { %1534 = vmatmul.mubr.f32.gmra.mrb[72].mxu1 %v3437_v54  ;;  %2437 = vmatprep.subr.bf16.mxu1 %v2436_v49  ;;  %v4287_v54 = vld [vmem:[#allocation11_spill] sm:$0xff] }
  0xe0   : > { %1269 = vmatmul.mubr.f32.gmra.mrb[8].mxu0 %v2634_v26  ;;  %1538 = vmatprep.mubr.f32.mxu1 %v3017_v27  ;;  %v2635_v27 = vld [vmem:[#allocation2 + $0x51] sm:$0xff] }
  0xe1   : > { %1273 = vmatprep.mubr.f32.mxu0 %v3296_v14  ;;  %2386 = vmatpush1.bf16.msra.mxu0 %v3243_v31  ;;  %v444_v14 = vld [vmem:[%s4191_s1 + $0x478] sm:$0xff] }
  0xe2   : > { %2387 = vmatprep.subr.bf16.mxu0 %v4247_v35  ;;  %2439 = vmatpush3.bf16.msra.mxu1 %v2436_v49  ;;  %v2448_v31 = vpack.c.bf16 %v444_v14, %v443_v1  ;;  %v702_v49 = vld [vmem:[#allocation2 + $0x32] sm:$0xff]  ;;  %v4301_v14 = vld [vmem:[#allocation29_spill] sm:$0xff] }
  0xe3   : > { %1539 = vmatmul.mubr.f32.gmra.mrb[74].mxu1 %v3462_v5  ;;  %2441 = vmatprep.subr.bf16.mxu1 %v2440_v43  ;;  %v2646_v5 = vld [vmem:[#allocation2 + $0xd9] sm:$0xff] }
  0xe4   : > { %1274 = vmatmul.mubr.f32.gmra.mrb[10].mxu0 %v2635_v27  ;;  %1543 = vmatprep.mubr.f32.mxu1 %v3021_v29  ;;  %v2636_v29 = vld [vmem:[#allocation2 + $0x61] sm:$0xff]  ;;  %v4300_v26 = vld [vmem:[#allocation28_spill] sm:$0xff] }
  0xe5   : > { %1278 = vmatprep.mubr.f32.mxu0 %v3317_v28  ;;  %2389 = vmatpush1.bf16.msra.mxu0 %v3264_v47  ;;  %v2637_v47 = vld [vmem:[#allocation2 + $0x69] sm:$0xff]  ;;  %v2655_v27 = vld [vmem:[#allocation2 + $0x139] sm:$0xff] }
  0xe6   : > { %2390 = vmatprep.subr.bf16.mxu0 %v4247_v35  ;;  %2443 = vmatpush3.bf16.msra.mxu1 %v2440_v43  ;;  %v4276_v28 = vld [vmem:[#allocation19_spill] sm:$0xff]  ;;  %v703_v43 = vld [vmem:[#allocation2 + $0x3a] sm:$0xff] }
  0xe7   : > { %1544 = vmatmul.mubr.f32.gmra.mrb[76].mxu1 %v3493_v51  ;;  %2445 = vmatprep.subr.bf16.mxu1 %v2444_v19  ;;  %v4273_v51 = vld [vmem:[#allocation17_spill] sm:$0xff]  ;;  %v705_v1 = vld [vmem:[#allocation2 + $0x52] sm:$0xff] }
  0xe8   : > { %1279 = vmatmul.mubr.f32.gmra.mrb[12].mxu0 %v2636_v29  ;;  %1548 = vmatprep.mubr.f32.mxu1 %v3032_v33  ;;  %v2638_v33 = vld [vmem:[#allocation2 + $0x79] sm:$0xff] }
  0xe9   : > { %1283 = vmatprep.mubr.f32.mxu0 %v3338_v45  ;;  %2392 = vmatpush1.bf16.msra.mxu0 %v3285_v9  ;;  %v4274_v9 = vld [vmem:[#allocation8_spill] sm:$0xff]  ;;  %v4278_v45 = vld [vmem:[#allocation6_spill] sm:$0xff] }
  0xea   : > { %2393 = vmatprep.subr.bf16.mxu0 %v4247_v35  ;;  %2447 = vmatpush3.bf16.msra.mxu1 %v2444_v19 }
  0xeb   : > { %1549 = vmatmul.mubr.f32.gmra.mrb[78].mxu1 %v3508_v62  ;;  %2449 = vmatprep.subr.bf16.mxu1 %v2448_v31  ;;  %v4290_v62 = vld [vmem:[#allocation16_spill] sm:$0xff] }
  0xec   : > { %1284 = vmatmul.mubr.f32.gmra.mrb[14].mxu0 %v2637_v47  ;;  %1553 = vmatprep.mubr.f32.mxu1 %v3043_v36  ;;  %v2639_v36 = vld [vmem:[#allocation2 + $0x81] sm:$0xff] }
  0xed   : > { %1288 = vmatprep.mubr.f32.mxu0 %v3362_v53  ;;  %2395 = vmatpush1.bf16.msra.mxu0 %v3306_v20  ;;  %v4275_v20 = vld [vmem:[#allocation5_spill] sm:$0xff]  ;;  %v4280_v53 = vld [vmem:[#allocation12_spill] sm:$0xff] }
  0xee   : > { %2396 = vmatprep.subr.bf16.mxu0 %v4247_v35  ;;  %2451 = vmatpush3.bf16.msra.mxu1 %v2448_v31  ;;  %v706_v31 = vld [vmem:[#allocation2 + $0x62] sm:$0xff] }
  0xef   : > { %1554 = vmatmul.mubr.f32.gmra.mrb[80].mxu1 %v3519_v46  ;;  %v4291_v46 = vld [vmem:[#allocation18_spill] sm:$0xff] }
  0xf0   : > { %1289 = vmatmul.mubr.f32.gmra.mrb[16].mxu0 %v2638_v33  ;;  %1558 = vmatprep.mubr.f32.mxu1 %v3047_v37  ;;  %v2640_v37 = vld [vmem:[#allocation2 + $0x91] sm:$0xff]  ;;  %v2656_v33 = vld [vmem:[#allocation2 + $0x141] sm:$0xff] }
  0xf1   : > { %1293 = vmatprep.mubr.f32.mxu0 %v3386_v24  ;;  %2398 = vmatpush1.bf16.msra.mxu0 %v3327_v41  ;;  %v4277_v41 = vld [vmem:[#allocation10_spill] sm:$0xff]  ;;  %v4282_v24 = vld [vmem:[#allocation23_spill] sm:$0xff] }
  0xf2   : > { %2399 = vmatprep.subr.bf16.mxu0 %v4247_v35 }
  0xf3   : > { %1559 = vmatmul.mubr.f32.gmra.mrb[82].mxu1 %v3527_v0  ;;  %v4294_v0 = vld [vmem:[#allocation32_spill] sm:$0xff] }
  0xf4   : > { %1294 = vmatmul.mubr.f32.gmra.mrb[18].mxu0 %v2639_v36  ;;  %1563 = vmatprep.mubr.f32.mxu1 %v3051_v39  ;;  %v2641_v39 = vld [vmem:[#allocation2 + $0x99] sm:$0xff]  ;;  %v707_v36 = vld [vmem:[#allocation2 + $0x6a] sm:$0xff] }
  0xf5   : > { %1298 = vmatprep.mubr.f32.mxu0 %v3410_v52  ;;  %2401 = vmatpush1.bf16.msra.mxu0 %v3350_v59  ;;  %v4279_v59 = vld [vmem:[#allocation21_spill] sm:$0xff] }
  0xf6   : > { %2402 = vmatprep.subr.bf16.mxu0 %v4247_v35  ;;  %v4283_v52 = vld [vmem:[#allocation13_spill] sm:$0xff] }
  0xf7   : > { %1564 = vmatmul.mubr.f32.gmra.mrb[84].mxu1 %v3535_v55  ;;  %v700_v55 = vld [vmem:[#allocation2 + $0x199] sm:$0xff] }
  0xf8   : > { %1299 = vmatmul.mubr.f32.gmra.mrb[20].mxu0 %v2640_v37  ;;  %1568 = vmatprep.mubr.f32.mxu1 %v3069_v48  ;;  %v2642_v48 = vld [vmem:[#allocation2 + $0xa9] sm:$0xff] }
  0xf9   : > { %1303 = vmatprep.mubr.f32.mxu0 %v3435_v17  ;;  %2404 = vmatpush1.bf16.msra.mxu0 %v3374_v63  ;;  %v4281_v63 = vld [vmem:[#allocation7_spill] sm:$0xff]  ;;  %v4286_v17 = vld [vmem:[#allocation14_spill] sm:$0xff] }
  0xfa   : > { %2405 = vmatprep.subr.bf16.mxu0 %v4247_v35  ;;  %v4302_v37 = vld [vmem:[#allocation30_spill] sm:$0xff] }
  0xfb   : > { %1569 = vmatmul.mubr.f32.gmra.mrb[86].mxu1 %v4273_v51  ;;  %v708_v51 = vld [vmem:[#allocation2 + $0x7a] sm:$0xff] }
  0xfc   : > { %1304 = vmatmul.mubr.f32.gmra.mrb[22].mxu0 %v2641_v39  ;;  %1573 = vmatprep.mubr.f32.mxu1 %v3087_v60  ;;  %v2643_v60 = vld [vmem:[#allocation2 + $0xb1] sm:$0xff] }
  0xfd   : > { %1308 = vmatprep.mubr.f32.mxu0 %v4274_v9  ;;  %2407 = vmatpush1.bf16.msra.mxu0 %v4275_v20  ;;  %v2657_v20 = vld [vmem:[#allocation2 + $0x151] sm:$0xff] }
  0xfe   : > { %2408 = vmatprep.subr.bf16.mxu0 %v4247_v35 }
  0xff   : > { %1574 = vmatmul.mubr.f32.gmra.mrb[88].mxu1 %v4276_v28  ;;  %v709_v28 = vld [vmem:[#allocation2 + $0x82] sm:$0xff] }
 0x100   : > { %1309 = vmatmul.mubr.f32.gmra.mrb[24].mxu0 %v2642_v48  ;;  %1578 = vmatprep.mubr.f32.mxu1 %v3098_v7  ;;  %v2644_v7 = vld [vmem:[#allocation2 + $0xc1] sm:$0xff]  ;;  %v4303_v48 = vld [vmem:[#allocation31_spill] sm:$0xff] }
 0x101   : > { %1313 = vmatprep.mubr.f32.mxu0 %v4277_v41  ;;  %2410 = vmatpush1.bf16.msra.mxu0 %v4278_v45  ;;  %v710_v41 = vld [vmem:[#allocation2 + $0x92] sm:$0xff] }
 0x102   : > { %2411 = vmatprep.subr.bf16.mxu0 %v4247_v35 }
 0x103   : > { %1579 = vmatmul.mubr.f32.gmra.mrb[90].mxu1 %v4279_v59 }
 0x104   : > { %1314 = vmatmul.mubr.f32.gmra.mrb[26].mxu0 %v2643_v60  ;;  %1583 = vmatprep.mubr.f32.mxu1 %v3109_v12  ;;  %v2645_v12 = vld [vmem:[#allocation2 + $0xc9] sm:$0xff]  ;;  %v2658_v60 = vld [vmem:[#allocation2 + $0x159] sm:$0xff] }
 0x105   : > { %1318 = vmatprep.mubr.f32.mxu0 %v4280_v53  ;;  %2413 = vmatpush1.bf16.msra.mxu0 %v4281_v63  ;;  %v711_v53 = vld [vmem:[#allocation2 + $0x9a] sm:$0xff] }
 0x106   : > { %2414 = vmatprep.subr.bf16.mxu0 %v4247_v35  ;;  %v4304_v63 = vld [vmem:[#allocation33_spill] sm:$0xff] }
 0x107   : > { %1584 = vmatmul.mubr.f32.gmra.mrb[92].mxu1 %v4282_v24  ;;  %v712_v24 = vld [vmem:[#allocation2 + $0xaa] sm:$0xff] }
 0x108   : > { %1319 = vmatmul.mubr.f32.gmra.mrb[28].mxu0 %v2644_v7  ;;  %1588 = vmatprep.mubr.f32.mxu1 %v3114_v15  ;;  %v4289_v15 = vld [vmem:[#allocation15_spill] sm:$0xff] }
 0x109   : > { %1323 = vmatprep.mubr.f32.mxu0 %v4283_v52  ;;  %2416 = vmatpush1.bf16.msra.mxu0 %v4284_v56  ;;  %v2659_v56 = vld [vmem:[#allocation2 + $0x169] sm:$0xff] }
 0x10a   : > { %2417 = vmatprep.subr.bf16.mxu0 %v4247_v35  ;;  %v2647_v35 = vld [vmem:[#allocation2 + $0xe1] sm:$0xff] }
 0x10b   : > { %1589 = vmatmul.mubr.f32.gmra.mrb[94].mxu1 %v4285_v6  ;;  %v713_v6 = vld [vmem:[#allocation2 + $0xb2] sm:$0xff] }
 0x10c   : > { %1324 = vmatmul.mubr.f32.gmra.mrb[30].mxu0 %v2645_v12  ;;  %1593 = vmatprep.mubr.f32.mxu1 %v3125_v18  ;;  %v2648_v18 = vld [vmem:[#allocation2 + $0xf1] sm:$0xff] }
 0x10d   : > { %1328 = vmatprep.mubr.f32.mxu0 %v4286_v17  ;;  %2419 = vmatpush1.bf16.msra.mxu0 %v4287_v54  ;;  %v4305_v12 = vld [vmem:[#allocation35_spill] sm:$0xff]  ;;  %v714_v17 = vld [vmem:[#allocation2 + $0xc2] sm:$0xff] }
 0x10e   : > { %v3797_v54 = vld [vmem:[#allocation2 + $0x182] sm:$0xff] }
 0x10f   : > { %1594 = vmatmul.mubr.f32.gmra.mrb[96].mxu1 %v4288_v25 }
 0x110   : > { %1329 = vmatmul.mubr.f32.gmra.mrb[32].mxu0 %v2646_v5  ;;  %1598 = vmatprep.mubr.f32.mxu1 %v3135_v21  ;;  %v2649_v21 = vld [vmem:[#allocation2 + $0xf9] sm:$0xff] }
 0x111   : > { %1333 = vmatprep.mubr.f32.mxu0 %v4289_v15  ;;  %v2660_v15 = vld [vmem:[#allocation2 + $0x171] sm:$0xff] }
 0x113   : > { %1599 = vmatmul.mubr.f32.gmra.mrb[98].mxu1 %v3591_v16  ;;  %v4293_v16 = vld [vmem:[#allocation20_spill] sm:$0xff] }
 0x114   : > { %1334 = vmatmul.mubr.f32.gmra.mrb[34].mxu0 %v2647_v35  ;;  %1603 = vmatprep.mubr.f32.mxu1 %v3149_v34  ;;  %v2650_v34 = vld [vmem:[#allocation2 + $0x109] sm:$0xff] }
 0x115   : > { %1338 = vmatprep.mubr.f32.mxu0 %v4290_v62  ;;  %v715_v35 = vld [vmem:[#allocation2 + $0xca] sm:$0xff]  ;;  %v716_v62 = vld [vmem:[#allocation2 + $0xda] sm:$0xff] }
 0x117   : > { %1604 = vmatmul.mubr.f32.gmra.mrb[100].mxu1 %v3599_v8  ;;  %v4296_v8 = vld [vmem:[#allocation22_spill] sm:$0xff] }
 0x118   : > { %1339 = vmatmul.mubr.f32.gmra.mrb[36].mxu0 %v2648_v18  ;;  %1608 = vmatprep.mubr.f32.mxu1 %v3160_v40  ;;  %v3802_v18 = vld [vmem:[#allocation2 + $0x18a] sm:$0xff] }
 0x119   : > { %1343 = vmatprep.mubr.f32.mxu0 %v4291_v46 }
 0x11b   : > { %1609 = vmatmul.mubr.f32.gmra.mrb[102].mxu1 %v3607_v44 }
 0x11c   : > { %1344 = vmatmul.mubr.f32.gmra.mrb[38].mxu0 %v2649_v21  ;;  %1613 = vmatprep.mubr.f32.mxu1 %v4292_v3  ;;  %v2661_v3 = vld [vmem:[#allocation2 + $0x181] sm:$0xff] }
 0x11d   : > { %1348 = vmatprep.mubr.f32.mxu0 %v4293_v16 }
 0x11f   : > { %1614 = vmatmul.mubr.f32.gmra.mrb[104].mxu1 %v4294_v0  ;;  %v717_v0 = vld [vmem:[#allocation2 + $0xe2] sm:$0xff] }
 0x120   : > { %1349 = vmatmul.mubr.f32.gmra.mrb[40].mxu0 %v2650_v34  ;;  %1618 = vmatprep.mubr.f32.mxu1 %v4295_v50  ;;  %v718_v34 = vld [vmem:[#allocation2 + $0xf2] sm:$0xff] }
 0x121   : > { %1353 = vmatprep.mubr.f32.mxu0 %v4296_v8  ;;  %v670_v50 = vld [vmem:[#allocation2 + $0x31] sm:$0xff] }
 0x122   : > { %v3772_v40 = vpop.f32.mrb[0].mxu1 }
 0x123   : > { %1619 = vmatmul.mubr.f32.gmra.mrb[106].mxu1 %v4297_v2  ;;  %v802_v44 = vpop.f32.mrb[1].mxu1 }
 0x124   : > { %1354 = vmatmul.mubr.f32.gmra.mrb[42].mxu0 %v2651_v4  ;;  %1623 = vmatprep.mubr.f32.mxu1 %v700_v55  ;;  %v2662_v44 = vld [vmem:[#allocation2 + $0x189] sm:$0xff]  ;;  %v719_v4 = vld [vmem:[#allocation2 + $0xfa] sm:$0xff] }
 0x125   : > { %1358 = vmatprep.mubr.f32.mxu0 %v4298_v58 }
 0x126   : > { %v3776_v32 = vpop.f32.mrb[2].mxu1 }
 0x127   : > { %1624 = vmatmul.mubr.f32.gmra.mrb[108].mxu1 %v2652_v13  ;;  %v807_v10 = vpop.f32.mrb[3].mxu1 }
 0x128   : > { %1359 = vmatmul.mubr.f32.gmra.mrb[44].mxu0 %v2653_v11  ;;  %1628 = vmatprep.mubr.f32.mxu1 %v701_v42  ;;  %v638_v42 = vld [vmem:[#allocation2 + $0x30] sm:$0xff] }
 0x129   : > { %1363 = vmatprep.mubr.f32.mxu0 %v4299_v22 }
 0x12a   : > { %v3779_v23 = vpop.f32.mrb[4].mxu1 }
 0x12b   : > { %1629 = vmatmul.mubr.f32.gmra.mrb[110].mxu1 %v2652_v13  ;;  %v812_v61 = vpop.f32.mrb[5].mxu1  ;;  %v671_v13 = vld [vmem:[#allocation2 + $0x39] sm:$0xff] }
 0x12c   : > { %1364 = vmatmul.mubr.f32.gmra.mrb[46].mxu0 %v2654_v38  ;;  %2180 = vmatprep.mubr.f32.mxu1 %v702_v49  ;;  %v639_v49 = vld [vmem:[#allocation2 + $0x38] sm:$0xff]  ;;  %v672_v61 = vld [vmem:[#allocation2 + $0x49] sm:$0xff] }
 0x12d   : > { %1368 = vmatprep.mubr.f32.mxu0 %v4300_v26 }
 0x12e   : > { %v3782_v57 = vpop.f32.mrb[6].mxu1 }
 0x12f   : > { %2181 = vmatmul.mubr.f32.vlgmr.msra.gmra.mrb[112].mxu1 %v703_v43  ;;  %v817_v19 = vpop.f32.mrb[7].mxu1 }
 0x130   : > { %1369 = vmatmul.mubr.f32.gmra.mrb[48].mxu0 %v2655_v27  ;;  %2183 = vmatprep.mubr.f32.mxu1 %v704_v30  ;;  %v640_v30 = vld [vmem:[#allocation2 + $0x48] sm:$0xff]  ;;  %v673_v19 = vld [vmem:[#allocation2 + $0x51] sm:$0xff] }
 0x131   : > { %1373 = vmatprep.mubr.f32.mxu0 %v4301_v14 }
 0x132   : > { %v3785_v29 = vpop.f32.mrb[8].mxu1 }
 0x133   : > { %2184 = vmatmul.mubr.f32.gmra.mrb[114].mxu1 %v705_v1  ;;  %v822_v47 = vpop.f32.mrb[9].mxu1 }
 0x134   : > { %1374 = vmatmul.mubr.f32.gmra.mrb[50].mxu0 %v2656_v33  ;;  %2186 = vmatprep.mubr.f32.mxu1 %v706_v31  ;;  %v674_v31 = vld [vmem:[#allocation2 + $0x61] sm:$0xff]  ;;  %v675_v33 = vld [vmem:[#allocation2 + $0x69] sm:$0xff] }
 0x135   : > { %1378 = vmatprep.mubr.f32.mxu0 %v4302_v37 }
 0x136   : > { %v3788_v39 = vpop.f32.mrb[10].mxu1 }
 0x137   : > { %2187 = vmatmul.mubr.f32.gmra.mrb[116].mxu1 %v707_v36  ;;  %v827_v9 = vpop.f32.mrb[11].mxu1 }
 0x138   : > { %1379 = vmatmul.mubr.f32.gmra.mrb[52].mxu0 %v2657_v20  ;;  %2189 = vmatprep.mubr.f32.mxu1 %v708_v51  ;;  %v676_v51 = vld [vmem:[#allocation2 + $0x79] sm:$0xff] }
 0x139   : > { %1383 = vmatprep.mubr.f32.mxu0 %v4303_v48  ;;  %v732_v20 = vld [vmem:[#allocation2 + $0x19a] sm:$0xff] }
 0x13a   : > { %v3791_v45 = vpop.f32.mrb[12].mxu1 }
 0x13b   : > { %2190 = vmatmul.mubr.f32.gmra.mrb[118].mxu1 %v709_v28  ;;  %v832_v59 = vpop.f32.mrb[13].mxu1  ;;  %v677_v28 = vld [vmem:[#allocation2 + $0x81] sm:$0xff] }
 0x13c   : > { %1384 = vmatmul.mubr.f32.gmra.mrb[54].mxu0 %v2658_v60  ;;  %2192 = vmatprep.mubr.f32.mxu1 %v710_v41  ;;  %v733_v59 = vld [vmem:[#allocation2 + $0x1a2] sm:$0xff] }
 0x13d   : > { %1388 = vmatprep.mubr.f32.mxu0 %v4304_v63  ;;  %v645_v60 = vld [vmem:[#allocation2 + $0x80] sm:$0xff] }
 0x13e   : > { %v3794_v7 = vpop.f32.mrb[14].mxu1 }
 0x13f   : > { %2193 = vmatmul.mubr.f32.gmra.mrb[120].mxu1 %v711_v53  ;;  %v837_v52 = vpop.f32.mrb[15].mxu1 }
 0x140   : > { %1389 = vmatmul.mubr.f32.gmra.mrb[56].mxu0 %v2659_v56  ;;  %2195 = vmatprep.mubr.f32.mxu1 %v712_v24 }
 0x141   : > { %1393 = vmatprep.mubr.f32.mxu0 %v4305_v12 }
 0x142   : > { %v3799_v25 = vpop.f32.mrb[16].mxu1 }
 0x143   : > { %2196 = vmatmul.mubr.f32.gmra.mrb[122].mxu1 %v713_v6  ;;  %v842_v5 = vpop.f32.mrb[17].mxu1 }
 0x144   : > { %1394 = vmatmul.mubr.f32.gmra.mrb[58].mxu0 %v2660_v15  ;;  %2198 = vmatprep.mubr.f32.mxu1 %v714_v17 }
 0x145   : > { %1398 = vmatprep.mubr.f32.mxu0 %v3797_v54 }
 0x146   : > { %v3804_v46 = vpop.f32.mrb[18].mxu1 }
 0x147   : > { %2199 = vmatmul.mubr.f32.gmra.mrb[124].mxu1 %v715_v35  ;;  %v847_v21 = vpop.f32.mrb[19].mxu1 }
 0x148   : > { %1399 = vmatmul.mubr.f32.gmra.mrb[60].mxu0 %v2661_v3  ;;  %2201 = vmatprep.mubr.f32.mxu1 %v716_v62 }
 0x149   : > { %1403 = vmatprep.mubr.f32.mxu0 %v3802_v18 }
 0x14a   : > { %v3807_v55 = vpop.f32.mrb[20].mxu1 }
 0x14b   : > { %2202 = vmatmul.mubr.f32.gmra.mrb[126].mxu1 %v717_v0  ;;  %v852_v2 = vpop.f32.mrb[21].mxu1 }
 0x14c   : > { %1404 = vmatmul.mubr.f32.gmra.mrb[62].mxu0 %v2662_v44  ;;  %2204 = vmatprep.mubr.f32.mxu1 %v718_v34 }
 0x14d   : > { %1473 = vmatprep.mubr.f32.mxu0 %v670_v50 }
 0x14e   : > { %v3809_v10 = vpop.f32.mrb[22].mxu1 }
 0x14f   : > { %2205 = vmatmul.mubr.f32.gmra.mrb[128].mxu1 %v719_v4  ;;  %v857_v11 = vpop.f32.mrb[23].mxu1 }
 0x150   : > { %1474 = vmatmul.mubr.f32.vlgmr.msra.gmra.mrb[0].mxu0 %v638_v42  ;;  %2207 = vmatprep.mubr.f32.mxu1 %v4293_v16  ;;  %v641_v16 = vld [vmem:[#allocation2 + $0x50] sm:$0xff] }
 0x151   : > { %1478 = vmatprep.mubr.f32.mxu0 %v671_v13 }
 0x152   : > { %v3812_v38 = vpop.f32.mrb[24].mxu1 }
 0x153   : > { %2208 = vmatmul.mubr.f32.gmra.mrb[130].mxu1 %v4296_v8  ;;  %v862_v43 = vpop.f32.mrb[25].mxu1 }
 0x154   : > { %1479 = vmatmul.mubr.f32.gmra.mrb[2].mxu0 %v639_v49  ;;  %2210 = vmatprep.mubr.f32.mxu1 %v4298_v58  ;;  %v642_v58 = vld [vmem:[#allocation2 + $0x60] sm:$0xff] }
 0x155   : > { %1483 = vmatprep.mubr.f32.mxu0 %v672_v61 }
 0x156   : > { %v3816_v27 = vpop.f32.mrb[26].mxu1 }
 0x157   : > { %2211 = vmatmul.mubr.f32.gmra.mrb[132].mxu1 %v4299_v22  ;;  %v867_v1 = vpop.f32.mrb[27].mxu1 }
 0x158   : > { %1484 = vmatmul.mubr.f32.gmra.mrb[4].mxu0 %v640_v30  ;;  %2213 = vmatprep.mubr.f32.mxu1 %v4300_v26  ;;  %v643_v26 = vld [vmem:[#allocation2 + $0x68] sm:$0xff] }
 0x159   : > { %1488 = vmatprep.mubr.f32.mxu0 %v673_v19 }
 0x15a   : > { %v3820_v47 = vpop.f32.mrb[28].mxu1 }
 0x15b   : > { %2214 = vmatmul.mubr.f32.gmra.mrb[134].mxu1 %v4301_v14  ;;  %v872_v8 = vpop.f32.mrb[29].mxu1 }
 0x15c   : > { %1489 = vmatmul.mubr.f32.gmra.mrb[6].mxu0 %v641_v16  ;;  %2216 = vmatprep.mubr.f32.mxu1 %v4302_v37  ;;  %v644_v37 = vld [vmem:[#allocation2 + $0x78] sm:$0xff] }
 0x15d   : > { %1493 = vmatprep.mubr.f32.mxu0 %v674_v31 }
 0x15e   : > { %v3824_v36 = vpop.f32.mrb[30].mxu1 }
 0x15f   : > { %2217 = vmatmul.mubr.f32.gmra.mrb[136].mxu1 %v4303_v48  ;;  %v877_v22 = vpop.f32.mrb[31].mxu1 }
 0x160   : > { %1494 = vmatmul.mubr.f32.gmra.mrb[8].mxu0 %v642_v58  ;;  %2219 = vmatprep.mubr.f32.mxu1 %v4304_v63 }
 0x161   : > { %1498 = vmatprep.mubr.f32.mxu0 %v675_v33 }
 0x162   : > { %v3828_v9 = vpop.f32.mrb[32].mxu1 }
 0x163   : > { %2220 = vmatmul.mubr.f32.gmra.mrb[138].mxu1 %v4305_v12  ;;  %v882_v14 = vpop.f32.mrb[33].mxu1 }
 0x164   : > { %1499 = vmatmul.mubr.f32.gmra.mrb[10].mxu0 %v643_v26  ;;  %2222 = vmatprep.mubr.f32.mxu1 %v3797_v54 }
 0x165   : > { %1503 = vmatprep.mubr.f32.mxu0 %v676_v51 }
 0x166   : > { %v3832_v48 = vpop.f32.mrb[34].mxu1 }
 0x167   : > { %2223 = vmatmul.mubr.f32.gmra.mrb[140].mxu1 %v3802_v18  ;;  %v887_v41 = vpop.f32.mrb[35].mxu1 }
 0x168   : > { %1504 = vmatmul.mubr.f32.gmra.mrb[12].mxu0 %v644_v37  ;;  %2225 = vmatprep.mubr.f32.mxu1 %v732_v20 }
 0x169   : > { %1508 = vmatprep.mubr.f32.mxu0 %v677_v28 }
 0x16a   : > { %v3835_v53 = vpop.f32.mrb[36].mxu1 }
 0x16b   : > { %2226 = vmatmul.mubr.f32.gmra.mrb[142].mxu1 %v733_v59  ;;  %v892_v63 = vpop.f32.mrb[37].mxu1 }
 0x16c   : > { %1509 = vmatmul.mubr.f32.gmra.mrb[14].mxu0 %v645_v60 }
 0x16e   : > { %v3837_v24 = vpop.f32.mrb[38].mxu1 }
 0x16f   : > { %v897_v52 = vpop.f32.mrb[39].mxu1 }
 0x172   : > { %v3839_v56 = vpop.f32.mrb[40].mxu1 }
 0x173   : > { %v902_v6 = vpop.f32.mrb[41].mxu1 }
 0x176   : > { %v3841_v12 = vpop.f32.mrb[42].mxu1 }
 0x177   : > { %v907_v17 = vpop.f32.mrb[43].mxu1 }
 0x17a   : > { %v3843_v54 = vpop.f32.mrb[44].mxu1 }
 0x17b   : > { %v912_v5 = vpop.f32.mrb[45].mxu1 }
 0x17e   : > { %v3845_v15 = vpop.f32.mrb[46].mxu1 }
 0x17f   : > { %v917_v35 = vpop.f32.mrb[47].mxu1 }
 0x182   : > { %v3847_v62 = vpop.f32.mrb[48].mxu1 }
 0x183   : > { %v922_v18 = vpop.f32.mrb[49].mxu1 }
 0x186   : > { %v3849_v21 = vpop.f32.mrb[50].mxu1 }
 0x187   : > { %v927_v3 = vpop.f32.mrb[51].mxu1 }
 0x18a   : > { %v3851_v0 = vpop.f32.mrb[52].mxu1 }
 0x18b   : > { %v932_v34 = vpop.f32.mrb[53].mxu1 }
 0x18e   : > { %v3853_v50 = vpop.f32.mrb[54].mxu1 }
 0x18f   : > { %v937_v2 = vpop.f32.mrb[55].mxu1 }
 0x192   : > { %v3855_v44 = vpop.f32.mrb[56].mxu1 }
 0x193   : > { %v942_v4 = vpop.f32.mrb[57].mxu1 }
 0x196   : > { %v3857_v42 = vpop.f32.mrb[58].mxu1 }
 0x197   : > { %v947_v13 = vpop.f32.mrb[59].mxu1 }
 0x19a   : > { %v3859_v11 = vpop.f32.mrb[60].mxu1 }
 0x19b   : > { %v952_v49 = vpop.f32.mrb[61].mxu1 }
 0x19e   : > { %v3861_v61 = vpop.f32.mrb[62].mxu1 }
 0x19f   : > { %v957_v43 = vpop.f32.mrb[63].mxu1 }
 0x1a2   : > { %v1515_v30 = vpop.f32.mrb[64].mxu1 }
 0x1a3   : > { %v1517_v19 = vpop.f32.mrb[65].mxu1 }
 0x1a6   : > { %v1520_v1 = vpop.f32.mrb[66].mxu1 }
 0x1a7   : > { %v1522_v16 = vpop.f32.mrb[67].mxu1 }
 0x1aa   : > { %v1525_v31 = vpop.f32.mrb[68].mxu1 }
 0x1ab   : > { %v1527_v8 = vpop.f32.mrb[69].mxu1 }
 0x1ae   : > { %v1530_v58 = vpop.f32.mrb[70].mxu1 }
 0x1af   : > { %v1532_v33 = vpop.f32.mrb[71].mxu1 }
 0x1b2   : > { %v1535_v22 = vpop.f32.mrb[72].mxu1 }
 0x1b3   : > { %v1537_v26 = vpop.f32.mrb[73].mxu1 }
 0x1b6   : > { %v1540_v51 = vpop.f32.mrb[74].mxu1 }
 0x1b7   : > { %v1542_v14 = vpop.f32.mrb[75].mxu1 }
 0x1ba   : > { %v1545_v37 = vpop.f32.mrb[76].mxu1 }
 0x1bb   : > { %v1547_v20 = vpop.f32.mrb[77].mxu1 }
 0x1be   : > { %v1550_v28 = vpop.f32.mrb[78].mxu1 }
 0x1bf   : > { %v1552_v41 = vpop.f32.mrb[79].mxu1 }
 0x1c2   : > { %v1555_v59 = vpop.f32.mrb[80].mxu1 }
 0x1c3   : > { %v1290_v60 = vpop.f32.mrb[16].mxu0  ;;  %v1557_v63 = vpop.f32.mrb[81].mxu1 }
 0x1c4   : > { %v2492_v52 = vadd.f32 %v1290_v60, %v3799_v25  ;;  %v1292_v6 = vpop.f32.mrb[17].mxu0 }
 0x1c6   : > { %v3864_v17 = vadd.f32 %v2492_v52, %v1515_v30  ;;  %v1560_v5 = vpop.f32.mrb[82].mxu1 }
 0x1c7   : > { %v1295_v35 = vpop.f32.mrb[18].mxu0  ;;  %v1562_v18 = vpop.f32.mrb[83].mxu1 }
 0x1c8   : > { %v2494_v3 = vadd.f32 %v1295_v35, %v3804_v46  ;;  %v1297_v34 = vpop.f32.mrb[19].mxu0 }
 0x1ca   : > { %v3867_v2 = vadd.f32 %v2494_v3, %v1520_v1  ;;  %v1565_v4 = vpop.f32.mrb[84].mxu1 }
 0x1cb   : > { %v1300_v13 = vpop.f32.mrb[20].mxu0  ;;  %v1567_v49 = vpop.f32.mrb[85].mxu1 }
 0x1cc   : > { %v2496_v43 = vadd.f32 %v1300_v13, %v3807_v55  ;;  %v1302_v19 = vpop.f32.mrb[21].mxu0 }
 0x1ce   : > { %v3870_v16 = vadd.f32 %v2496_v43, %v1525_v31  ;;  %v1570_v25 = vpop.f32.mrb[86].mxu1 }
 0x1cf   : > { %v1305_v8 = vpop.f32.mrb[22].mxu0  ;;  %v1572_v30 = vpop.f32.mrb[87].mxu1 }
 0x1d0   : > { %v2498_v33 = vadd.f32 %v1305_v8, %v3809_v10  ;;  %v1307_v26 = vpop.f32.mrb[23].mxu0 }
 0x1d2   : > { %v3873_v14 = vadd.f32 %v2498_v33, %v1530_v58  ;;  %v1575_v46 = vpop.f32.mrb[88].mxu1 }
 0x1d3   : > { %v1310_v20 = vpop.f32.mrb[24].mxu0  ;;  %v1577_v1 = vpop.f32.mrb[89].mxu1 }
 0x1d4   : > { %v2500_v41 = vadd.f32 %v1310_v20, %v3812_v38  ;;  %v1312_v60 = vpop.f32.mrb[25].mxu0 }
 0x1d6   : > { %v3876_v63 = vadd.f32 %v2500_v41, %v1535_v22  ;;  %v1580_v55 = vpop.f32.mrb[90].mxu1 }
 0x1d7   : > { %v1315_v52 = vpop.f32.mrb[26].mxu0  ;;  %v1582_v31 = vpop.f32.mrb[91].mxu1 }
 0x1d8   : > { %v2502_v6 = vadd.f32 %v1315_v52, %v3816_v27  ;;  %v1317_v35 = vpop.f32.mrb[27].mxu0 }
 0x1da   : > { %v3879_v18 = vadd.f32 %v2502_v6, %v1540_v51  ;;  %v1585_v10 = vpop.f32.mrb[92].mxu1 }
 0x1db   : > { %v1320_v3 = vpop.f32.mrb[28].mxu0  ;;  %v1587_v58 = vpop.f32.mrb[93].mxu1 }
 0x1dc   : > { %v2504_v34 = vadd.f32 %v1320_v3, %v3820_v47  ;;  %v1322_v13 = vpop.f32.mrb[29].mxu0 }
 0x1de   : > { %v3882_v49 = vadd.f32 %v2504_v34, %v1545_v37  ;;  %v1590_v38 = vpop.f32.mrb[94].mxu1 }
 0x1df   : > { %v1325_v43 = vpop.f32.mrb[30].mxu0  ;;  %v1592_v22 = vpop.f32.mrb[95].mxu1 }
 0x1e0   : > { %v2506_v19 = vadd.f32 %v1325_v43, %v3824_v36  ;;  %v1327_v8 = vpop.f32.mrb[31].mxu0 }
 0x1e2   : > { %v3885_v30 = vadd.f32 %v2506_v19, %v1550_v28  ;;  %v1595_v27 = vpop.f32.mrb[96].mxu1 }
 0x1e3   : > { %v1330_v33 = vpop.f32.mrb[32].mxu0  ;;  %v1597_v51 = vpop.f32.mrb[97].mxu1 }
 0x1e4   : > { %v2508_v26 = vadd.f32 %v1330_v33, %v3828_v9  ;;  %v1332_v20 = vpop.f32.mrb[33].mxu0 }
 0x1e6   : > { %v3888_v1 = vadd.f32 %v2508_v26, %v1555_v59  ;;  %v1600_v47 = vpop.f32.mrb[98].mxu1 }
 0x1e7   : > { %v1335_v41 = vpop.f32.mrb[34].mxu0  ;;  %v1602_v37 = vpop.f32.mrb[99].mxu1 }
 0x1e8   : > { %v2510_v60 = vadd.f32 %v1335_v41, %v3832_v48  ;;  %v1337_v52 = vpop.f32.mrb[35].mxu0 }
 0x1ea   : > { %v3891_v31 = vadd.f32 %v2510_v60, %v1560_v5  ;;  %v1605_v36 = vpop.f32.mrb[100].mxu1 }
 0x1eb   : > { %v1340_v6 = vpop.f32.mrb[36].mxu0  ;;  %v1607_v28 = vpop.f32.mrb[101].mxu1 }
 0x1ec   : > { %v2512_v35 = vadd.f32 %v1340_v6, %v3835_v53  ;;  %v1342_v3 = vpop.f32.mrb[37].mxu0 }
 0x1ee   : > { %v3894_v58 = vadd.f32 %v2512_v35, %v1565_v4  ;;  %v1610_v9 = vpop.f32.mrb[102].mxu1 }
 0x1ef   : > { %v1345_v34 = vpop.f32.mrb[38].mxu0  ;;  %v1612_v59 = vpop.f32.mrb[103].mxu1 }
 0x1f0   : > { %v2514_v13 = vadd.f32 %v1345_v34, %v3837_v24  ;;  %v1347_v43 = vpop.f32.mrb[39].mxu0 }
 0x1f2   : > { %v3897_v22 = vadd.f32 %v2514_v13, %v1570_v25  ;;  %v1615_v48 = vpop.f32.mrb[104].mxu1 }
 0x1f3   : > { %v1350_v19 = vpop.f32.mrb[40].mxu0  ;;  %v1617_v5 = vpop.f32.mrb[105].mxu1 }
 0x1f4   : > { %v2516_v8 = vadd.f32 %v1350_v19, %v3839_v56  ;;  %v1352_v33 = vpop.f32.mrb[41].mxu0 }
 0x1f6   : > { %v3900_v51 = vadd.f32 %v2516_v8, %v1575_v46  ;;  %v3902_v53 = vpop.f32.mrb[106].mxu1 }
 0x1f7   : > { %v1355_v4 = vpop.f32.mrb[42].mxu0  ;;  %v1622_v26 = vpop.f32.mrb[107].mxu1 }
 0x1f8   : > { %v2518_v20 = vadd.f32 %v1355_v4, %v3841_v12  ;;  %v1357_v41 = vpop.f32.mrb[43].mxu0 }
 0x1fa   : > { %v3905_v37 = vpop.f32.mrb[108].mxu1  ;;  %v3907_v24 = vadd.f32 %v2518_v20, %v1580_v55 }
 0x1fb   : > { %v1360_v25 = vpop.f32.mrb[44].mxu0  ;;  %v1627_v60 = vpop.f32.mrb[109].mxu1 }
 0x1fc   : > { %v2520_v52 = vadd.f32 %v1360_v25, %v3843_v54  ;;  %v1362_v6 = vpop.f32.mrb[45].mxu0 }
 0x1fe   : > { %v3910_v56 = vpop.f32.mrb[110].mxu1  ;;  %v3912_v46 = vadd.f32 %v2520_v52, %v1585_v10 }
 0x1ff   : > { %v1365_v28 = vpop.f32.mrb[46].mxu0  ;;  %v1632_v35 = vpop.f32.mrb[111].mxu1 }
 0x200   : > { %v2522_v3 = vadd.f32 %v1365_v28, %v3845_v15  ;;  %v1367_v34 = vpop.f32.mrb[47].mxu0 }
 0x202   : > { %v3915_v12 = vpop.f32.mrb[112].mxu1  ;;  %v3917_v59 = vadd.f32 %v2522_v3, %v1590_v38 }
 0x203   : > { %v1370_v55 = vpop.f32.mrb[48].mxu0  ;;  %v3919_v13 = vpop.f32.mrb[113].mxu1 }
 0x204   : > { %v2524_v43 = vadd.f32 %v1370_v55, %v3847_v62  ;;  %v1372_v54 = vpop.f32.mrb[49].mxu0 }
 0x206   : > { %v3922_v19 = vpop.f32.mrb[114].mxu1  ;;  %v3924_v5 = vadd.f32 %v2524_v43, %v1595_v27 }
 0x207   : > { %v1375_v10 = vpop.f32.mrb[50].mxu0  ;;  %v3926_v8 = vpop.f32.mrb[115].mxu1 }
 0x208   : > { %v2526_v15 = vadd.f32 %v1375_v10, %v3849_v21  ;;  %v1377_v33 = vpop.f32.mrb[51].mxu0 }
 0x20a   : > { %v3929_v4 = vpop.f32.mrb[116].mxu1  ;;  %v3931_v38 = vadd.f32 %v2526_v15, %v1600_v47 }
 0x20b   : > { %v1380_v26 = vpop.f32.mrb[52].mxu0  ;;  %v3933_v20 = vpop.f32.mrb[117].mxu1 }
 0x20c   : > { %v2528_v62 = vadd.f32 %v1380_v26, %v3851_v0  ;;  %v1382_v41 = vpop.f32.mrb[53].mxu0 }
 0x20e   : > { %v3936_v25 = vpop.f32.mrb[118].mxu1  ;;  %v3938_v27 = vadd.f32 %v2528_v62, %v1605_v36 }
 0x20f   : > { %v1385_v60 = vpop.f32.mrb[54].mxu0  ;;  %v3940_v52 = vpop.f32.mrb[119].mxu1 }
 0x210   : > { %v2530_v21 = vadd.f32 %v1385_v60, %v3853_v50  ;;  %v1387_v6 = vpop.f32.mrb[55].mxu0 }
 0x212   : > { %v2194_v0 = vpop.f32.mrb[120].mxu1  ;;  %v3950_v47 = vadd.f32 %v2530_v21, %v1610_v9 }
 0x213   : > { %v1390_v28 = vpop.f32.mrb[56].mxu0  ;;  %v3953_v36 = vadd.f32 %v3867_v2, %v2194_v0  ;;  %v1740_v35 = vpop.f32.mrb[121].mxu1 }
 0x214   : > { %v2532_v50 = vadd.f32 %v1390_v28, %v3855_v44  ;;  %v1392_v3 = vpop.f32.mrb[57].mxu0  ;;  %v3957_v34 = vadd.f32 %v3864_v17, %v1740_v35 }
 0x215   : > { %1868 = vst [vmem:[%s3948_s22 + $0x48] sm:$0xff] %v3953_v36 }
 0x216   : > { %1867 = vst [vmem:[%s3948_s22 + $0x40] sm:$0xff] %v3957_v34  ;;  %v2197_v55 = vpop.f32.mrb[122].mxu1  ;;  %v3963_v9 = vadd.f32 %v2532_v50, %v1615_v48 }
 0x217   : > { %v1395_v43 = vpop.f32.mrb[58].mxu0  ;;  %v3966_v2 = vadd.f32 %v3873_v14, %v2197_v55  ;;  %v1750_v54 = vpop.f32.mrb[123].mxu1 }
 0x218   : > { %v2534_v44 = vadd.f32 %v1395_v43, %v3857_v42  ;;  %v1397_v10 = vpop.f32.mrb[59].mxu0  ;;  %v3970_v17 = vadd.f32 %v3870_v16, %v1750_v54 }
 0x219   : > { %1870 = vst [vmem:[%s3948_s22 + $0x58] sm:$0xff] %v3966_v2 }
 0x21a   : > { %1869 = vst [vmem:[%s3948_s22 + $0x50] sm:$0xff] %v3970_v17  ;;  %v2200_v15 = vpop.f32.mrb[124].mxu1  ;;  %v3977_v48 = vadd.f32 %v2534_v44, %v3902_v53 }
 0x21b   : > { %v1400_v33 = vpop.f32.mrb[60].mxu0  ;;  %v3980_v14 = vadd.f32 %v3879_v18, %v2200_v15  ;;  %v1760_v26 = vpop.f32.mrb[125].mxu1 }
 0x21c   : > { %v2536_v42 = vadd.f32 %v1400_v33, %v3859_v11  ;;  %v1402_v62 = vpop.f32.mrb[61].mxu0  ;;  %v3984_v16 = vadd.f32 %v3876_v63, %v1760_v26 }
 0x21d   : > { %1872 = vst [vmem:[%s3948_s22 + $0x68] sm:$0xff] %v3980_v14 }
 0x21e   : > { %1871 = vst [vmem:[%s3948_s22 + $0x60] sm:$0xff] %v3984_v16  ;;  %v2203_v41 = vpop.f32.mrb[126].mxu1  ;;  %v3991_v53 = vadd.f32 %v2536_v42, %v3905_v37 }
 0x21f   : > { %v1405_v60 = vpop.f32.mrb[62].mxu0  ;;  %v3994_v18 = vadd.f32 %v3885_v30, %v2203_v41  ;;  %v1770_v21 = vpop.f32.mrb[127].mxu1 }
 0x220   : > { %v2538_v11 = vadd.f32 %v1405_v60, %v3861_v61  ;;  %v1407_v6 = vpop.f32.mrb[63].mxu0  ;;  %v3998_v63 = vadd.f32 %v3882_v49, %v1770_v21 }
 0x221   : > { %1874 = vst [vmem:[%s3948_s22 + $0x78] sm:$0xff] %v3994_v18 }
 0x222   : > { %1873 = vst [vmem:[%s3948_s22 + $0x70] sm:$0xff] %v3998_v63  ;;  %v2206_v37 = vpop.f32.mrb[128].mxu1  ;;  %v4005_v0 = vadd.f32 %v2538_v11, %v3910_v56 }
 0x223   : > { %v1475_v28 = vpop.f32.mrb[0].mxu0  ;;  %v4008_v30 = vadd.f32 %v3891_v31, %v2206_v37  ;;  %v1780_v35 = vpop.f32.mrb[129].mxu1 }
 0x224   : > { %v2484_v61 = vadd.f32 %v1475_v28, %v3772_v40  ;;  %v1477_v49 = vpop.f32.mrb[1].mxu0  ;;  %v4012_v50 = vadd.f32 %v3888_v1, %v1780_v35 }
 0x225   : > { %1876 = vst [vmem:[%s3948_s22 + $0x88] sm:$0xff] %v4008_v30 }
 0x226   : > { %v1701_v3 = vadd.f32 %v2484_v61, %v3919_v13  ;;  %1875 = vst [vmem:[%s3948_s22 + $0x80] sm:$0xff] %v4012_v50  ;;  %v2209_v56 = vpop.f32.mrb[130].mxu1 }
 0x227   : > { %v1480_v55 = vpop.f32.mrb[2].mxu0  ;;  %v4020_v31 = vadd.f32 %v3897_v22, %v2209_v56  ;;  %v1790_v43 = vpop.f32.mrb[131].mxu1 }
 0x228   : > { %1859 = vst [vmem:[%s3948_s22] sm:$0xff] %v1701_v3  ;;  %v2485_v40 = vadd.f32 %v1480_v55, %v3776_v32  ;;  %v1482_v54 = vpop.f32.mrb[3].mxu0  ;;  %v4025_v1 = vadd.f32 %v3894_v58, %v1790_v43  ;;  %v1928_v10 = vmul.f32 %v1701_v3, %v1701_v3 }
 0x229   : > { %1878 = vst [vmem:[%s3948_s22 + $0x98] sm:$0xff] %v4020_v31 }
 0x22a   : > { %v1706_v13 = vadd.f32 %v2485_v40, %v3915_v12  ;;  %1877 = vst [vmem:[%s3948_s22 + $0x90] sm:$0xff] %v4025_v1  ;;  %v2212_v44 = vpop.f32.mrb[132].mxu1 }
 0x22b   : > { %v1485_v22 = vpop.f32.mrb[4].mxu0  ;;  %v4033_v15 = vadd.f32 %v3907_v24, %v2212_v44  ;;  %v1800_v32 = vpop.f32.mrb[133].mxu1 }
 0x22c   : > { %1860 = vst [vmem:[%s3948_s22 + $0x8] sm:$0xff] %v1706_v13  ;;  %v1891_v33 = vadd.f32 %v1706_v13, %v1701_v3  ;;  %v1929_v26 = vmul.f32 %v1706_v13, %v1706_v13  ;;  %v2486_v58 = vadd.f32 %v1485_v22, %v3779_v23  ;;  %v1487_v42 = vpop.f32.mrb[5].mxu0  ;;  %v4038_v12 = vadd.f32 %v3900_v51, %v1800_v32 }
 0x22d   : > { %1880 = vst [vmem:[%s3948_s22 + $0xa8] sm:$0xff] %v4033_v15 }
 0x22e   : > { %v1960_v62 = vadd.f32 %v1929_v26, %v1928_v10  ;;  %v1711_v41 = vadd.f32 %v2486_v58, %v3926_v8  ;;  %1879 = vst [vmem:[%s3948_s22 + $0xa0] sm:$0xff] %v4038_v12  ;;  %v2215_v24 = vpop.f32.mrb[134].mxu1 }
 0x22f   : > { %v1490_v60 = vpop.f32.mrb[6].mxu0  ;;  %v4046_v21 = vadd.f32 %v3917_v59, %v2215_v24  ;;  %v1810_v23 = vpop.f32.mrb[135].mxu1 }
 0x230   : > { %1861 = vst [vmem:[%s3948_s22 + $0x10] sm:$0xff] %v1711_v41  ;;  %v1892_v11 = vadd.f32 %v1891_v33, %v1711_v41  ;;  %v1930_v6 = vmul.f32 %v1711_v41, %v1711_v41  ;;  %v2487_v51 = vadd.f32 %v1490_v60, %v3782_v57  ;;  %v1492_v37 = vpop.f32.mrb[7].mxu0  ;;  %v4051_v28 = vadd.f32 %v3912_v46, %v1810_v23 }
 0x231   : > { %1882 = vst [vmem:[%s3948_s22 + $0xb8] sm:$0xff] %v4046_v21 }
 0x232   : > { %v1961_v8 = vadd.f32 %v1960_v62, %v1930_v6  ;;  %v1716_v35 = vadd.f32 %v2487_v51, %v3922_v19  ;;  %1881 = vst [vmem:[%s3948_s22 + $0xb0] sm:$0xff] %v4051_v28  ;;  %v2218_v59 = vpop.f32.mrb[136].mxu1 }
 0x233   : > { %v1495_v61 = vpop.f32.mrb[8].mxu0  ;;  %v4059_v49 = vadd.f32 %v3931_v38, %v2218_v59  ;;  %v1820_v57 = vpop.f32.mrb[137].mxu1 }
 0x234   : > { %1862 = vst [vmem:[%s3948_s22 + $0x18] sm:$0xff] %v1716_v35  ;;  %v1893_v3 = vadd.f32 %v1892_v11, %v1716_v35  ;;  %v1931_v56 = vmul.f32 %v1716_v35, %v1716_v35  ;;  %v2488_v46 = vadd.f32 %v1495_v61, %v3785_v29  ;;  %v1497_v55 = vpop.f32.mrb[9].mxu0  ;;  %v4064_v43 = vadd.f32 %v3924_v5, %v1820_v57 }
 0x235   : > { %1884 = vst [vmem:[%s3948_s22 + $0xc8] sm:$0xff] %v4059_v49  ;;  %v1936_v61 = vmul.f32 %v3957_v34, %v3957_v34 }
 0x236   : > { %v1962_v19 = vadd.f32 %v1961_v8, %v1931_v56  ;;  %v1721_v40 = vadd.f32 %v2488_v46, %v3933_v20  ;;  %1883 = vst [vmem:[%s3948_s22 + $0xc0] sm:$0xff] %v4064_v43  ;;  %v2221_v38 = vpop.f32.mrb[138].mxu1 }
 0x237   : > { %v1500_v54 = vpop.f32.mrb[10].mxu0  ;;  %v4072_v13 = vadd.f32 %v3950_v47, %v2221_v38  ;;  %v1830_v29 = vpop.f32.mrb[139].mxu1 }
 0x238   : > { %1863 = vst [vmem:[%s3948_s22 + $0x20] sm:$0xff] %v1721_v40  ;;  %v1894_v44 = vadd.f32 %v1893_v3, %v1721_v40  ;;  %v1932_v10 = vmul.f32 %v1721_v40, %v1721_v40  ;;  %v2489_v5 = vadd.f32 %v1500_v54, %v3788_v39  ;;  %v1502_v22 = vpop.f32.mrb[11].mxu0  ;;  %v4077_v32 = vadd.f32 %v3938_v27, %v1830_v29 }
 0x239   : > { %1886 = vst [vmem:[%s3948_s22 + $0xd8] sm:$0xff] %v4072_v13 }
 0x23a   : > { %v1963_v20 = vadd.f32 %v1962_v19, %v1932_v10  ;;  %v1726_v33 = vadd.f32 %v2489_v5, %v3929_v4  ;;  %1885 = vst [vmem:[%s3948_s22 + $0xd0] sm:$0xff] %v4077_v32  ;;  %v2224_v47 = vpop.f32.mrb[140].mxu1  ;;  %v1939_v19 = vmul.f32 %v3966_v2, %v3966_v2 }
 0x23b   : > { %v1505_v26 = vpop.f32.mrb[12].mxu0  ;;  %v4085_v58 = vadd.f32 %v3977_v48, %v2224_v47  ;;  %v1840_v39 = vpop.f32.mrb[141].mxu1 }
 0x23c   : > { %1864 = vst [vmem:[%s3948_s22 + $0x28] sm:$0xff] %v1726_v33  ;;  %v1895_v42 = vadd.f32 %v1894_v44, %v1726_v33  ;;  %v1933_v62 = vmul.f32 %v1726_v33, %v1726_v33  ;;  %v2490_v27 = vadd.f32 %v1505_v26, %v3791_v45  ;;  %v1507_v41 = vpop.f32.mrb[13].mxu0  ;;  %v4090_v24 = vadd.f32 %v3963_v9, %v1840_v39 }
 0x23d   : > { %1888 = vst [vmem:[%s3948_s22 + $0xe8] sm:$0xff] %v4085_v58 }
 0x23e   : > { %v1964_v4 = vadd.f32 %v1963_v20, %v1933_v62  ;;  %v1731_v60 = vadd.f32 %v2490_v27, %v3940_v52  ;;  %1887 = vst [vmem:[%s3948_s22 + $0xe0] sm:$0xff] %v4090_v24  ;;  %v2227_v48 = vpop.f32.mrb[142].mxu1 }
 0x23f   : > { %v1510_v23 = vpop.f32.mrb[14].mxu0  ;;  %v4098_v11 = vadd.f32 %v4005_v0, %v2227_v48  ;;  %v1850_v45 = vpop.f32.mrb[143].mxu1 }
 0x240   : > { %1865 = vst [vmem:[%s3948_s22 + $0x30] sm:$0xff] %v1731_v60  ;;  %v1896_v6 = vadd.f32 %v1895_v42, %v1731_v60  ;;  %v1934_v51 = vmul.f32 %v1731_v60, %v1731_v60  ;;  %v2491_v9 = vadd.f32 %v1510_v23, %v3794_v7  ;;  %v1512_v37 = vpop.f32.mrb[15].mxu0  ;;  %v4103_v8 = vadd.f32 %v3991_v53, %v1850_v45 }
 0x241   : > { %1890 = vst [vmem:[%s3948_s22 + $0xf8] sm:$0xff] %v4098_v11  ;;  %v1937_v53 = vmul.f32 %v3953_v36, %v3953_v36 }
 0x242   : > { %v1965_v52 = vadd.f32 %v1964_v4, %v1934_v51  ;;  %v1736_v35 = vadd.f32 %v2491_v9, %v3936_v25  ;;  %1889 = vst [vmem:[%s3948_s22 + $0xf0] sm:$0xff] %v4103_v8  ;;  %v1938_v25 = vmul.f32 %v3970_v17, %v3970_v17 }
 0x244   : > { %1866 = vst [vmem:[%s3948_s22 + $0x38] sm:$0xff] %v1736_v35  ;;  %v1897_v0 = vadd.f32 %v1896_v6, %v1736_v35  ;;  %v1935_v59 = vmul.f32 %v1736_v35, %v1736_v35 }
 0x246   : > { %v1898_v57 = vadd.f32 %v1897_v0, %v3957_v34  ;;  %v1966_v7 = vadd.f32 %v1965_v52, %v1935_v59  ;;  %v1940_v34 = vmul.f32 %v3984_v16, %v3984_v16 }
 0x248   : > { %v1899_v3 = vadd.f32 %v1898_v57, %v3953_v36  ;;  %v1967_v56 = vadd.f32 %v1966_v7, %v1936_v61  ;;  %v1941_v36 = vmul.f32 %v3980_v14, %v3980_v14 }
 0x24a   : > { %v1900_v46 = vadd.f32 %v1899_v3, %v3970_v17  ;;  %v1968_v55 = vadd.f32 %v1967_v56, %v1937_v53  ;;  %v1942_v17 = vmul.f32 %v3998_v63, %v3998_v63 }
 0x24c   : > { %v1901_v40 = vadd.f32 %v1900_v46, %v3966_v2  ;;  %v1969_v38 = vadd.f32 %v1968_v55, %v1938_v25  ;;  %v1943_v2 = vmul.f32 %v3994_v18, %v3994_v18  ;;  %v1958_v55 = vmul.f32 %v4103_v8, %v4103_v8 }
 0x24e   : > { %v1902_v54 = vadd.f32 %v1901_v40, %v3984_v16  ;;  %v1970_v29 = vadd.f32 %v1969_v38, %v1939_v19  ;;  %v1944_v16 = vmul.f32 %v4012_v50, %v4012_v50  ;;  %v1959_v19 = vmul.f32 %v4098_v11, %v4098_v11 }
 0x250   : > { %v1903_v44 = vadd.f32 %v1902_v54, %v3980_v14  ;;  %v1971_v10 = vadd.f32 %v1970_v29, %v1940_v34  ;;  %v1945_v14 = vmul.f32 %v4008_v30, %v4008_v30 }
 0x252   : > { %v1904_v5 = vadd.f32 %v1903_v44, %v3998_v63  ;;  %v1972_v22 = vadd.f32 %v1971_v10, %v1941_v36  ;;  %v1946_v63 = vmul.f32 %v4025_v1, %v4025_v1 }
 0x254   : > { %v1905_v20 = vadd.f32 %v1904_v5, %v3994_v18  ;;  %v1973_v33 = vadd.f32 %v1972_v22, %v1942_v17  ;;  %v1947_v18 = vmul.f32 %v4020_v31, %v4020_v31 }
 0x256   : > { %v1906_v47 = vadd.f32 %v1905_v20, %v4012_v50  ;;  %v1974_v26 = vadd.f32 %v1973_v33, %v1943_v2  ;;  %v1948_v50 = vmul.f32 %v4038_v12, %v4038_v12 }
 0x258   : > { %v1907_v39 = vadd.f32 %v1906_v47, %v4008_v30  ;;  %v1975_v42 = vadd.f32 %v1974_v26, %v1944_v16  ;;  %v1949_v30 = vmul.f32 %v4033_v15, %v4033_v15 }
 0x25a   : > { %v1976_v62 = vadd.f32 %v1975_v42, %v1945_v14  ;;  %v1908_v27 = vadd.f32 %v1907_v39, %v4025_v1  ;;  %v1950_v1 = vmul.f32 %v4051_v28, %v4051_v28 }
 0x25c   : > { %v1909_v41 = vadd.f32 %v1908_v27, %v4020_v31  ;;  %v1977_v4 = vadd.f32 %v1976_v62, %v1946_v63  ;;  %v1951_v31 = vmul.f32 %v4046_v21, %v4046_v21 }
 0x25e   : > { %v1910_v60 = vadd.f32 %v1909_v41, %v4038_v12  ;;  %v1978_v48 = vadd.f32 %v1977_v4, %v1947_v18  ;;  %v1952_v12 = vmul.f32 %v4064_v43, %v4064_v43 }
 0x260   : > { %v1911_v23 = vadd.f32 %v1910_v60, %v4033_v15  ;;  %v1979_v45 = vadd.f32 %v1978_v48, %v1948_v50  ;;  %v1953_v15 = vmul.f32 %v4059_v49, %v4059_v49 }
 0x262   : > { %v1912_v6 = vadd.f32 %v1911_v23, %v4051_v28  ;;  %v1980_v51 = vadd.f32 %v1979_v45, %v1949_v30  ;;  %v1954_v28 = vmul.f32 %v4077_v32, %v4077_v32 }
 0x264   : > { %v1913_v9 = vadd.f32 %v1912_v6, %v4046_v21  ;;  %v1981_v37 = vadd.f32 %v1980_v51, %v1950_v1  ;;  %v1955_v21 = vmul.f32 %v4072_v13, %v4072_v13 }
 0x266   : > { %v1914_v52 = vadd.f32 %v1913_v9, %v4064_v43  ;;  %v1982_v35 = vadd.f32 %v1981_v37, %v1951_v31  ;;  %v1956_v43 = vmul.f32 %v4090_v24, %v4090_v24 }
 0x268   : > { %v1915_v0 = vadd.f32 %v1914_v52, %v4059_v49  ;;  %v1983_v59 = vadd.f32 %v1982_v35, %v1952_v12  ;;  %v1957_v49 = vmul.f32 %v4085_v58, %v4085_v58 }
 0x26a   : > { %v1916_v61 = vadd.f32 %v1915_v0, %v4077_v32  ;;  %v1984_v57 = vadd.f32 %v1983_v59, %v1953_v15 }
 0x26c   : > { %v1917_v7 = vadd.f32 %v1916_v61, %v4072_v13  ;;  %v1985_v53 = vadd.f32 %v1984_v57, %v1954_v28 }
 0x26e   : > { %v1918_v3 = vadd.f32 %v1917_v7, %v4090_v24  ;;  %v1986_v56 = vadd.f32 %v1985_v53, %v1955_v21 }
 0x270   : > { %v1919_v25 = vadd.f32 %v1918_v3, %v4085_v58  ;;  %v1987_v46 = vadd.f32 %v1986_v56, %v1956_v43 }
 0x272   : > { %v1920_v32 = vadd.f32 %v1919_v25, %v4103_v8  ;;  %v1988_v13 = vadd.f32 %v1987_v46, %v1957_v49 }
 0x274   : > { %v1921_v40 = vadd.f32 %v1920_v32, %v4098_v11  ;;  %v1989_v24 = vadd.f32 %v1988_v13, %v1958_v55 }
 0x276   : > { %v1922_v38 = vrot.slane %v1921_v40, 4  ;;  %v1990_v34 = vadd.f32 %v1989_v24, %v1959_v19 }
 0x278   : > { %v1923_v54 = vadd.f32 %v1922_v38, %v1921_v40  ;;  %v1991_v29 = vrot.slane %v1990_v34, 4 }
 0x27a   : > { %v1924_v36 = vrot.slane %v1923_v54, 2  ;;  %v1992_v58 = vadd.f32 %v1991_v29, %v1990_v34 }
 0x27c   : > { %v1925_v44 = vadd.f32 %v1924_v36, %v1923_v54  ;;  %v1993_v10 = vrot.slane %v1992_v58, 2 }
 0x27e   : > { %v1926_v17 = vrot.slane %v1925_v44, 1  ;;  %v1994_v5 = vadd.f32 %v1993_v10, %v1992_v58 }
 0x280   : > { %v1995_v22 = vrot.slane %v1994_v5, 1  ;;  %v1927_v8 = vadd.f32 %v1926_v17, %v1925_v44 }
 0x282   : > { %v1996_v11 = vadd.f32 %v1995_v22, %v1994_v5 }
 0x284   : > { %v1998_v2 = vsel %vm1997_vm0, %v1927_v8, %v1996_v11 }
 0x285   : > { %1999 = vst [vmem:[%s181_s25] sm:$0x3] %v1998_v2 }
 0x286 PF: > { %s14_s12 = sadd.s32 1, %s2669_s12  }
 0x287   : > { %p11_p4 = scmp.ge.s32.totalorder %s14_s12, 4  }
 0x289   :  { %13 = sbr.rel (!%p11_p4) target bundleno = 1 (0x1), region = 72 }

// kernel: residual_block.4
= control target key start
LH: loop header
LB: loop body
LE: loop exit
PB: predicated region body
PF: predicated region fallthrough
CT: control target
= control target key end

     0   :  { %s2961_s23 = smov 0   ;;  %s4709_s0 = inlined_call_operand.vmem [shape: f32[2,16,16,128], index: 0, kind: input, shape index: {}]   ;;  %s4710_s1 = inlined_call_operand.vmem [shape: f32[1,128], index: 1, kind: input, shape index: {}]   ;;  %s4711_s2 = inlined_call_operand.vmem [shape: f32[1,128], index: 2, kind: input, shape index: {}]   ;;  %s4712_s3 = inlined_call_operand.<no memory space> [shape: f32[1,1], index: 3, kind: input, shape index: {}]   ;;  %s4713_s4 = inlined_call_operand.vmem [shape: f32[1152,128], index: 4, kind: input, shape index: {}]   ;;  %s4714_s5 = inlined_call_operand.vmem [shape: f32[2,16,16,128], index: 5, kind: output, shape index: {0}]   ;;  %s4715_s6 = inlined_call_operand.vmem [shape: f32[2,2,128], index: 6, kind: output, shape index: {1}]  }
   0x1   :  { %12 = sst [smem:[#allocation3]] %s4712_s3 }
   0x2 LB: > { %s2344_s24 = sadd.s32 4294967295, %s2919_s23   ;;  %p2348_p0 = scmp.ge.s32.totalorder %s2919_s23, 1  ;;  %s2919_s23 = sphi %s2961_s23, %s18_s23  }
   0x3   : > { %p216_p1 = scmp.lt.s32.totalorder %s2919_s23, 3 }
   0x5   : > { %p217_p2 = pnand %p2348_p0, %p216_p1 }
   0x7   : > { %220 = sbr.rel (%p217_p2) target bundleno = 647 (0x287), region = 40 }
   0xe   : > { %v2972_v0 = vld [vmem:[%s4713_s4] sm:$0xff]  ;;  %v2977_v1 = vld [vmem:[%s4713_s4 + $0x8] sm:$0xff]  ;;  %v4716_v3 = vmov 0.0|0.0   ;;  %v2996_v6 = vld [vmem:[%s4713_s4 + $0x10] sm:$0xff]  ;;  %v2922_v8 = vmov 0.0   ;;  %p250_p3 = scmp.lt.s32.totalorder %s2344_s24, 1 }
   0xf   : > { %v2982_v2 = vld [vmem:[%s4713_s4 + $0x100] sm:$0xff]  ;;  %2488 = vmatprep.subr.bf16.mxu1 %v4716_v3  ;;  %2536 = vmatprep.subr.bf16.mxu0 %v4716_v3  ;;  %v2489_v4 = vpack.c.bf16 %v2977_v1, %v2972_v0  ;;  %v2991_v5 = vld [vmem:[%s4713_s4 + $0x108] sm:$0xff]  ;;  %v3001_v7 = vld [vmem:[%s4713_s4 + $0x18] sm:$0xff]  ;;  %472 = vst [vmem:[#allocation2] sm:$0xff] %v2922_v8  ;;  %s3123_s22 = sld [smem:[#allocation3]] }
  0x10   : > { %473 = vst [vmem:[#allocation2 + $0x8] sm:$0xff] %v2922_v8  ;;  %474 = vst [vmem:[#allocation2 + $0x10] sm:$0x3] %v2922_v8  ;;  %v2537_v9 = vpack.c.bf16 %v2991_v5, %v2982_v2  ;;  %v593_v10 = vld [vmem:[%s4713_s4 + $0x110] sm:$0xff]  ;;  %v594_v11 = vld [vmem:[%s4713_s4 + $0x118] sm:$0xff]  ;;  %v2492_v12 = vpack.c.bf16 %v3001_v7, %v2996_v6  ;;  %s4766_s24 = smov (!%p250_p3, %s2344_s24), 1 }
  0x11   : > { %475 = vst [vmem:[#allocation2 + $0x18] sm:$0xff] %v2922_v8  ;;  %476 = vst [vmem:[#allocation2 + $0x20] sm:$0xff] %v2922_v8  ;;  %2490 = vmatpush1.bf16.msra.mxu1 %v2489_v4  ;;  %v2540_v13 = vpack.c.bf16 %v594_v11, %v593_v10  ;;  %v563_v14 = vld [vmem:[%s4713_s4 + $0x20] sm:$0xff]  ;;  %v564_v15 = vld [vmem:[%s4713_s4 + $0x28] sm:$0xff]  ;;  %s2358_s17 = sshll.u32 %s4766_s24, 8 }
  0x12   : > { %477 = vst [vmem:[#allocation2 + $0x28] sm:$0x3] %v2922_v8  ;;  %478 = vst [vmem:[#allocation2 + $0x30] sm:$0xff] %v2922_v8  ;;  %2538 = vmatpush1.bf16.msra.mxu0 %v2537_v9  ;;  %2491 = vmatprep.subr.bf16.mxu1 %v4716_v3  ;;  %v595_v16 = vld [vmem:[%s4713_s4 + $0x120] sm:$0xff]  ;;  %v596_v17 = vld [vmem:[%s4713_s4 + $0x128] sm:$0xff]  ;;  %v2495_v18 = vpack.c.bf16 %v564_v15, %v563_v14  ;;  %s3137_s30 = scalar_lea.vmem %s4709_s0, %s2358_s17  ;;  %s4467_s16 = scalar_lea.vmem %s4714_s5, %s2358_s17 }
  0x13   : > { %479 = vst [vmem:[#allocation2 + $0x38] sm:$0xff] %v2922_v8  ;;  %480 = vst [vmem:[#allocation2 + $0x40] sm:$0x3] %v2922_v8  ;;  %2539 = vmatprep.subr.bf16.mxu0 %v4716_v3  ;;  %v2543_v19 = vpack.c.bf16 %v596_v17, %v595_v16  ;;  %v565_v20 = vld [vmem:[%s4713_s4 + $0x30] sm:$0xff]  ;;  %v566_v21 = vld [vmem:[%s4713_s4 + $0x38] sm:$0xff]  ;;  %s2353_s17 = sshll.u32 %s4766_s24, 1 }
  0x14   : > { %481 = vst [vmem:[#allocation2 + $0x48] sm:$0xff] %v2922_v8  ;;  %482 = vst [vmem:[#allocation2 + $0x50] sm:$0xff] %v2922_v8  ;;  %v597_v22 = vld [vmem:[%s4713_s4 + $0x130] sm:$0xff]  ;;  %v598_v23 = vld [vmem:[%s4713_s4 + $0x138] sm:$0xff]  ;;  %v2498_v24 = vpack.c.bf16 %v566_v21, %v565_v20 }
  0x15   : > { %483 = vst [vmem:[#allocation2 + $0x58] sm:$0x3] %v2922_v8  ;;  %484 = vst [vmem:[#allocation2 + $0x60] sm:$0xff] %v2922_v8  ;;  %2493 = vmatpush1.bf16.msra.mxu1 %v2492_v12  ;;  %v2546_v25 = vpack.c.bf16 %v598_v23, %v597_v22  ;;  %v567_v26 = vld [vmem:[%s4713_s4 + $0x40] sm:$0xff]  ;;  %v568_v27 = vld [vmem:[%s4713_s4 + $0x48] sm:$0xff]  ;;  %v3205_v57 = vstv %s3123_s22  ;;  %s263_s22 = scalar_lea.vmem %s4715_s6, %s2353_s17 }
  0x16   : > { %485 = vst [vmem:[#allocation2 + $0x68] sm:$0xff] %v2922_v8  ;;  %486 = vst [vmem:[#allocation2 + $0x70] sm:$0x3] %v2922_v8  ;;  %2541 = vmatpush1.bf16.msra.mxu0 %v2540_v13  ;;  %2494 = vmatprep.subr.bf16.mxu1 %v4716_v3  ;;  %v599_v28 = vld [vmem:[%s4713_s4 + $0x140] sm:$0xff]  ;;  %v600_v29 = vld [vmem:[%s4713_s4 + $0x148] sm:$0xff]  ;;  %v2501_v30 = vpack.c.bf16 %v568_v27, %v567_v26 }
  0x17   : > { %487 = vst [vmem:[#allocation2 + $0x78] sm:$0xff] %v2922_v8  ;;  %488 = vst [vmem:[#allocation2 + $0x80] sm:$0xff] %v2922_v8  ;;  %2542 = vmatprep.subr.bf16.mxu0 %v4716_v3  ;;  %v2549_v31 = vpack.c.bf16 %v600_v29, %v599_v28  ;;  %v569_v32 = vld [vmem:[%s4713_s4 + $0x50] sm:$0xff]  ;;  %v570_v33 = vld [vmem:[%s4713_s4 + $0x58] sm:$0xff] }
  0x18   : > { %489 = vst [vmem:[#allocation2 + $0x88] sm:$0x3] %v2922_v8  ;;  %490 = vst [vmem:[#allocation2 + $0x90] sm:$0xff] %v2922_v8  ;;  %v601_v34 = vld [vmem:[%s4713_s4 + $0x150] sm:$0xff]  ;;  %v602_v35 = vld [vmem:[%s4713_s4 + $0x158] sm:$0xff]  ;;  %v2504_v36 = vpack.c.bf16 %v570_v33, %v569_v32 }
  0x19   : > { %491 = vst [vmem:[#allocation2 + $0x98] sm:$0xff] %v2922_v8  ;;  %492 = vst [vmem:[#allocation2 + $0xa0] sm:$0x3] %v2922_v8  ;;  %2496 = vmatpush1.bf16.msra.mxu1 %v2495_v18  ;;  %v571_v37 = vld [vmem:[%s4713_s4 + $0x60] sm:$0xff]  ;;  %v572_v38 = vld [vmem:[%s4713_s4 + $0x68] sm:$0xff]  ;;  %v2552_v40 = vpack.c.bf16 %v602_v35, %v601_v34 }
  0x1a   : > { %493 = vst [vmem:[#allocation2 + $0xa8] sm:$0xff] %v2922_v8  ;;  %494 = vst [vmem:[#allocation2 + $0xb0] sm:$0xff] %v2922_v8  ;;  %2544 = vmatpush1.bf16.msra.mxu0 %v2543_v19  ;;  %2497 = vmatprep.subr.bf16.mxu1 %v4716_v3  ;;  %v603_v39 = vld [vmem:[%s4713_s4 + $0x160] sm:$0xff]  ;;  %v604_v41 = vld [vmem:[%s4713_s4 + $0x168] sm:$0xff]  ;;  %v2507_v51 = vpack.c.bf16 %v572_v38, %v571_v37 }
  0x1b   : > { %495 = vst [vmem:[#allocation2 + $0xb8] sm:$0x3] %v2922_v8  ;;  %496 = vst [vmem:[#allocation2 + $0xc0] sm:$0xff] %v2922_v8  ;;  %2545 = vmatprep.subr.bf16.mxu0 %v4716_v3  ;;  %v3155_v42 = vld [vmem:[%s4713_s4 + $0x70] sm:$0xff]  ;;  %v574_v43 = vld [vmem:[%s4713_s4 + $0x78] sm:$0xff]  ;;  %v2555_v56 = vpack.c.bf16 %v604_v41, %v603_v39 }
  0x1c   : > { %497 = vst [vmem:[#allocation2 + $0xc8] sm:$0xff] %v2922_v8  ;;  %498 = vst [vmem:[#allocation2 + $0xd0] sm:$0x3] %v2922_v8  ;;  %v3164_v44 = vld [vmem:[%s4713_s4 + $0x170] sm:$0xff]  ;;  %v3169_v45 = vld [vmem:[%s4713_s4 + $0x178] sm:$0xff]  ;;  %v2510_v60 = vpack.c.bf16 %v574_v43, %v3155_v42 }
  0x1d   : > { %499 = vst [vmem:[#allocation2 + $0xd8] sm:$0xff] %v2922_v8  ;;  %500 = vst [vmem:[#allocation2 + $0xe0] sm:$0xff] %v2922_v8  ;;  %2499 = vmatpush1.bf16.msra.mxu1 %v2498_v24  ;;  %v735_v46 = vld [vmem:[#allocation2 + $0x1] sm:$0xff]  ;;  %v3180_v49 = vld [vmem:[%s4710_s1] ss:$0 sm:$0xff]  ;;  %v2558_v4 = vpack.c.bf16 %v3169_v45, %v3164_v44 }
  0x1e   : > { %501 = vst [vmem:[#allocation2 + $0xe8] sm:$0x3] %v2922_v8  ;;  %502 = vst [vmem:[#allocation2 + $0xf0] sm:$0xff] %v2922_v8  ;;  %2547 = vmatpush1.bf16.msra.mxu0 %v2546_v25  ;;  %2500 = vmatprep.subr.bf16.mxu1 %v4716_v3  ;;  %v264_v47 = vld [vmem:[%s3137_s30] sm:$0xff]  ;;  %v3190_v52 = vld [vmem:[%s4713_s4 + $0x88] sm:$0xff] }
  0x1f   : > { %503 = vst [vmem:[#allocation2 + $0xf8] sm:$0xff] %v2922_v8  ;;  %504 = vst [vmem:[#allocation2 + $0x100] sm:$0x3] %v2922_v8  ;;  %2548 = vmatprep.subr.bf16.mxu0 %v4716_v3  ;;  %v3175_v48 = vld [vmem:[%s4713_s4 + $0x80] sm:$0xff]  ;;  %1056 = vmatprep.mubr.f32.mxu1 %v735_v46  ;;  %v3200_v54 = vld [vmem:[%s4713_s4 + $0x188] sm:$0xff]  ;;  %v303_v55 = vmul.f32 %v3180_v49, %v264_v47 }
  0x20   : > { %505 = vst [vmem:[#allocation2 + $0x108] sm:$0xff] %v2922_v8  ;;  %506 = vst [vmem:[#allocation2 + $0x110] sm:$0xff] %v2922_v8  ;;  %v3185_v50 = vld [vmem:[%s4711_s2] ss:$0 sm:$0xff]  ;;  %v265_v58 = vld [vmem:[%s3137_s30 + $0x8] sm:$0xff]  ;;  %v2513_v5 = vpack.c.bf16 %v3190_v52, %v3175_v48 }
  0x21   : > { %507 = vst [vmem:[#allocation2 + $0x118] sm:$0x3] %v2922_v8  ;;  %508 = vst [vmem:[#allocation2 + $0x120] sm:$0xff] %v2922_v8  ;;  %2502 = vmatpush1.bf16.msra.mxu1 %v2501_v30  ;;  %v3195_v53 = vld [vmem:[%s4713_s4 + $0x180] sm:$0xff]  ;;  %v266_v59 = vld [vmem:[%s3137_s30 + $0x10] sm:$0xff]  ;;  %v342_v63 = vadd.f32 %v3185_v50, %v303_v55  ;;  %v304_v0 = vmul.f32 %v3180_v49, %v265_v58 }
  0x22   : > { %509 = vst [vmem:[#allocation2 + $0x128] sm:$0xff] %v2922_v8  ;;  %510 = vst [vmem:[#allocation2 + $0x130] sm:$0x3] %v2922_v8  ;;  %2550 = vmatpush1.bf16.msra.mxu0 %v2549_v31  ;;  %2503 = vmatprep.subr.bf16.mxu1 %v4716_v3  ;;  %v3214_v61 = vld [vmem:[%s4713_s4 + $0x90] sm:$0xff]  ;;  %v3219_v62 = vld [vmem:[%s4713_s4 + $0x98] sm:$0xff]  ;;  %v305_v1 = vmul.f32 %v3180_v49, %v266_v59  ;;  %v2561_v6 = vpack.c.bf16 %v3200_v54, %v3195_v53 }
  0x23   : > { %511 = vst [vmem:[#allocation2 + $0x138] sm:$0xff] %v2922_v8  ;;  %512 = vst [vmem:[#allocation2 + $0x140] sm:$0xff] %v2922_v8  ;;  %2551 = vmatprep.subr.bf16.mxu0 %v4716_v3  ;;  %v267_v2 = vld [vmem:[%s3137_s30 + $0x18] sm:$0xff]  ;;  %v268_v9 = vld [vmem:[%s3137_s30 + $0x20] sm:$0xff]  ;;  %vm375_vm0 = vcmp.ge.f32.partialorder %v342_v63, 0.0  ;;  %v408_v11 = vmul.f32 %v3205_v57, %v342_v63  ;;  %v343_v12 = vadd.f32 %v3185_v50, %v304_v0 }
  0x24   : > { %513 = vst [vmem:[#allocation2 + $0x148] sm:$0x3] %v2922_v8  ;;  %514 = vst [vmem:[#allocation2 + $0x150] sm:$0xff] %v2922_v8  ;;  %v306_v7 = vmul.f32 %v3180_v49, %v267_v2  ;;  %v3236_v10 = vld [vmem:[%s4713_s4 + $0x190] sm:$0xff]  ;;  %v344_v13 = vadd.f32 %v3185_v50, %v305_v1  ;;  %v2516_v14 = vpack.c.bf16 %v3219_v62, %v3214_v61  ;;  %v3247_v15 = vld [vmem:[%s4713_s4 + $0x198] sm:$0xff] }
  0x25   : > { %515 = vst [vmem:[#allocation2 + $0x158] sm:$0xff] %v2922_v8  ;;  %516 = vst [vmem:[#allocation2 + $0x160] sm:$0x3] %v2922_v8  ;;  %2505 = vmatpush1.bf16.msra.mxu1 %v2504_v36  ;;  %v307_v17 = vmul.f32 %v3180_v49, %v268_v9  ;;  %v269_v18 = vld [vmem:[%s3137_s30 + $0x28] sm:$0xff]  ;;  %v270_v19 = vld [vmem:[%s3137_s30 + $0x30] sm:$0xff]  ;;  %v3254_v20 = vsel %vm375_vm0, %v342_v63, %v408_v11  ;;  %vm376_vm1 = vcmp.ge.f32.partialorder %v343_v12, 0.0 }
  0x26   : > { %517 = vst [vmem:[#allocation2 + $0x168] sm:$0xff] %v2922_v8  ;;  %518 = vst [vmem:[#allocation2 + $0x170] sm:$0xff] %v2922_v8  ;;  %2553 = vmatpush1.bf16.msra.mxu0 %v2552_v40  ;;  %2506 = vmatprep.subr.bf16.mxu1 %v4716_v3  ;;  %v345_v16 = vadd.f32 %v3185_v50, %v306_v7  ;;  %v409_v21 = vmul.f32 %v3205_v57, %v343_v12  ;;  %vm377_vm2 = vcmp.ge.f32.partialorder %v344_v13, 0.0  ;;  %v3260_v22 = vld [vmem:[%s4713_s4 + $0xa0] sm:$0xff]  ;;  %v271_v26 = vld [vmem:[%s3137_s30 + $0x38] sm:$0xff] }
  0x27   : > { %519 = vst [vmem:[#allocation2 + $0x178] sm:$0x3] %v2922_v8  ;;  %520 = vst [vmem:[#allocation2 + $0x180] sm:$0xff] %v2922_v8  ;;  %2554 = vmatprep.subr.bf16.mxu0 %v4716_v3  ;;  %v410_v23 = vmul.f32 %v3205_v57, %v344_v13  ;;  %v346_v25 = vadd.f32 %v3185_v50, %v307_v17  ;;  %v272_v27 = vld [vmem:[%s3137_s30 + $0x40] sm:$0xff]  ;;  %v2564_v28 = vpack.c.bf16 %v3247_v15, %v3236_v10  ;;  %v3273_v29 = vld [vmem:[%s4713_s4 + $0xa8] sm:$0xff] }
  0x28   : > { %521 = vst [vmem:[#allocation2 + $0x188] sm:$0xff] %v2922_v8  ;;  %522 = vst [vmem:[#allocation2 + $0x190] sm:$0x3] %v2922_v8  ;;  %vm378_vm3 = vcmp.ge.f32.partialorder %v345_v16, 0.0  ;;  %v411_v24 = vmul.f32 %v3205_v57, %v345_v16  ;;  %v3275_v30 = vsel %vm376_vm1, %v343_v12, %v409_v21  ;;  %v308_v31 = vmul.f32 %v3180_v49, %v269_v18  ;;  %v273_v33 = vld [vmem:[%s3137_s30 + $0x48] sm:$0xff]  ;;  %v274_v34 = vld [vmem:[%s3137_s30 + $0x50] sm:$0xff] }
  0x29   : > { %523 = vst [vmem:[#allocation2 + $0x198] sm:$0xff] %v2922_v8  ;;  %524 = vst [vmem:[#allocation2 + $0x1a0] sm:$0xff] %v2922_v8  ;;  %2508 = vmatpush1.bf16.msra.mxu1 %v2507_v51  ;;  %v309_v32 = vmul.f32 %v3180_v49, %v270_v19  ;;  %v3284_v35 = vsel %vm377_vm2, %v344_v13, %v410_v23  ;;  %vm379_vm4 = vcmp.ge.f32.partialorder %v346_v25, 0.0  ;;  %v3302_v43 = vld [vmem:[%s4713_s4 + $0x1a0] sm:$0xff]  ;;  %v3307_v44 = vld [vmem:[%s4713_s4 + $0x1a8] sm:$0xff] }
  0x2a   : > { %525 = vst [vmem:[#allocation2 + $0x1a8] sm:$0x3] %v2922_v8  ;;  %2556 = vmatpush1.bf16.msra.mxu0 %v2555_v56  ;;  %2509 = vmatprep.subr.bf16.mxu1 %v4716_v3  ;;  %527 = vst [vmem:[#allocation2 + $0x19] sm:$0xff] %v3254_v20  ;;  %v3287_v36 = vsel %vm378_vm3, %v345_v16, %v411_v24  ;;  %v412_v37 = vmul.f32 %v3205_v57, %v346_v25  ;;  %v3329_v59 = vld [vmem:[%s4713_s4 + $0xb0] sm:$0xff]  ;;  %v275_v0 = vld [vmem:[%s3137_s30 + $0x58] sm:$0xff] }
  0x2b   : > { %2557 = vmatprep.subr.bf16.mxu0 %v4716_v3  ;;  %528 = vst [vmem:[#allocation2 + $0x21] sm:$0xff] %v3275_v30  ;;  %529 = vst [vmem:[#allocation2 + $0x31] sm:$0xff] %v3284_v35  ;;  %v347_v38 = vadd.f32 %v3185_v50, %v308_v31  ;;  %v348_v39 = vadd.f32 %v3185_v50, %v309_v32  ;;  %v310_v40 = vmul.f32 %v3180_v49, %v271_v26  ;;  %v3342_v1 = vld [vmem:[%s4713_s4 + $0xb8] sm:$0xff]  ;;  %v3347_v2 = vld [vmem:[%s4713_s4 + $0x1b0] sm:$0xff] }
  0x2c   : > { %530 = vst [vmem:[#allocation2 + $0x39] sm:$0xff] %v3287_v36  ;;  %v311_v41 = vmul.f32 %v3180_v49, %v272_v27  ;;  %v2519_v42 = vpack.c.bf16 %v3273_v29, %v3260_v22  ;;  %v3309_v45 = vsel %vm379_vm4, %v346_v25, %v412_v37  ;;  %v312_v46 = vmul.f32 %v3180_v49, %v273_v33  ;;  %v614_v7 = vld [vmem:[%s4713_s4 + $0x1b8] sm:$0xff]  ;;  %v277_v12 = vld [vmem:[%s3137_s30 + $0x68] sm:$0xff]  ;;  %v278_v13 = vld [vmem:[%s3137_s30 + $0x70] sm:$0xff] }
  0x2d   : > { %2511 = vmatpush1.bf16.msra.mxu1 %v2510_v60  ;;  %v313_v47 = vmul.f32 %v3180_v49, %v274_v34  ;;  %531 = vst [vmem:[#allocation2 + $0x49] sm:$0xff] %v3309_v45  ;;  %vm380_vm5 = vcmp.ge.f32.partialorder %v347_v38, 0.0  ;;  %v413_v48 = vmul.f32 %v3205_v57, %v347_v38  ;;  %vm381_vm6 = vcmp.ge.f32.partialorder %v348_v39, 0.0  ;;  %v3372_v61 = vld [vmem:[%s4713_s4 + $0xc0] sm:$0xff]  ;;  %v3377_v62 = vld [vmem:[%s4713_s4 + $0xc8] sm:$0xff]  ;;  %v279_v15 = vld [vmem:[%s3137_s30 + $0x78] sm:$0xff] }
  0x2e   : > { %2559 = vmatpush1.bf16.msra.mxu0 %v2558_v4  ;;  %2512 = vmatprep.subr.bf16.mxu1 %v4716_v3  ;;  %v414_v51 = vmul.f32 %v3205_v57, %v348_v39  ;;  %v349_v52 = vadd.f32 %v3185_v50, %v310_v40  ;;  %v350_v55 = vadd.f32 %v3185_v50, %v311_v41  ;;  %v280_v26 = vld [vmem:[%s3137_s30 + $0x80] sm:$0xff]  ;;  %v616_v37 = vld [vmem:[%s4713_s4 + $0x1c8] sm:$0xff]  ;;  %v585_v41 = vld [vmem:[%s4713_s4 + $0xd0] sm:$0xff] }
  0x2f   : > { %2560 = vmatprep.subr.bf16.mxu0 %v4716_v3  ;;  %v351_v56 = vadd.f32 %v3185_v50, %v312_v46  ;;  %v2567_v58 = vpack.c.bf16 %v3307_v44, %v3302_v43  ;;  %v3333_v54 = vsel %vm380_vm5, %v347_v38, %v413_v48  ;;  %v352_v63 = vadd.f32 %v3185_v50, %v313_v47  ;;  %v615_v29 = vld [vmem:[%s4713_s4 + $0x1c0] sm:$0xff]  ;;  %v281_v44 = vld [vmem:[%s3137_s30 + $0x88] sm:$0xff]  ;;  %v586_v46 = vld [vmem:[%s4713_s4 + $0xd8] sm:$0xff] }
  0x30   : > { %v3335_v60 = vsel %vm381_vm6, %v348_v39, %v414_v51  ;;  %532 = vst [vmem:[#allocation2 + $0x51] sm:$0xff] %v3333_v54  ;;  %vm382_vm7 = vcmp.ge.f32.partialorder %v349_v52, 0.0  ;;  %v415_v4 = vmul.f32 %v3205_v57, %v349_v52  ;;  %vm383_vm8 = vcmp.ge.f32.partialorder %v350_v55, 0.0  ;;  %v617_v47 = vld [vmem:[%s4713_s4 + $0x1d0] sm:$0xff] }
  0x31   : > { %2514 = vmatpush1.bf16.msra.mxu1 %v2513_v5  ;;  %v3331_v53 = vld [vmem:[#allocation2 + $0x18] sm:$0xff]  ;;  %533 = vst [vmem:[#allocation2 + $0x61] sm:$0xff] %v3335_v60  ;;  %v416_v5 = vmul.f32 %v3205_v57, %v350_v55  ;;  %vm384_vm9 = vcmp.ge.f32.partialorder %v351_v56, 0.0  ;;  %v417_v9 = vmul.f32 %v3205_v57, %v351_v56  ;;  %vm385_vm10 = vcmp.ge.f32.partialorder %v352_v63, 0.0 }
  0x32   : > { %2562 = vmatpush1.bf16.msra.mxu0 %v2561_v6  ;;  %2515 = vmatprep.subr.bf16.mxu1 %v4716_v3  ;;  %v276_v6 = vld [vmem:[%s3137_s30 + $0x60] sm:$0xff]  ;;  %v418_v11 = vmul.f32 %v3205_v57, %v352_v63  ;;  %v314_v10 = vmul.f32 %v3180_v49, %v275_v0  ;;  %v2522_v21 = vpack.c.bf16 %v3342_v1, %v3329_v59  ;;  %v283_v0 = vld [vmem:[%s3137_s30 + $0x98] sm:$0xff] }
  0x33   : > { %2563 = vmatprep.subr.bf16.mxu0 %v4716_v3  ;;  %1281 = vmatprep.mubr.f32.mxu0 %v3331_v53  ;;  %v3383_v16 = vsel %vm383_vm8, %v350_v55, %v416_v5  ;;  %v3391_v17 = vsel %vm384_vm9, %v351_v56, %v417_v9  ;;  %v315_v19 = vmul.f32 %v3180_v49, %v276_v6  ;;  %v282_v55 = vld [vmem:[%s3137_s30 + $0x90] sm:$0xff]  ;;  %v284_v1 = vld [vmem:[%s3137_s30 + $0xa0] sm:$0xff] }
  0x34   : > { %535 = vst [vmem:[#allocation2 + $0x79] sm:$0xff] %v3383_v16  ;;  %v3394_v18 = vsel %vm385_vm10, %v352_v63, %v418_v11  ;;  %536 = vst [vmem:[#allocation2 + $0x81] sm:$0xff] %v3391_v17  ;;  %v353_v23 = vadd.f32 %v3185_v50, %v314_v10  ;;  %v316_v24 = vmul.f32 %v3180_v49, %v277_v12 }
  0x35   : > { %2517 = vmatpush1.bf16.msra.mxu1 %v2516_v14  ;;  %v3380_v14 = vsel %vm382_vm7, %v349_v52, %v415_v4  ;;  %537 = vst [vmem:[#allocation2 + $0x91] sm:$0xff] %v3394_v18  ;;  %v317_v25 = vmul.f32 %v3180_v49, %v278_v13  ;;  %v2570_v27 = vpack.c.bf16 %v614_v7, %v3347_v2  ;;  %v587_v2 = vld [vmem:[%s4713_s4 + $0xe0] sm:$0xff]  ;;  %v588_v4 = vld [vmem:[%s4713_s4 + $0xe8] sm:$0xff] }
  0x36   : > { %2565 = vmatpush1.bf16.msra.mxu0 %v2564_v28  ;;  %2518 = vmatprep.subr.bf16.mxu1 %v4716_v3  ;;  %534 = vst [vmem:[#allocation2 + $0x69] sm:$0xff] %v3380_v14  ;;  %v2525_v28 = vpack.c.bf16 %v3377_v62, %v3372_v61  ;;  %v354_v31 = vadd.f32 %v3185_v50, %v315_v19  ;;  %vm386_vm11 = vcmp.ge.f32.partialorder %v353_v23, 0.0  ;;  %v619_v61 = vld [vmem:[%s4713_s4 + $0x1e0] sm:$0xff]  ;;  %v620_v62 = vld [vmem:[%s4713_s4 + $0x1e8] sm:$0xff] }
  0x37   : > { %2566 = vmatprep.subr.bf16.mxu0 %v4716_v3  ;;  %v318_v32 = vmul.f32 %v3180_v49, %v279_v15  ;;  %v419_v33 = vmul.f32 %v3205_v57, %v353_v23  ;;  %v355_v34 = vadd.f32 %v3185_v50, %v316_v24  ;;  %v356_v22 = vadd.f32 %v3185_v50, %v317_v25 }
  0x38   : > { %vm387_vm12 = vcmp.ge.f32.partialorder %v354_v31, 0.0  ;;  %v420_v38 = vmul.f32 %v3205_v57, %v354_v31  ;;  %v319_v40 = vmul.f32 %v3180_v49, %v280_v26  ;;  %v2573_v56 = vpack.c.bf16 %v616_v37, %v615_v29 }
  0x39   : > { %2520 = vmatpush1.bf16.msra.mxu1 %v2519_v42  ;;  %v357_v39 = vadd.f32 %v3185_v50, %v318_v32  ;;  %v3430_v42 = vsel %vm386_vm11, %v353_v23, %v419_v33  ;;  %vm388_vm13 = vcmp.ge.f32.partialorder %v355_v34, 0.0  ;;  %v421_v43 = vmul.f32 %v3205_v57, %v355_v34 }
  0x3a   : > { %2568 = vmatpush1.bf16.msra.mxu0 %v2567_v58  ;;  %2521 = vmatprep.subr.bf16.mxu1 %v4716_v3  ;;  %vm389_vm14 = vcmp.ge.f32.partialorder %v356_v22, 0.0  ;;  %538 = vst [vmem:[#allocation2 + $0x99] sm:$0xff] %v3430_v42  ;;  %v3441_v48 = vsel %vm387_vm12, %v354_v31, %v420_v38  ;;  %v422_v51 = vmul.f32 %v3205_v57, %v356_v22  ;;  %v618_v58 = vld [vmem:[%s4713_s4 + $0x1d8] sm:$0xff] }
  0x3b   : > { %2569 = vmatprep.subr.bf16.mxu0 %v4716_v3  ;;  %vm390_vm15 = vcmp.ge.f32.partialorder %v357_v39, 0.0  ;;  %v423_v52 = vmul.f32 %v3205_v57, %v357_v39  ;;  %539 = vst [vmem:[#allocation2 + $0xa9] sm:$0xff] %v3441_v48  ;;  %v3452_v59 = vsel %vm388_vm13, %v355_v34, %v421_v43  ;;  %v358_v63 = vadd.f32 %v3185_v50, %v319_v40  ;;  %v286_v34 = vld [vmem:[%s3137_s30 + $0xb0] sm:$0xff]  ;;  %v590_v38 = vld [vmem:[%s4713_s4 + $0xf8] sm:$0xff] }
  0x3c   : > { %540 = vst [vmem:[#allocation2 + $0xb1] sm:$0xff] %v3452_v59  ;;  %v3466_v5 = vsel %vm389_vm14, %v356_v22, %v422_v51  ;;  %v320_v7 = vmul.f32 %v3180_v49, %v281_v44  ;;  %v2528_v9 = vpack.c.bf16 %v586_v46, %v585_v41  ;;  %v321_v12 = vmul.f32 %v3180_v49, %v282_v55  ;;  %v589_v22 = vld [vmem:[%s4713_s4 + $0xf0] sm:$0xff]  ;;  %v287_v43 = vld [vmem:[%s3137_s30 + $0xb8] sm:$0xff]  ;;  %v288_v44 = vld [vmem:[%s3137_s30 + $0xc0] sm:$0xff] }
  0x3d   : > { %2523 = vmatpush1.bf16.msra.mxu1 %v2522_v21  ;;  %v3469_v6 = vsel %vm390_vm15, %v357_v39, %v423_v52  ;;  %541 = vst [vmem:[#allocation2 + $0xc1] sm:$0xff] %v3466_v5  ;;  %vm391_vm0 = vcmp.ge.f32.partialorder %v358_v63, 0.0  ;;  %v424_v11 = vmul.f32 %v3205_v57, %v358_v63  ;;  %v2576_v13 = vpack.c.bf16 %v618_v58, %v617_v47  ;;  %v285_v21 = vld [vmem:[%s3137_s30 + $0xa8] sm:$0xff]  ;;  %v621_v46 = vld [vmem:[%s4713_s4 + $0x1f0] sm:$0xff]  ;;  %v622_v47 = vld [vmem:[%s4713_s4 + $0x1f8] sm:$0xff] }
  0x3e   : > { %2571 = vmatpush1.bf16.msra.mxu0 %v2570_v27  ;;  %2524 = vmatprep.subr.bf16.mxu1 %v4716_v3  ;;  %542 = vst [vmem:[#allocation2 + $0xc9] sm:$0xff] %v3469_v6  ;;  %v359_v10 = vadd.f32 %v3185_v50, %v320_v7  ;;  %v322_v15 = vmul.f32 %v3180_v49, %v283_v0  ;;  %v3530_v55 = vld [vmem:[%s4713_s4 + $0x200] sm:$0xff]  ;;  %v624_v0 = vld [vmem:[%s4713_s4 + $0x208] sm:$0xff] }
  0x3f   : > { %2572 = vmatprep.subr.bf16.mxu0 %v4716_v3  ;;  %v323_v19 = vmul.f32 %v3180_v49, %v284_v1  ;;  %v2531_v23 = vpack.c.bf16 %v588_v4, %v587_v2  ;;  %v3487_v24 = vsel %vm391_vm0, %v358_v63, %v424_v11  ;;  %v360_v25 = vadd.f32 %v3185_v50, %v321_v12  ;;  %v289_v7 = vld [vmem:[%s3137_s30 + $0xc8] sm:$0xff] }
  0x40   : > { %543 = vst [vmem:[#allocation2 + $0xd9] sm:$0xff] %v3487_v24  ;;  %vm392_vm1 = vcmp.ge.f32.partialorder %v359_v10, 0.0  ;;  %v425_v26 = vmul.f32 %v3205_v57, %v359_v10  ;;  %v361_v27 = vadd.f32 %v3185_v50, %v322_v15  ;;  %v2579_v31 = vpack.c.bf16 %v620_v62, %v619_v61  ;;  %v655_v15 = vld [vmem:[%s4713_s4 + $0x300] sm:$0xff] }
  0x41   : > { %2526 = vmatpush1.bf16.msra.mxu1 %v2525_v28  ;;  %v362_v28 = vadd.f32 %v3185_v50, %v323_v19  ;;  %vm393_vm2 = vcmp.ge.f32.partialorder %v360_v25, 0.0  ;;  %v426_v32 = vmul.f32 %v3205_v57, %v360_v25  ;;  %v324_v33 = vmul.f32 %v3180_v49, %v285_v21  ;;  %v656_v19 = vld [vmem:[%s4713_s4 + $0x308] sm:$0xff] }
  0x42   : > { %2574 = vmatpush1.bf16.msra.mxu0 %v2573_v56  ;;  %2527 = vmatprep.subr.bf16.mxu1 %v4716_v3  ;;  %v3501_v29 = vsel %vm392_vm1, %v359_v10, %v425_v26  ;;  %vm394_vm3 = vcmp.ge.f32.partialorder %v361_v27, 0.0  ;;  %v427_v37 = vmul.f32 %v3205_v57, %v361_v27  ;;  %v325_v52 = vmul.f32 %v3180_v49, %v286_v34  ;;  %v767_v26 = vld [vmem:[#allocation2 + $0x2] sm:$0xff] }
  0x43   : > { %2575 = vmatprep.subr.bf16.mxu0 %v4716_v3  ;;  %vm395_vm4 = vcmp.ge.f32.partialorder %v362_v28, 0.0  ;;  %544 = vst [vmem:[#allocation2 + $0xe1] sm:$0xff] %v3501_v29  ;;  %v3509_v39 = vsel %vm393_vm2, %v360_v25, %v426_v32  ;;  %v428_v40 = vmul.f32 %v3205_v57, %v362_v28  ;;  %v363_v41 = vadd.f32 %v3185_v50, %v324_v33  ;;  %v291_v25 = vld [vmem:[%s3137_s30 + $0xd8] sm:$0xff]  ;;  %v625_v32 = vld [vmem:[%s4713_s4 + $0x210] sm:$0xff] }
  0x44   : > { %545 = vst [vmem:[#allocation2 + $0xf1] sm:$0xff] %v3509_v39  ;;  %v3524_v51 = vsel %vm394_vm3, %v361_v27, %v427_v37  ;;  %v2534_v63 = vpack.c.bf16 %v590_v38, %v589_v22  ;;  %v364_v1 = vadd.f32 %v3185_v50, %v325_v52  ;;  %v326_v2 = vmul.f32 %v3180_v49, %v287_v43  ;;  %v736_v27 = vld [vmem:[#allocation2 + $0x9] sm:$0xff]  ;;  %v626_v33 = vld [vmem:[%s4713_s4 + $0x218] sm:$0xff]  ;;  %v292_v38 = vld [vmem:[%s3137_s30 + $0xe0] sm:$0xff] }
  0x45   : > { %2529 = vmatpush1.bf16.msra.mxu1 %v2528_v9  ;;  %546 = vst [vmem:[#allocation2 + $0xf9] sm:$0xff] %v3524_v51  ;;  %v3534_v56 = vsel %vm395_vm4, %v362_v28, %v428_v40  ;;  %vm396_vm5 = vcmp.ge.f32.partialorder %v363_v41, 0.0  ;;  %v429_v58 = vmul.f32 %v3205_v57, %v363_v41  ;;  %v327_v4 = vmul.f32 %v3180_v49, %v288_v44  ;;  %v290_v9 = vld [vmem:[%s3137_s30 + $0xd0] sm:$0xff]  ;;  %v3580_v40 = vld [vmem:[#allocation2 + $0x20] sm:$0xff]  ;;  %v658_v44 = vld [vmem:[%s4713_s4 + $0x318] sm:$0xff] }
  0x46   : > { %2577 = vmatpush1.bf16.msra.mxu0 %v2576_v13  ;;  %2530 = vmatprep.subr.bf16.mxu1 %v4716_v3  ;;  %547 = vst [vmem:[#allocation2 + $0x109] sm:$0xff] %v3534_v56  ;;  %v2582_v11 = vpack.c.bf16 %v622_v47, %v621_v46  ;;  %vm397_vm6 = vcmp.ge.f32.partialorder %v364_v1, 0.0  ;;  %v430_v13 = vmul.f32 %v3205_v57, %v364_v1  ;;  %v657_v43 = vld [vmem:[%s4713_s4 + $0x310] sm:$0xff]  ;;  %vm2255_vm0 = vcmask 1040384  }
  0x47   : > { %2578 = vmatprep.subr.bf16.mxu0 %v4716_v3  ;;  %v3547_v12 = vsel %vm396_vm5, %v363_v41, %v429_v58  ;;  %v365_v61 = vadd.f32 %v3185_v50, %v326_v2  ;;  %v366_v62 = vadd.f32 %v3185_v50, %v327_v4  ;;  %v2585_v10 = vpack.c.bf16 %v624_v0, %v3530_v55  ;;  %v294_v2 = vld [vmem:[%s3137_s30 + $0xf0] sm:$0xff] }
  0x48   : > { %548 = vst [vmem:[#allocation2 + $0x111] sm:$0xff] %v3547_v12  ;;  %v328_v21 = vmul.f32 %v3180_v49, %v289_v7  ;;  %v3564_v28 = vsel %vm397_vm6, %v364_v1, %v430_v13  ;;  %v3582_v41 = vpack.c.bf16 %v656_v19, %v655_v15  ;;  %v330_v47 = vmul.f32 %v3180_v49, %v291_v25  ;;  %v293_v1 = vld [vmem:[%s3137_s30 + $0xe8] sm:$0xff]  ;;  %v3612_v13 = vld [vmem:[#allocation2 + $0x30] sm:$0xff] }
  0x49   : > { %2532 = vmatpush1.bf16.msra.mxu1 %v2531_v23  ;;  %v329_v23 = vmul.f32 %v3180_v49, %v290_v9  ;;  %vm398_vm7 = vcmp.ge.f32.partialorder %v365_v61, 0.0  ;;  %vm399_vm8 = vcmp.ge.f32.partialorder %v366_v62, 0.0  ;;  %549 = vst [vmem:[#allocation2 + $0x121] sm:$0xff] %v3564_v28  ;;  %v432_v34 = vmul.f32 %v3205_v57, %v366_v62  ;;  %v768_v4 = vld [vmem:[#allocation2 + $0xa] sm:$0xff] }
  0x4a   : > { %2580 = vmatpush1.bf16.msra.mxu0 %v2579_v31  ;;  %2533 = vmatprep.subr.bf16.mxu1 %v4716_v3  ;;  %v431_v31 = vmul.f32 %v3205_v57, %v365_v61  ;;  %v367_v22 = vadd.f32 %v3185_v50, %v328_v21  ;;  %v331_v0 = vmul.f32 %v3180_v49, %v292_v38  ;;  %v659_v21 = vld [vmem:[%s4713_s4 + $0x320] sm:$0xff]  ;;  %v630_v38 = vld [vmem:[%s4713_s4 + $0x238] sm:$0xff] }
  0x4b   : > { %2581 = vmatprep.subr.bf16.mxu0 %v4716_v3  ;;  %v368_v37 = vadd.f32 %v3185_v50, %v329_v23  ;;  %v3597_v52 = vsel %vm399_vm8, %v366_v62, %v432_v34  ;;  %v2588_v7 = vpack.c.bf16 %v626_v33, %v625_v32  ;;  %v3607_v9 = vpack.c.bf16 %v658_v44, %v657_v43  ;;  %v628_v62 = vld [vmem:[%s4713_s4 + $0x228] sm:$0xff]  ;;  %v769_v32 = vld [vmem:[#allocation2 + $0x1a] sm:$0xff] }
  0x4c   : > { %v3591_v46 = vsel %vm398_vm7, %v365_v61, %v431_v31  ;;  %vm400_vm9 = vcmp.ge.f32.partialorder %v367_v22, 0.0  ;;  %v433_v55 = vmul.f32 %v3205_v57, %v367_v22  ;;  %551 = vst [vmem:[#allocation2 + $0x139] sm:$0xff] %v3597_v52  ;;  %v627_v61 = vld [vmem:[%s4713_s4 + $0x220] sm:$0xff]  ;;  %v370_v19 = vadd.f32 %v3185_v50, %v331_v0  ;;  %v660_v23 = vld [vmem:[%s4713_s4 + $0x328] sm:$0xff] }
  0x4d   : > { %2535 = vmatpush1.bf16.msra.mxu1 %v2534_v63  ;;  %550 = vst [vmem:[#allocation2 + $0x129] sm:$0xff] %v3591_v46  ;;  %vm401_vm10 = vcmp.ge.f32.partialorder %v368_v37, 0.0  ;;  %v434_v58 = vmul.f32 %v3205_v57, %v368_v37  ;;  %v369_v63 = vadd.f32 %v3185_v50, %v330_v47  ;;  %v332_v25 = vmul.f32 %v3180_v49, %v293_v1  ;;  %v770_v0 = vld [vmem:[#allocation2 + $0x22] sm:$0xff] }
  0x4e   : > { %2583 = vmatpush1.bf16.msra.mxu0 %v2582_v11  ;;  %2712 = vmatprep.subr.bf16.mxu1 %v4716_v3  ;;  %v3610_v11 = vsel %vm400_vm9, %v367_v22, %v433_v55  ;;  %vm403_vm12 = vcmp.ge.f32.partialorder %v370_v19, 0.0  ;;  %v436_v31 = vmul.f32 %v3205_v57, %v370_v19  ;;  %v2591_v33 = vpack.c.bf16 %v628_v62, %v627_v61  ;;  %v661_v55 = vld [vmem:[%s4713_s4 + $0x330] sm:$0xff]  ;;  %v631_v61 = vld [vmem:[%s4713_s4 + $0x240] sm:$0xff] }
  0x4f   : > { %2584 = vmatprep.subr.bf16.mxu0 %v4716_v3  ;;  %552 = vst [vmem:[#allocation2 + $0x141] sm:$0xff] %v3610_v11  ;;  %vm402_vm11 = vcmp.ge.f32.partialorder %v369_v63, 0.0  ;;  %v435_v15 = vmul.f32 %v3205_v57, %v369_v63  ;;  %v371_v34 = vadd.f32 %v3185_v50, %v332_v25  ;;  %v3658_v43 = vpack.c.bf16 %v660_v23, %v659_v21  ;;  %v771_v23 = vld [vmem:[#allocation2 + $0x32] sm:$0xff] }
  0x50   : > { %1057 = vmatmul.mubr.f32.vlgmr.msra.gmra.mrb[0].mxu1 %v2922_v8  ;;  %v3660_v44 = vsel %vm403_vm12, %v370_v19, %v436_v31  ;;  %v664_v19 = vld [vmem:[%s4713_s4 + $0x348] sm:$0xff]  ;;  %v633_v25 = vld [vmem:[%s4713_s4 + $0x250] sm:$0xff]  ;;  %v666_v31 = vld [vmem:[%s4713_s4 + $0x358] sm:$0xff] }
  0x51   : > { %1282 = vmatmul.mubr.f32.vlgmr.msra.gmra.mrb[0].mxu0 %v767_v26  ;;  %1061 = vmatprep.mubr.f32.mxu1 %v736_v27  ;;  %v333_v26 = vmul.f32 %v3180_v49, %v294_v2  ;;  %v295_v27 = vld [vmem:[%s3137_s30 + $0xf8] sm:$0xff]  ;;  %555 = vst [vmem:[#allocation2 + $0x169] sm:$0xff] %v3660_v44  ;;  %vm404_vm13 = vcmp.ge.f32.partialorder %v371_v34, 0.0 }
  0x52   : > { %2586 = vmatpush1.bf16.msra.mxu0 %v2585_v10  ;;  %1286 = vmatprep.mubr.f32.mxu0 %v3580_v40  ;;  %v3624_v10 = vsel %vm401_vm10, %v368_v37, %v434_v58  ;;  %v3648_v37 = vld [vmem:[#allocation2 + $0x38] sm:$0xff]  ;;  %v334_v47 = vmul.f32 %v3180_v49, %v295_v27  ;;  %v665_v27 = vld [vmem:[%s4713_s4 + $0x350] sm:$0xff] }
  0x53   : > { %2587 = vmatprep.subr.bf16.mxu0 %v4716_v3  ;;  %2728 = vmatpush1.bf16.msra.mxu1 %v3582_v41  ;;  %553 = vst [vmem:[#allocation2 + $0x151] sm:$0xff] %v3624_v10  ;;  %v372_v22 = vadd.f32 %v3185_v50, %v333_v26  ;;  %v662_v58 = vld [vmem:[%s4713_s4 + $0x338] sm:$0xff] }
  0x54   : > { %1062 = vmatmul.mubr.f32.gmra.mrb[2].mxu1 %v2922_v8  ;;  %2713 = vmatprep.subr.bf16.mxu1 %v4716_v3  ;;  %v3641_v8 = vsel %vm402_vm11, %v369_v63, %v435_v15  ;;  %v437_v63 = vmul.f32 %v3205_v57, %v371_v34  ;;  %v663_v15 = vld [vmem:[%s4713_s4 + $0x340] sm:$0xff]  ;;  %v634_v26 = vld [vmem:[%s4713_s4 + $0x258] sm:$0xff] }
  0x55   : > { %1287 = vmatmul.mubr.f32.gmra.mrb[2].mxu0 %v768_v4  ;;  %1066 = vmatprep.mubr.f32.mxu1 %v3254_v20  ;;  %554 = vst [vmem:[#allocation2 + $0x159] sm:$0xff] %v3641_v8  ;;  %v629_v20 = vld [vmem:[%s4713_s4 + $0x230] sm:$0xff]  ;;  %vm405_vm14 = vcmp.ge.f32.partialorder %v372_v22, 0.0  ;;  %v438_v49 = vmul.f32 %v3205_v57, %v372_v22 }
  0x56   : > { %1291 = vmatprep.mubr.f32.mxu0 %v3612_v13  ;;  %2589 = vmatpush1.bf16.msra.mxu0 %v2588_v7  ;;  %v2594_v1 = vpack.c.bf16 %v630_v38, %v629_v20  ;;  %v3677_v2 = vsel %vm404_vm13, %v371_v34, %v437_v63  ;;  %v803_v7 = vld [vmem:[#allocation2 + $0x48] sm:$0xff]  ;;  %v805_v34 = vld [vmem:[#allocation2 + $0x60] sm:$0xff]  ;;  %v3733_v20 = vpack.c.bf16 %v666_v31, %v665_v27  ;;  %v638_v63 = vld [vmem:[%s4713_s4 + $0x278] sm:$0xff] }
  0x57   : > { %2590 = vmatprep.subr.bf16.mxu0 %v4716_v3  ;;  %2729 = vmatpush1.bf16.msra.mxu1 %v3607_v9  ;;  %v3679_v4 = vsel %vm405_vm14, %v372_v22, %v438_v49  ;;  %556 = vst [vmem:[#allocation2 + $0x171] sm:$0xff] %v3677_v2  ;;  %v636_v22 = vld [vmem:[%s4713_s4 + $0x268] sm:$0xff]  ;;  %v674_v27 = vld [vmem:[%s4713_s4 + $0x398] sm:$0xff] }
  0x58   : > { %1067 = vmatmul.mubr.f32.gmra.mrb[4].mxu1 %v3331_v53  ;;  %2714 = vmatprep.subr.bf16.mxu1 %v4716_v3  ;;  %v373_v53 = vadd.f32 %v3185_v50, %v334_v47  ;;  %v632_v50 = vld [vmem:[%s4713_s4 + $0x248] sm:$0xff]  ;;  %557 = vst [vmem:[#allocation2 + $0x181] sm:$0xff] %v3679_v4 }
  0x59   : > { %1292 = vmatmul.mubr.f32.gmra.mrb[4].mxu0 %v769_v32  ;;  %1071 = vmatprep.mubr.f32.mxu1 %v3275_v30  ;;  %v3689_v30 = vpack.c.bf16 %v662_v58, %v661_v55  ;;  %v772_v32 = vld [vmem:[#allocation2 + $0x3a] sm:$0xff]  ;;  %v668_v38 = vld [vmem:[%s4713_s4 + $0x368] sm:$0xff] }
  0x5a   : > { %1296 = vmatprep.mubr.f32.mxu0 %v3648_v37  ;;  %2592 = vmatpush1.bf16.msra.mxu0 %v2591_v33  ;;  %vm406_vm15 = vcmp.ge.f32.partialorder %v373_v53, 0.0  ;;  %v439_v62 = vmul.f32 %v3205_v57, %v373_v53  ;;  %v2597_v57 = vpack.c.bf16 %v632_v50, %v631_v61  ;;  %v2600_v33 = vpack.c.bf16 %v634_v26, %v633_v25  ;;  %v773_v47 = vld [vmem:[#allocation2 + $0x4a] sm:$0xff]  ;;  %v807_v61 = vld [vmem:[#allocation2 + $0x78] sm:$0xff] }
  0x5b   : > { %2593 = vmatprep.subr.bf16.mxu0 %v4716_v3  ;;  %2730 = vmatpush1.bf16.msra.mxu1 %v3658_v43  ;;  %v806_v58 = vld [vmem:[#allocation2 + $0x68] sm:$0xff]  ;;  %v642_v25 = vld [vmem:[%s4713_s4 + $0x298] sm:$0xff] }
  0x5c   : > { %1072 = vmatmul.mubr.f32.gmra.mrb[6].mxu1 %v3580_v40  ;;  %2715 = vmatprep.subr.bf16.mxu1 %v4716_v3  ;;  %v3703_v21 = vsel %vm406_vm15, %v373_v53, %v439_v62  ;;  %v804_v40 = vld [vmem:[#allocation2 + $0x50] sm:$0xff]  ;;  %v670_v53 = vld [vmem:[%s4713_s4 + $0x378] sm:$0xff]  ;;  %v640_v50 = vld [vmem:[%s4713_s4 + $0x288] sm:$0xff] }
  0x5d   : > { %1297 = vmatmul.mubr.f32.gmra.mrb[6].mxu0 %v770_v0  ;;  %1076 = vmatprep.mubr.f32.mxu1 %v3284_v35  ;;  %4738 = vst [vmem:[#allocation4_spill] sm:$0xff] %v3703_v21  ;;  %558 = vst [vmem:[#allocation2 + $0x189] sm:$0xff] %v3703_v21  ;;  %v3714_v35 = vpack.c.bf16 %v664_v19, %v663_v15  ;;  %v774_v0 = vld [vmem:[#allocation2 + $0x52] sm:$0xff]  ;;  %v672_v15 = vld [vmem:[%s4713_s4 + $0x388] sm:$0xff] }
  0x5e   : > { %1301 = vmatprep.mubr.f32.mxu0 %v803_v7  ;;  %2595 = vmatpush1.bf16.msra.mxu0 %v2594_v1  ;;  %v775_v19 = vld [vmem:[#allocation2 + $0x62] sm:$0xff]  ;;  %v776_v31 = vld [vmem:[#allocation2 + $0x6a] sm:$0xff]  ;;  %v2891_v21 = vld [vmem:[#allocation2 + $0x99] sm:$0xff] }
  0x5f   : > { %2596 = vmatprep.subr.bf16.mxu0 %v4716_v3  ;;  %2731 = vmatpush1.bf16.msra.mxu1 %v3689_v30 }
  0x60   : > { %1077 = vmatmul.mubr.f32.gmra.mrb[8].mxu1 %v3612_v13  ;;  %2716 = vmatprep.subr.bf16.mxu1 %v4716_v3  ;;  %v635_v13 = vld [vmem:[%s4713_s4 + $0x260] sm:$0xff] }
  0x61   : > { %1302 = vmatmul.mubr.f32.gmra.mrb[8].mxu0 %v771_v23  ;;  %1081 = vmatprep.mubr.f32.mxu1 %v3287_v36  ;;  %v667_v36 = vld [vmem:[%s4713_s4 + $0x360] sm:$0xff]  ;;  %v2603_v55 = vpack.c.bf16 %v636_v22, %v635_v13  ;;  %v644_v13 = vld [vmem:[%s4713_s4 + $0x2a8] sm:$0xff] }
  0x62   : > { %1306 = vmatprep.mubr.f32.mxu0 %v804_v40  ;;  %2598 = vmatpush1.bf16.msra.mxu0 %v2597_v57  ;;  %v3752_v49 = vpack.c.bf16 %v668_v38, %v667_v36  ;;  %v808_v57 = vld [vmem:[#allocation2 + $0x80] sm:$0xff]  ;;  %v676_v36 = vld [vmem:[%s4713_s4 + $0x3a8] sm:$0xff] }
  0x63   : > { %2599 = vmatprep.subr.bf16.mxu0 %v4716_v3  ;;  %2732 = vmatpush1.bf16.msra.mxu1 %v3714_v35  ;;  %v777_v38 = vld [vmem:[#allocation2 + $0x7a] sm:$0xff] }
  0x64   : > { %1082 = vmatmul.mubr.f32.gmra.mrb[10].mxu1 %v3648_v37  ;;  %2717 = vmatprep.subr.bf16.mxu1 %v4716_v3  ;;  %v637_v37 = vld [vmem:[%s4713_s4 + $0x270] sm:$0xff] }
  0x65   : > { %1307 = vmatmul.mubr.f32.gmra.mrb[10].mxu0 %v772_v32  ;;  %1086 = vmatprep.mubr.f32.mxu1 %v3309_v45  ;;  %v669_v45 = vld [vmem:[%s4713_s4 + $0x370] sm:$0xff]  ;;  %v2606_v1 = vpack.c.bf16 %v638_v63, %v637_v37  ;;  %v646_v37 = vld [vmem:[%s4713_s4 + $0x2b8] sm:$0xff] }
  0x66   : > { %1311 = vmatprep.mubr.f32.mxu0 %v805_v34  ;;  %2601 = vmatpush1.bf16.msra.mxu0 %v2600_v33  ;;  %v3770_v62 = vpack.c.bf16 %v670_v53, %v669_v45  ;;  %v3798_v33 = vld [vmem:[#allocation2 + $0x90] sm:$0xff]  ;;  %v678_v45 = vld [vmem:[%s4713_s4 + $0x3b8] sm:$0xff]  ;;  %v778_v53 = vld [vmem:[#allocation2 + $0x82] sm:$0xff] }
  0x67   : > { %2602 = vmatprep.subr.bf16.mxu0 %v4716_v3  ;;  %2733 = vmatpush1.bf16.msra.mxu1 %v3733_v20  ;;  %v677_v63 = vld [vmem:[%s4713_s4 + $0x3b0] sm:$0xff] }
  0x68   : > { %1087 = vmatmul.mubr.f32.gmra.mrb[12].mxu1 %v803_v7  ;;  %2718 = vmatprep.subr.bf16.mxu1 %v4716_v3  ;;  %v639_v7 = vld [vmem:[%s4713_s4 + $0x280] sm:$0xff] }
  0x69   : > { %1312 = vmatmul.mubr.f32.gmra.mrb[12].mxu0 %v773_v47  ;;  %1091 = vmatprep.mubr.f32.mxu1 %v3333_v54  ;;  %v671_v54 = vld [vmem:[%s4713_s4 + $0x380] sm:$0xff]  ;;  %v2609_v23 = vpack.c.bf16 %v640_v50, %v639_v7  ;;  %v648_v7 = vld [vmem:[%s4713_s4 + $0x2c8] sm:$0xff] }
  0x6a   : > { %1316 = vmatprep.mubr.f32.mxu0 %v806_v58  ;;  %2604 = vmatpush1.bf16.msra.mxu0 %v2603_v55  ;;  %v3788_v26 = vpack.c.bf16 %v672_v15, %v671_v54  ;;  %v3819_v55 = vld [vmem:[#allocation2 + $0x98] sm:$0xff]  ;;  %v679_v50 = vld [vmem:[%s4713_s4 + $0x3c0] sm:$0xff]  ;;  %v680_v54 = vld [vmem:[%s4713_s4 + $0x3c8] sm:$0xff] }
  0x6b   : > { %2605 = vmatprep.subr.bf16.mxu0 %v4716_v3  ;;  %2734 = vmatpush1.bf16.msra.mxu1 %v3752_v49  ;;  %v3861_v15 = vld [vmem:[#allocation2 + $0x92] sm:$0xff] }
  0x6c   : > { %1092 = vmatmul.mubr.f32.gmra.mrb[14].mxu1 %v804_v40  ;;  %2719 = vmatprep.subr.bf16.mxu1 %v4716_v3  ;;  %v641_v40 = vld [vmem:[%s4713_s4 + $0x290] sm:$0xff] }
  0x6d   : > { %1317 = vmatmul.mubr.f32.gmra.mrb[14].mxu0 %v774_v0  ;;  %1096 = vmatprep.mubr.f32.mxu1 %v3335_v60  ;;  %v673_v60 = vld [vmem:[%s4713_s4 + $0x390] sm:$0xff]  ;;  %v2612_v32 = vpack.c.bf16 %v642_v25, %v641_v40  ;;  %v650_v40 = vld [vmem:[%s4713_s4 + $0x2d8] sm:$0xff] }
  0x6e   : > { %1321 = vmatprep.mubr.f32.mxu0 %v807_v61  ;;  %2607 = vmatpush1.bf16.msra.mxu0 %v2606_v1  ;;  %v3808_v22 = vpack.c.bf16 %v674_v27, %v673_v60  ;;  %v3840_v1 = vld [vmem:[#allocation2 + $0xa8] sm:$0xff]  ;;  %v681_v25 = vld [vmem:[%s4713_s4 + $0x3d0] sm:$0xff]  ;;  %v682_v60 = vld [vmem:[%s4713_s4 + $0x3d8] sm:$0xff] }
  0x6f   : > { %2608 = vmatprep.subr.bf16.mxu0 %v4716_v3  ;;  %2735 = vmatpush1.bf16.msra.mxu1 %v3770_v62  ;;  %v3886_v27 = vld [vmem:[#allocation2 + $0x9a] sm:$0xff] }
  0x70   : > { %1097 = vmatmul.mubr.f32.gmra.mrb[16].mxu1 %v805_v34  ;;  %2720 = vmatprep.subr.bf16.mxu1 %v4716_v3  ;;  %v643_v34 = vld [vmem:[%s4713_s4 + $0x2a0] sm:$0xff] }
  0x71   : > { %1322 = vmatmul.mubr.f32.gmra.mrb[16].mxu0 %v775_v19  ;;  %1101 = vmatprep.mubr.f32.mxu1 %v3380_v14  ;;  %v675_v14 = vld [vmem:[%s4713_s4 + $0x3a0] sm:$0xff]  ;;  %v2615_v47 = vpack.c.bf16 %v644_v13, %v643_v34  ;;  %v652_v13 = vld [vmem:[%s4713_s4 + $0x2e8] sm:$0xff] }
  0x72   : > { %1326 = vmatprep.mubr.f32.mxu0 %v808_v57  ;;  %2610 = vmatpush1.bf16.msra.mxu0 %v2609_v23  ;;  %v3863_v23 = vld [vmem:[#allocation2 + $0xb0] sm:$0xff]  ;;  %v651_v34 = vld [vmem:[%s4713_s4 + $0x2e0] sm:$0xff] }
  0x73   : > { %2611 = vmatprep.subr.bf16.mxu0 %v4716_v3  ;;  %2736 = vmatpush1.bf16.msra.mxu1 %v3788_v26 }
  0x74   : > { %1102 = vmatmul.mubr.f32.gmra.mrb[18].mxu1 %v806_v58  ;;  %2721 = vmatprep.subr.bf16.mxu1 %v4716_v3  ;;  %v645_v58 = vld [vmem:[%s4713_s4 + $0x2b0] sm:$0xff] }
  0x75   : > { %1327 = vmatmul.mubr.f32.gmra.mrb[18].mxu0 %v776_v31  ;;  %1106 = vmatprep.mubr.f32.mxu1 %v3383_v16  ;;  %v3829_v16 = vpack.c.bf16 %v676_v36, %v675_v14  ;;  %v2618_v0 = vpack.c.bf16 %v646_v37, %v645_v58  ;;  %v683_v14 = vld [vmem:[%s4713_s4 + $0x3e0] sm:$0xff]  ;;  %v684_v36 = vld [vmem:[%s4713_s4 + $0x3e8] sm:$0xff]  ;;  %v653_v37 = vld [vmem:[%s4713_s4 + $0x2f0] sm:$0xff] }
  0x76   : > { %1331 = vmatprep.mubr.f32.mxu0 %v3798_v33  ;;  %2613 = vmatpush1.bf16.msra.mxu0 %v2612_v32  ;;  %v3888_v32 = vld [vmem:[#allocation2 + $0xc0] sm:$0xff]  ;;  %v3913_v58 = vld [vmem:[#allocation2 + $0xc8] sm:$0xff] }
  0x77   : > { %2614 = vmatprep.subr.bf16.mxu0 %v4716_v3  ;;  %2737 = vmatpush1.bf16.msra.mxu1 %v3808_v22 }
  0x78   : > { %1107 = vmatmul.mubr.f32.gmra.mrb[20].mxu1 %v807_v61  ;;  %2722 = vmatprep.subr.bf16.mxu1 %v4716_v3  ;;  %v647_v61 = vld [vmem:[%s4713_s4 + $0x2c0] sm:$0xff] }
  0x79   : > { %1332 = vmatmul.mubr.f32.gmra.mrb[20].mxu0 %v777_v38  ;;  %1111 = vmatprep.mubr.f32.mxu1 %v3391_v17  ;;  %v3850_v17 = vpack.c.bf16 %v678_v45, %v677_v63  ;;  %v2621_v19 = vpack.c.bf16 %v648_v7, %v647_v61  ;;  %v3911_v38 = vld [vmem:[#allocation2 + $0xaa] sm:$0xff]  ;;  %v3923_v63 = vpack.c.bf16 %v684_v36, %v683_v14  ;;  %v3942_v7 = vld [vmem:[#allocation2 + $0xb2] sm:$0xff]  ;;  %v4002_v14 = vld [vmem:[#allocation2 + $0x120] sm:$0xff] }
  0x7a   : > { %1336 = vmatprep.mubr.f32.mxu0 %v3819_v55  ;;  %2616 = vmatpush1.bf16.msra.mxu0 %v2615_v47  ;;  %v2627_v47 = vpack.c.bf16 %v652_v13, %v651_v34  ;;  %v685_v45 = vld [vmem:[%s4713_s4 + $0x3f0] sm:$0xff]  ;;  %v688_v61 = vld [vmem:[%s4713_s4 + $0x408] sm:$0xff] }
  0x7b   : > { %2617 = vmatprep.subr.bf16.mxu0 %v4716_v3  ;;  %2738 = vmatpush1.bf16.msra.mxu1 %v3829_v16  ;;  %v3986_v34 = vld [vmem:[#allocation2 + $0x108] sm:$0xff]  ;;  %v3994_v13 = vld [vmem:[#allocation2 + $0x110] sm:$0xff] }
  0x7c   : > { %1112 = vmatmul.mubr.f32.gmra.mrb[22].mxu1 %v808_v57  ;;  %2723 = vmatprep.subr.bf16.mxu1 %v4716_v3  ;;  %v649_v57 = vld [vmem:[%s4713_s4 + $0x2d0] sm:$0xff]  ;;  %v4010_v36 = vld [vmem:[#allocation2 + $0x128] sm:$0xff] }
  0x7d   : > { %1337 = vmatmul.mubr.f32.gmra.mrb[22].mxu0 %v778_v53  ;;  %1116 = vmatprep.mubr.f32.mxu1 %v3394_v18  ;;  %v3873_v18 = vpack.c.bf16 %v680_v54, %v679_v50  ;;  %v2624_v31 = vpack.c.bf16 %v650_v40, %v649_v57  ;;  %v686_v53 = vld [vmem:[%s4713_s4 + $0x3f8] sm:$0xff]  ;;  %v3957_v57 = vld [vmem:[#allocation2 + $0xc2] sm:$0xff] }
  0x7e   : > { %1341 = vmatprep.mubr.f32.mxu0 %v3840_v1  ;;  %2619 = vmatpush1.bf16.msra.mxu0 %v2618_v0  ;;  %v687_v0 = vld [vmem:[%s4713_s4 + $0x400] sm:$0xff]  ;;  %v3944_v54 = vld [vmem:[#allocation2 + $0xd8] sm:$0xff] }
  0x7f   : > { %2620 = vmatprep.subr.bf16.mxu0 %v4716_v3  ;;  %2739 = vmatpush1.bf16.msra.mxu1 %v3850_v17  ;;  %v3959_v40 = vld [vmem:[#allocation2 + $0xe0] sm:$0xff] }
  0x80   : > { %1117 = vmatmul.mubr.f32.gmra.mrb[24].mxu1 %v3798_v33  ;;  %2724 = vmatprep.subr.bf16.mxu1 %v4716_v3 }
  0x81   : > { %1342 = vmatmul.mubr.f32.gmra.mrb[24].mxu0 %v3861_v15  ;;  %1121 = vmatprep.mubr.f32.mxu1 %v3430_v42  ;;  %v3898_v42 = vpack.c.bf16 %v682_v60, %v681_v25  ;;  %v3970_v25 = vld [vmem:[#allocation2 + $0xf0] sm:$0xff]  ;;  %v3976_v60 = vld [vmem:[#allocation2 + $0xda] sm:$0xff] }
  0x82   : > { %1346 = vmatprep.mubr.f32.mxu0 %v3863_v23  ;;  %2622 = vmatpush1.bf16.msra.mxu0 %v2621_v19  ;;  %v3952_v19 = vpack.c.bf16 %v688_v61, %v687_v0  ;;  %v4058_v0 = vld [vmem:[#allocation2 + $0x170] sm:$0xff]  ;;  %v4064_v61 = vld [vmem:[#allocation2 + $0x15a] sm:$0xff] }
  0x83   : > { %2623 = vmatprep.subr.bf16.mxu0 %v4716_v3  ;;  %2740 = vmatpush1.bf16.msra.mxu1 %v3873_v18  ;;  %4746 = vst [vmem:[#allocation12_spill] sm:$0xff] %v4064_v61 }
  0x84   : > { %1122 = vmatmul.mubr.f32.gmra.mrb[26].mxu1 %v3819_v55  ;;  %2725 = vmatprep.subr.bf16.mxu1 %v4716_v3 }
  0x85   : > { %1347 = vmatmul.mubr.f32.gmra.mrb[26].mxu0 %v3886_v27  ;;  %1126 = vmatprep.mubr.f32.mxu1 %v3441_v48  ;;  %v654_v48 = vld [vmem:[%s4713_s4 + $0x2f8] sm:$0xff] }
  0x86   : > { %1351 = vmatprep.mubr.f32.mxu0 %v3888_v32  ;;  %2625 = vmatpush1.bf16.msra.mxu0 %v2624_v31  ;;  %v2630_v50 = vpack.c.bf16 %v654_v48, %v653_v37  ;;  %v3978_v31 = vld [vmem:[#allocation2 + $0xf8] sm:$0xff]  ;;  %v4026_v37 = vld [vmem:[#allocation2 + $0x140] sm:$0xff]  ;;  %v4034_v48 = vld [vmem:[#allocation2 + $0x150] sm:$0xff] }
  0x87   : > { %2626 = vmatprep.subr.bf16.mxu0 %v4716_v3  ;;  %2741 = vmatpush1.bf16.msra.mxu1 %v3898_v42 }
  0x88   : > { %1127 = vmatmul.mubr.f32.gmra.mrb[28].mxu1 %v3840_v1  ;;  %2726 = vmatprep.subr.bf16.mxu1 %v4716_v3 }
  0x89   : > { %1352 = vmatmul.mubr.f32.gmra.mrb[28].mxu0 %v3911_v38  ;;  %1131 = vmatprep.mubr.f32.mxu1 %v3452_v59  ;;  %v3948_v59 = vpack.c.bf16 %v686_v53, %v685_v45  ;;  %v4042_v45 = vld [vmem:[#allocation2 + $0x158] sm:$0xff]  ;;  %v4050_v53 = vld [vmem:[#allocation2 + $0x168] sm:$0xff] }
  0x8a   : > { %1356 = vmatprep.mubr.f32.mxu0 %v3913_v58  ;;  %2628 = vmatpush1.bf16.msra.mxu0 %v2627_v47  ;;  %v4018_v47 = vld [vmem:[#allocation2 + $0x138] sm:$0xff] }
  0x8b   : > { %2629 = vmatprep.subr.bf16.mxu0 %v4716_v3  ;;  %2742 = vmatpush1.bf16.msra.mxu1 %v3923_v63 }
  0x8c   : > { %1132 = vmatmul.mubr.f32.gmra.mrb[30].mxu1 %v3863_v23  ;;  %2727 = vmatprep.subr.bf16.mxu1 %v4716_v3 }
  0x8d   : > { %1357 = vmatmul.mubr.f32.gmra.mrb[30].mxu0 %v3942_v7  ;;  %1136 = vmatprep.mubr.f32.mxu1 %v3466_v5  ;;  %v3968_v5 = vld [vmem:[#allocation2 + $0xca] sm:$0xff] }
  0x8e   : > { %1361 = vmatprep.mubr.f32.mxu0 %v3944_v54  ;;  %2631 = vmatpush1.bf16.msra.mxu0 %v2630_v50  ;;  %v4066_v50 = vld [vmem:[#allocation2 + $0x180] sm:$0xff] }
  0x8f   : > { %2743 = vmatpush1.bf16.msra.mxu1 %v3948_v59  ;;  %2632 = vmatprep.subr.bf16.mxu0 %v4716_v3  ;;  %4747 = vst [vmem:[#allocation13_spill] sm:$0xff] %v4066_v50  ;;  %v4072_v3 = vld [vmem:[#allocation2 + $0x16a] sm:$0xff] }
  0x90   : > { %1137 = vmatmul.mubr.f32.gmra.mrb[32].mxu1 %v3888_v32  ;;  %2681 = vmatprep.subr.bf16.mxu1 %v3952_v19  ;;  %4748 = vst [vmem:[#allocation14_spill] sm:$0xff] %v4072_v3 }
  0x91   : > { %1362 = vmatmul.mubr.f32.gmra.mrb[32].mxu0 %v3957_v57  ;;  %1141 = vmatprep.mubr.f32.mxu1 %v3469_v6  ;;  %v3984_v6 = vld [vmem:[#allocation2 + $0xe2] sm:$0xff] }
  0x92   : > { %1366 = vmatprep.mubr.f32.mxu0 %v3959_v40 }
  0x94   : > { %1142 = vmatmul.mubr.f32.gmra.mrb[34].mxu1 %v3913_v58 }
  0x95   : > { %1367 = vmatmul.mubr.f32.gmra.mrb[34].mxu0 %v3968_v5  ;;  %1146 = vmatprep.mubr.f32.mxu1 %v3487_v24  ;;  %v3992_v24 = vld [vmem:[#allocation2 + $0xf2] sm:$0xff] }
  0x96   : > { %1371 = vmatprep.mubr.f32.mxu0 %v3970_v25 }
  0x98   : > { %1147 = vmatmul.mubr.f32.gmra.mrb[36].mxu1 %v3944_v54 }
  0x99   : > { %1372 = vmatmul.mubr.f32.gmra.mrb[36].mxu0 %v3976_v60  ;;  %1151 = vmatprep.mubr.f32.mxu1 %v3501_v29  ;;  %v4000_v29 = vld [vmem:[#allocation2 + $0xfa] sm:$0xff] }
  0x9a   : > { %1376 = vmatprep.mubr.f32.mxu0 %v3978_v31 }
  0x9c   : > { %1152 = vmatmul.mubr.f32.gmra.mrb[38].mxu1 %v3959_v40 }
  0x9d   : > { %1377 = vmatmul.mubr.f32.gmra.mrb[38].mxu0 %v3984_v6  ;;  %1156 = vmatprep.mubr.f32.mxu1 %v3509_v39  ;;  %v4008_v39 = vld [vmem:[#allocation2 + $0x10a] sm:$0xff] }
  0x9e   : > { %1381 = vmatprep.mubr.f32.mxu0 %v3986_v34  ;;  %4739 = vst [vmem:[#allocation5_spill] sm:$0xff] %v4008_v39 }
  0xa0   : > { %1157 = vmatmul.mubr.f32.gmra.mrb[40].mxu1 %v3970_v25 }
  0xa1   : > { %1382 = vmatmul.mubr.f32.gmra.mrb[40].mxu0 %v3992_v24  ;;  %1161 = vmatprep.mubr.f32.mxu1 %v3524_v51  ;;  %v4016_v51 = vld [vmem:[#allocation2 + $0x112] sm:$0xff] }
  0xa2   : > { %1386 = vmatprep.mubr.f32.mxu0 %v3994_v13  ;;  %4740 = vst [vmem:[#allocation6_spill] sm:$0xff] %v4016_v51 }
  0xa4   : > { %1162 = vmatmul.mubr.f32.gmra.mrb[42].mxu1 %v3978_v31 }
  0xa5   : > { %1387 = vmatmul.mubr.f32.gmra.mrb[42].mxu0 %v4000_v29  ;;  %1166 = vmatprep.mubr.f32.mxu1 %v3534_v56  ;;  %v4024_v56 = vld [vmem:[#allocation2 + $0x122] sm:$0xff] }
  0xa6   : > { %1391 = vmatprep.mubr.f32.mxu0 %v4002_v14  ;;  %4741 = vst [vmem:[#allocation7_spill] sm:$0xff] %v4024_v56 }
  0xa8   : > { %1167 = vmatmul.mubr.f32.gmra.mrb[44].mxu1 %v3986_v34 }
  0xa9   : > { %1392 = vmatmul.mubr.f32.gmra.mrb[44].mxu0 %v4008_v39  ;;  %1171 = vmatprep.mubr.f32.mxu1 %v3547_v12  ;;  %v4032_v12 = vld [vmem:[#allocation2 + $0x12a] sm:$0xff]  ;;  %v4751_v39 = vmov 0.0|0.0  }
  0xaa   : > { %1396 = vmatprep.mubr.f32.mxu0 %v4010_v36  ;;  %4742 = vst [vmem:[#allocation8_spill] sm:$0xff] %v4032_v12 }
  0xac   : > { %1172 = vmatmul.mubr.f32.gmra.mrb[46].mxu1 %v3994_v13 }
  0xad   : > { %1397 = vmatmul.mubr.f32.gmra.mrb[46].mxu0 %v4016_v51  ;;  %1176 = vmatprep.mubr.f32.mxu1 %v3564_v28  ;;  %v4040_v28 = vld [vmem:[#allocation2 + $0x13a] sm:$0xff] }
  0xae   : > { %1401 = vmatprep.mubr.f32.mxu0 %v4018_v47  ;;  %4743 = vst [vmem:[#allocation9_spill] sm:$0xff] %v4040_v28 }
  0xb0   : > { %1177 = vmatmul.mubr.f32.gmra.mrb[48].mxu1 %v4002_v14 }
  0xb1   : > { %1402 = vmatmul.mubr.f32.gmra.mrb[48].mxu0 %v4024_v56  ;;  %1181 = vmatprep.mubr.f32.mxu1 %v3591_v46  ;;  %v4048_v46 = vld [vmem:[#allocation2 + $0x142] sm:$0xff]  ;;  %v831_v56 = vld [vmem:[#allocation2 + $0x19] sm:$0xff] }
  0xb2   : > { %1406 = vmatprep.mubr.f32.mxu0 %v4026_v37  ;;  %4744 = vst [vmem:[#allocation10_spill] sm:$0xff] %v4048_v46 }
  0xb4   : > { %1182 = vmatmul.mubr.f32.gmra.mrb[50].mxu1 %v4010_v36 }
  0xb5   : > { %1407 = vmatmul.mubr.f32.gmra.mrb[50].mxu0 %v4032_v12  ;;  %1186 = vmatprep.mubr.f32.mxu1 %v3597_v52  ;;  %v4056_v52 = vld [vmem:[#allocation2 + $0x152] sm:$0xff] }
  0xb6   : > { %1411 = vmatprep.mubr.f32.mxu0 %v4034_v48  ;;  %4745 = vst [vmem:[#allocation11_spill] sm:$0xff] %v4056_v52  ;;  %v689_v12 = vld [vmem:[%s4713_s4 + $0x410] sm:$0xff] }
  0xb8   : > { %1187 = vmatmul.mubr.f32.gmra.mrb[52].mxu1 %v4018_v47 }
  0xb9   : > { %1412 = vmatmul.mubr.f32.gmra.mrb[52].mxu0 %v4040_v28  ;;  %1191 = vmatprep.mubr.f32.mxu1 %v3610_v11  ;;  %v863_v28 = vld [vmem:[#allocation2 + $0x1a] sm:$0xff] }
  0xba   : > { %1416 = vmatprep.mubr.f32.mxu0 %v4042_v45 }
  0xbc   : > { %1192 = vmatmul.mubr.f32.gmra.mrb[54].mxu1 %v4026_v37 }
  0xbd   : > { %1417 = vmatmul.mubr.f32.gmra.mrb[54].mxu0 %v4048_v46  ;;  %1196 = vmatprep.mubr.f32.mxu1 %v3624_v10  ;;  %v4074_v46 = vld [vmem:[#allocation2 + $0x188] sm:$0xff] }
  0xbe   : > { %1421 = vmatprep.mubr.f32.mxu0 %v4050_v53  ;;  %4749 = vst [vmem:[#allocation15_spill] sm:$0xff] %v4074_v46 }
  0xc0   : > { %1197 = vmatmul.mubr.f32.gmra.mrb[56].mxu1 %v4034_v48 }
  0xc1   : > { %1422 = vmatmul.mubr.f32.gmra.mrb[56].mxu0 %v4056_v52  ;;  %1201 = vmatprep.mubr.f32.mxu1 %v3641_v8  ;;  %v4080_v52 = vld [vmem:[#allocation2 + $0x172] sm:$0xff] }
  0xc2   : > { %1426 = vmatprep.mubr.f32.mxu0 %v4058_v0  ;;  %4750 = vst [vmem:[#allocation16_spill] sm:$0xff] %v4080_v52 }
  0xc4   : > { %1202 = vmatmul.mubr.f32.gmra.mrb[58].mxu1 %v4042_v45 }
  0xc5   : > { %1427 = vmatmul.mubr.f32.gmra.mrb[58].mxu0 %v4064_v61  ;;  %1206 = vmatprep.mubr.f32.mxu1 %v3660_v44  ;;  %v2890_v61 = vld [vmem:[#allocation2 + $0x91] sm:$0xff] }
  0xc6   : > { %1431 = vmatprep.mubr.f32.mxu0 %v4066_v50  ;;  %v4098_v50 = vld [vmem:[#allocation2 + $0x32] sm:$0xff] }
  0xc8   : > { %1207 = vmatmul.mubr.f32.gmra.mrb[60].mxu1 %v4050_v53 }
  0xc9   : > { %1432 = vmatmul.mubr.f32.gmra.mrb[60].mxu0 %v4072_v3  ;;  %1211 = vmatprep.mubr.f32.mxu1 %v3677_v2  ;;  %v690_v3 = vld [vmem:[%s4713_s4 + $0x418] sm:$0xff] }
  0xca   : > { %1436 = vmatprep.mubr.f32.mxu0 %v4074_v46  ;;  %v864_v46 = vld [vmem:[#allocation2 + $0x22] sm:$0xff]  ;;  %v2684_v51 = vpack.c.bf16 %v690_v3, %v689_v12  ;;  %v2893_v12 = vld [vmem:[#allocation2 + $0xb1] sm:$0xff] }
  0xcc   : > { %1212 = vmatmul.mubr.f32.gmra.mrb[62].mxu1 %v4058_v0 }
  0xcd   : > { %1437 = vmatmul.mubr.f32.gmra.mrb[62].mxu0 %v4080_v52  ;;  %1771 = vmatprep.mubr.f32.mxu1 %v2890_v61  ;;  %v691_v61 = vld [vmem:[%s4713_s4 + $0x420] sm:$0xff]  ;;  %v692_v52 = vld [vmem:[%s4713_s4 + $0x428] sm:$0xff] }
  0xce   : > { %1506 = vmatprep.mubr.f32.mxu0 %v863_v28  ;;  %v832_v28 = vld [vmem:[#allocation2 + $0x21] sm:$0xff]  ;;  %v2688_v3 = vpack.c.bf16 %v692_v52, %v691_v61  ;;  %v4125_v52 = vld [vmem:[#allocation2 + $0x39] sm:$0xff] }
  0xcf   : > { %v2894_v61 = vld [vmem:[#allocation2 + $0xc1] sm:$0xff] }
  0xd0   : > { %1772 = vmatmul.mubr.f32.vlgmr.msra.gmra.mrb[64].mxu1 %v3798_v33  ;;  %v693_v33 = vld [vmem:[%s4713_s4 + $0x430] sm:$0xff] }
  0xd1   : > { %1507 = vmatmul.mubr.f32.vlgmr.msra.gmra.mrb[0].mxu0 %v831_v56  ;;  %1776 = vmatprep.mubr.f32.mxu1 %v2891_v21  ;;  %v2892_v21 = vld [vmem:[#allocation2 + $0xa9] sm:$0xff]  ;;  %v4110_v56 = vld [vmem:[#allocation2 + $0x31] sm:$0xff] }
  0xd2   : > { %2634 = vmatpush1.bf16.msra.mxu0 %v3582_v41  ;;  %1511 = vmatprep.mubr.f32.mxu0 %v864_v46  ;;  %v694_v41 = vld [vmem:[%s4713_s4 + $0x438] sm:$0xff]  ;;  %v695_v46 = vld [vmem:[%s4713_s4 + $0x440] sm:$0xff] }
  0xd3   : > { %2635 = vmatprep.subr.bf16.mxu0 %v4751_v39  ;;  %2683 = vmatpush3.bf16.msra.mxu1 %v3952_v19  ;;  %v2692_v19 = vpack.c.bf16 %v694_v41, %v693_v33  ;;  %v4148_v33 = vld [vmem:[#allocation2 + $0xc9] sm:$0xff]  ;;  %v699_v41 = vld [vmem:[%s4713_s4 + $0x460] sm:$0xff] }
  0xd4   : > { %1777 = vmatmul.mubr.f32.gmra.mrb[66].mxu1 %v3819_v55  ;;  %2685 = vmatprep.subr.bf16.mxu1 %v2684_v51  ;;  %v4113_v55 = vld [vmem:[#allocation2 + $0x3a] sm:$0xff] }
  0xd5   : > { %1512 = vmatmul.mubr.f32.gmra.mrb[2].mxu0 %v832_v28  ;;  %1781 = vmatprep.mubr.f32.mxu1 %v2892_v21  ;;  %v697_v28 = vld [vmem:[%s4713_s4 + $0x450] sm:$0xff] }
  0xd6   : > { %1516 = vmatprep.mubr.f32.mxu0 %v4098_v50  ;;  %2637 = vmatpush1.bf16.msra.mxu0 %v3607_v9  ;;  %v696_v9 = vld [vmem:[%s4713_s4 + $0x448] sm:$0xff] }
  0xd7   : > { %2638 = vmatprep.subr.bf16.mxu0 %v4751_v39  ;;  %2687 = vmatpush3.bf16.msra.mxu1 %v2684_v51  ;;  %v2696_v51 = vpack.c.bf16 %v696_v9, %v695_v46  ;;  %v4140_v21 = vld [vmem:[#allocation2 + $0x49] sm:$0xff]  ;;  %v4166_v46 = vld [vmem:[#allocation2 + $0xd9] sm:$0xff] }
  0xd8   : > { %1782 = vmatmul.mubr.f32.gmra.mrb[68].mxu1 %v3840_v1  ;;  %2689 = vmatprep.subr.bf16.mxu1 %v2688_v3  ;;  %v4128_v1 = vld [vmem:[#allocation2 + $0x4a] sm:$0xff] }
  0xd9   : > { %1517 = vmatmul.mubr.f32.gmra.mrb[4].mxu0 %v4110_v56  ;;  %1786 = vmatprep.mubr.f32.mxu1 %v2893_v12  ;;  %v701_v9 = vld [vmem:[%s4713_s4 + $0x470] sm:$0xff] }
  0xda   : > { %1521 = vmatprep.mubr.f32.mxu0 %v4113_v55  ;;  %2640 = vmatpush1.bf16.msra.mxu0 %v3658_v43  ;;  %v698_v43 = vld [vmem:[%s4713_s4 + $0x458] sm:$0xff] }
  0xdb   : > { %2641 = vmatprep.subr.bf16.mxu0 %v4751_v39  ;;  %2691 = vmatpush3.bf16.msra.mxu1 %v2688_v3  ;;  %v2700_v3 = vpack.c.bf16 %v698_v43, %v697_v28  ;;  %v4184_v28 = vld [vmem:[#allocation2 + $0xe1] sm:$0xff]  ;;  %v4188_v43 = vld [vmem:[#allocation2 + $0x69] sm:$0xff] }
  0xdc   : > { %1787 = vmatmul.mubr.f32.gmra.mrb[70].mxu1 %v3863_v23  ;;  %2693 = vmatprep.subr.bf16.mxu1 %v2692_v19  ;;  %v4143_v23 = vld [vmem:[#allocation2 + $0x52] sm:$0xff] }
  0xdd   : > { %1522 = vmatmul.mubr.f32.gmra.mrb[6].mxu0 %v4125_v52  ;;  %1791 = vmatprep.mubr.f32.mxu1 %v2894_v61 }
  0xde   : > { %1526 = vmatprep.mubr.f32.mxu0 %v4128_v1  ;;  %2643 = vmatpush1.bf16.msra.mxu0 %v3689_v30  ;;  %v700_v30 = vld [vmem:[%s4713_s4 + $0x468] sm:$0xff] }
  0xdf   : > { %2644 = vmatprep.subr.bf16.mxu0 %v4751_v39  ;;  %2695 = vmatpush3.bf16.msra.mxu1 %v2692_v19  ;;  %v4158_v19 = vld [vmem:[#allocation2 + $0x51] sm:$0xff]  ;;  %v2704_v12 = vpack.c.bf16 %v700_v30, %v699_v41  ;;  %v4212_v41 = vld [vmem:[#allocation2 + $0x81] sm:$0xff] }
  0xe0   : > { %1792 = vmatmul.mubr.f32.gmra.mrb[72].mxu1 %v3888_v32  ;;  %2697 = vmatprep.subr.bf16.mxu1 %v2696_v51  ;;  %v4161_v32 = vld [vmem:[#allocation2 + $0x62] sm:$0xff] }
  0xe1   : > { %1527 = vmatmul.mubr.f32.gmra.mrb[8].mxu0 %v4140_v21  ;;  %1796 = vmatprep.mubr.f32.mxu1 %v4148_v33  ;;  %v4763_v30 = vld [vmem:[#allocation14_spill] sm:$0xff] }
  0xe2   : > { %1531 = vmatprep.mubr.f32.mxu0 %v4143_v23  ;;  %2646 = vmatpush1.bf16.msra.mxu0 %v3714_v35  ;;  %v702_v35 = vld [vmem:[%s4713_s4 + $0x478] sm:$0xff] }
  0xe3   : > { %2647 = vmatprep.subr.bf16.mxu0 %v4751_v39  ;;  %2699 = vmatpush3.bf16.msra.mxu1 %v2696_v51  ;;  %v4176_v51 = vld [vmem:[#allocation2 + $0x61] sm:$0xff]  ;;  %v2708_v61 = vpack.c.bf16 %v702_v35, %v701_v9  ;;  %v2909_v9 = vld [vmem:[#allocation2 + $0x169] sm:$0xff]  ;;  %v971_v35 = vld [vmem:[#allocation2 + $0xb2] sm:$0xff] }
  0xe4   : > { %1797 = vmatmul.mubr.f32.gmra.mrb[74].mxu1 %v3913_v58  ;;  %2701 = vmatprep.subr.bf16.mxu1 %v2700_v3  ;;  %v4179_v58 = vld [vmem:[#allocation2 + $0x6a] sm:$0xff] }
  0xe5   : > { %1532 = vmatmul.mubr.f32.gmra.mrb[10].mxu0 %v4158_v19  ;;  %1801 = vmatprep.mubr.f32.mxu1 %v4166_v46 }
  0xe6   : > { %1536 = vmatprep.mubr.f32.mxu0 %v4161_v32  ;;  %2649 = vmatpush1.bf16.msra.mxu0 %v3733_v20  ;;  %v4191_v20 = vld [vmem:[#allocation2 + $0x7a] sm:$0xff] }
  0xe7   : > { %2650 = vmatprep.subr.bf16.mxu0 %v4751_v39  ;;  %2703 = vmatpush3.bf16.msra.mxu1 %v2700_v3  ;;  %v4200_v3 = vld [vmem:[#allocation2 + $0x79] sm:$0xff] }
  0xe8   : > { %1802 = vmatmul.mubr.f32.gmra.mrb[76].mxu1 %v3944_v54  ;;  %2705 = vmatprep.subr.bf16.mxu1 %v2704_v12  ;;  %v4196_v54 = vld [vmem:[#allocation2 + $0xf1] sm:$0xff] }
  0xe9   : > { %1537 = vmatmul.mubr.f32.gmra.mrb[12].mxu0 %v4176_v51  ;;  %1806 = vmatprep.mubr.f32.mxu1 %v4184_v28 }
  0xea   : > { %1541 = vmatprep.mubr.f32.mxu0 %v4179_v58  ;;  %2652 = vmatpush1.bf16.msra.mxu0 %v3752_v49  ;;  %v4203_v49 = vld [vmem:[#allocation2 + $0x82] sm:$0xff] }
  0xeb   : > { %2653 = vmatprep.subr.bf16.mxu0 %v4751_v39  ;;  %2707 = vmatpush3.bf16.msra.mxu1 %v2704_v12 }
  0xec   : > { %1807 = vmatmul.mubr.f32.gmra.mrb[78].mxu1 %v3959_v40  ;;  %2709 = vmatprep.subr.bf16.mxu1 %v2708_v61  ;;  %v4208_v40 = vld [vmem:[#allocation2 + $0xf9] sm:$0xff] }
  0xed   : > { %1542 = vmatmul.mubr.f32.gmra.mrb[14].mxu0 %v4188_v43  ;;  %1811 = vmatprep.mubr.f32.mxu1 %v4196_v54 }
  0xee   : > { %1546 = vmatprep.mubr.f32.mxu0 %v4191_v20  ;;  %2655 = vmatpush1.bf16.msra.mxu0 %v3770_v62  ;;  %v4218_v62 = vld [vmem:[#allocation2 + $0x109] sm:$0xff] }
  0xef   : > { %2656 = vmatprep.subr.bf16.mxu0 %v4751_v39  ;;  %2711 = vmatpush3.bf16.msra.mxu1 %v2708_v61  ;;  %v972_v61 = vld [vmem:[#allocation2 + $0xc2] sm:$0xff] }
  0xf0   : > { %1812 = vmatmul.mubr.f32.gmra.mrb[80].mxu1 %v3970_v25  ;;  %v841_v25 = vld [vmem:[#allocation2 + $0x91] sm:$0xff] }
  0xf1   : > { %1547 = vmatmul.mubr.f32.gmra.mrb[16].mxu0 %v4200_v3  ;;  %1816 = vmatprep.mubr.f32.mxu1 %v4208_v40 }
  0xf2   : > { %1551 = vmatprep.mubr.f32.mxu0 %v4203_v49  ;;  %2658 = vmatpush1.bf16.msra.mxu0 %v3788_v26  ;;  %v4225_v26 = vld [vmem:[#allocation2 + $0x111] sm:$0xff] }
  0xf3   : > { %2659 = vmatprep.subr.bf16.mxu0 %v4751_v39 }
  0xf4   : > { %1817 = vmatmul.mubr.f32.gmra.mrb[82].mxu1 %v3978_v31  ;;  %v842_v31 = vld [vmem:[#allocation2 + $0x99] sm:$0xff] }
  0xf5   : > { %1552 = vmatmul.mubr.f32.gmra.mrb[18].mxu0 %v4212_v41  ;;  %1821 = vmatprep.mubr.f32.mxu1 %v4218_v62 }
  0xf6   : > { %1556 = vmatprep.mubr.f32.mxu0 %v3861_v15  ;;  %2661 = vmatpush1.bf16.msra.mxu0 %v3808_v22  ;;  %v4232_v22 = vld [vmem:[#allocation2 + $0x121] sm:$0xff]  ;;  %v843_v15 = vld [vmem:[#allocation2 + $0xa9] sm:$0xff] }
  0xf7   : > { %2662 = vmatprep.subr.bf16.mxu0 %v4751_v39 }
  0xf8   : > { %1822 = vmatmul.mubr.f32.gmra.mrb[84].mxu1 %v3986_v34 }
  0xf9   : > { %1557 = vmatmul.mubr.f32.gmra.mrb[20].mxu0 %v841_v25  ;;  %1826 = vmatprep.mubr.f32.mxu1 %v4225_v26  ;;  %v4316_v25 = vld [vmem:[#allocation2 + $0x18a] sm:$0xff] }
  0xfa   : > { %1561 = vmatprep.mubr.f32.mxu0 %v3886_v27  ;;  %2664 = vmatpush1.bf16.msra.mxu0 %v3829_v16  ;;  %v2903_v16 = vld [vmem:[#allocation2 + $0x129] sm:$0xff]  ;;  %v844_v27 = vld [vmem:[#allocation2 + $0xb1] sm:$0xff] }
  0xfb   : > { %2665 = vmatprep.subr.bf16.mxu0 %v4751_v39 }
  0xfc   : > { %1827 = vmatmul.mubr.f32.gmra.mrb[86].mxu1 %v3994_v13 }
  0xfd   : > { %1562 = vmatmul.mubr.f32.gmra.mrb[22].mxu0 %v842_v31  ;;  %1831 = vmatprep.mubr.f32.mxu1 %v4232_v22 }
  0xfe   : > { %1566 = vmatprep.mubr.f32.mxu0 %v3911_v38  ;;  %2667 = vmatpush1.bf16.msra.mxu0 %v3850_v17  ;;  %v2904_v38 = vld [vmem:[#allocation2 + $0x139] sm:$0xff]  ;;  %v845_v17 = vld [vmem:[#allocation2 + $0xc1] sm:$0xff] }
  0xff   : > { %2668 = vmatprep.subr.bf16.mxu0 %v4751_v39 }
 0x100   : > { %1832 = vmatmul.mubr.f32.gmra.mrb[88].mxu1 %v4002_v14  ;;  %v4760_v14 = vld [vmem:[#allocation10_spill] sm:$0xff] }
 0x101   : > { %1567 = vmatmul.mubr.f32.gmra.mrb[24].mxu0 %v843_v15  ;;  %1836 = vmatprep.mubr.f32.mxu1 %v2903_v16  ;;  %v975_v15 = vld [vmem:[#allocation2 + $0xe2] sm:$0xff] }
 0x102   : > { %1571 = vmatprep.mubr.f32.mxu0 %v3942_v7  ;;  %2670 = vmatpush1.bf16.msra.mxu0 %v3873_v18  ;;  %v958_v18 = vld [vmem:[#allocation2 + $0x199] sm:$0xff]  ;;  %v959_v7 = vld [vmem:[#allocation2 + $0x1a1] sm:$0xff] }
 0x103   : > { %2671 = vmatprep.subr.bf16.mxu0 %v4751_v39 }
 0x104   : > { %1837 = vmatmul.mubr.f32.gmra.mrb[90].mxu1 %v4010_v36 }
 0x105   : > { %1572 = vmatmul.mubr.f32.gmra.mrb[26].mxu0 %v844_v27  ;;  %1841 = vmatprep.mubr.f32.mxu1 %v2904_v38 }
 0x106   : > { %1576 = vmatprep.mubr.f32.mxu0 %v3957_v57  ;;  %2673 = vmatpush1.bf16.msra.mxu0 %v3898_v42  ;;  %v4756_v42 = vld [vmem:[#allocation15_spill] sm:$0xff]  ;;  %v2905_v57 = vld [vmem:[#allocation2] sm:$0xff] }
 0x107   : > { %2674 = vmatprep.subr.bf16.mxu0 %v4751_v39 }
 0x108   : > { %1842 = vmatmul.mubr.f32.gmra.mrb[92].mxu1 %v4018_v47  ;;  %v2906_v47 = vld [vmem:[#allocation2 + $0x141] sm:$0xff] }
 0x109   : > { %1577 = vmatmul.mubr.f32.gmra.mrb[28].mxu0 %v845_v17  ;;  %1846 = vmatprep.mubr.f32.mxu1 %v3610_v11  ;;  %v4752_v11 = vld [vmem:[#allocation5_spill] sm:$0xff]  ;;  %v2912_v17 = vld [vmem:[#allocation2 + $0x189] sm:$0xff] }
 0x10a   : > { %1581 = vmatprep.mubr.f32.mxu0 %v3968_v5  ;;  %2676 = vmatpush1.bf16.msra.mxu0 %v3923_v63 }
 0x10b   : > { %2677 = vmatprep.subr.bf16.mxu0 %v4751_v39 }
 0x10c   : > { %1847 = vmatmul.mubr.f32.gmra.mrb[94].mxu1 %v4026_v37  ;;  %v4761_v37 = vld [vmem:[#allocation11_spill] sm:$0xff] }
 0x10d   : > { %1582 = vmatmul.mubr.f32.gmra.mrb[30].mxu0 %v4148_v33  ;;  %1851 = vmatprep.mubr.f32.mxu1 %v3624_v10  ;;  %v4753_v10 = vld [vmem:[#allocation13_spill] sm:$0xff] }
 0x10e   : > { %1586 = vmatprep.mubr.f32.mxu0 %v3976_v60  ;;  %2679 = vmatpush1.bf16.msra.mxu0 %v3948_v59  ;;  %v4758_v60 = vld [vmem:[#allocation8_spill] sm:$0xff]  ;;  %v969_v33 = vld [vmem:[#allocation2 + $0x9a] sm:$0xff] }
 0x110   : > { %1852 = vmatmul.mubr.f32.gmra.mrb[96].mxu1 %v4034_v48 }
 0x111   : > { %1587 = vmatmul.mubr.f32.gmra.mrb[32].mxu0 %v4166_v46  ;;  %1856 = vmatprep.mubr.f32.mxu1 %v3641_v8  ;;  %v4754_v8 = vld [vmem:[#allocation4_spill] sm:$0xff] }
 0x112   : > { %1591 = vmatprep.mubr.f32.mxu0 %v3984_v6 }
 0x114   : > { %1857 = vmatmul.mubr.f32.gmra.mrb[98].mxu1 %v4042_v45 }
 0x115   : > { %1592 = vmatmul.mubr.f32.gmra.mrb[34].mxu0 %v4184_v28  ;;  %1861 = vmatprep.mubr.f32.mxu1 %v3660_v44  ;;  %v4755_v44 = vld [vmem:[#allocation6_spill] sm:$0xff] }
 0x116   : > { %1596 = vmatprep.mubr.f32.mxu0 %v3992_v24  ;;  %v4759_v24 = vld [vmem:[#allocation9_spill] sm:$0xff]  ;;  %v4311_v28 = vld [vmem:[#allocation2 + $0x182] sm:$0xff] }
 0x118   : > { %1862 = vmatmul.mubr.f32.gmra.mrb[100].mxu1 %v4050_v53  ;;  %v2907_v53 = vld [vmem:[#allocation2 + $0x151] sm:$0xff] }
 0x119   : > { %1597 = vmatmul.mubr.f32.gmra.mrb[36].mxu0 %v4196_v54  ;;  %1866 = vmatprep.mubr.f32.mxu1 %v3677_v2 }
 0x11a   : > { %1601 = vmatprep.mubr.f32.mxu0 %v4000_v29 }
 0x11c   : > { %1867 = vmatmul.mubr.f32.gmra.mrb[102].mxu1 %v4058_v0  ;;  %v4762_v0 = vld [vmem:[#allocation12_spill] sm:$0xff] }
 0x11d   : > { %1602 = vmatmul.mubr.f32.gmra.mrb[38].mxu0 %v4208_v40  ;;  %1871 = vmatprep.mubr.f32.mxu1 %v3679_v4  ;;  %v4757_v4 = vld [vmem:[#allocation7_spill] sm:$0xff] }
 0x11e   : > { %1606 = vmatprep.mubr.f32.mxu0 %v4752_v11  ;;  %v973_v40 = vld [vmem:[#allocation2 + $0xca] sm:$0xff]  ;;  %v977_v11 = vld [vmem:[#allocation2 + $0xfa] sm:$0xff] }
 0x120   : > { %1872 = vmatmul.mubr.f32.gmra.mrb[104].mxu1 %v4753_v10  ;;  %v896_v10 = vld [vmem:[#allocation2 + $0x30] sm:$0xff] }
 0x121   : > { %1607 = vmatmul.mubr.f32.gmra.mrb[40].mxu0 %v4218_v62  ;;  %1876 = vmatprep.mubr.f32.mxu1 %v4754_v8  ;;  %v974_v62 = vld [vmem:[#allocation2 + $0xda] sm:$0xff]  ;;  %v978_v8 = vld [vmem:[#allocation2 + $0x10a] sm:$0xff] }
 0x122   : > { %1611 = vmatprep.mubr.f32.mxu0 %v4755_v44 }
 0x123   : > { %v4276_v2 = vpop.f32.mrb[0].mxu1 }
 0x124   : > { %1877 = vmatmul.mubr.f32.gmra.mrb[106].mxu1 %v4756_v42  ;;  %v1060_v63 = vpop.f32.mrb[1].mxu1  ;;  %v979_v42 = vld [vmem:[#allocation2 + $0x112] sm:$0xff] }
 0x125   : > { %1612 = vmatmul.mubr.f32.gmra.mrb[42].mxu0 %v4225_v26  ;;  %1881 = vmatprep.mubr.f32.mxu1 %v958_v18  ;;  %v897_v63 = vld [vmem:[#allocation2 + $0x38] sm:$0xff] }
 0x126   : > { %1616 = vmatprep.mubr.f32.mxu0 %v4757_v4  ;;  %v980_v4 = vld [vmem:[#allocation2 + $0x122] sm:$0xff] }
 0x127   : > { %v4281_v59 = vpop.f32.mrb[2].mxu1 }
 0x128   : > { %1882 = vmatmul.mubr.f32.gmra.mrb[108].mxu1 %v2905_v57  ;;  %v1065_v5 = vpop.f32.mrb[3].mxu1 }
 0x129   : > { %1617 = vmatmul.mubr.f32.gmra.mrb[44].mxu0 %v4232_v22  ;;  %1886 = vmatprep.mubr.f32.mxu1 %v959_v7  ;;  %v2911_v22 = vld [vmem:[#allocation2 + $0x181] sm:$0xff] }
 0x12a   : > { %1621 = vmatprep.mubr.f32.mxu0 %v4758_v60 }
 0x12b   : > { %v4285_v6 = vpop.f32.mrb[4].mxu1 }
 0x12c   : > { %1887 = vmatmul.mubr.f32.gmra.mrb[110].mxu1 %v2905_v57  ;;  %v1070_v34 = vpop.f32.mrb[5].mxu1 }
 0x12d   : > { %1622 = vmatmul.mubr.f32.gmra.mrb[46].mxu0 %v2903_v16  ;;  %2440 = vmatprep.mubr.f32.mxu1 %v4098_v50  ;;  %v968_v50 = vld [vmem:[#allocation2 + $0x92] sm:$0xff] }
 0x12e   : > { %1626 = vmatprep.mubr.f32.mxu0 %v4759_v24  ;;  %v976_v16 = vld [vmem:[#allocation2 + $0xf2] sm:$0xff] }
 0x12f   : > { %v4289_v13 = vpop.f32.mrb[6].mxu1 }
 0x130   : > { %2441 = vmatmul.mubr.f32.vlgmr.msra.gmra.mrb[112].mxu1 %v4113_v55  ;;  %v1075_v29 = vpop.f32.mrb[7].mxu1 }
 0x131   : > { %1627 = vmatmul.mubr.f32.gmra.mrb[48].mxu0 %v2904_v38  ;;  %2443 = vmatprep.mubr.f32.mxu1 %v4128_v1 }
 0x132   : > { %1631 = vmatprep.mubr.f32.mxu0 %v4760_v14 }
 0x133   : > { %v4294_v39 = vpop.f32.mrb[8].mxu1 }
 0x134   : > { %2444 = vmatmul.mubr.f32.gmra.mrb[114].mxu1 %v4143_v23  ;;  %v1080_v36 = vpop.f32.mrb[9].mxu1  ;;  %v2908_v23 = vld [vmem:[#allocation2 + $0x159] sm:$0xff] }
 0x135   : > { %1632 = vmatmul.mubr.f32.gmra.mrb[50].mxu0 %v2906_v47  ;;  %2446 = vmatprep.mubr.f32.mxu1 %v4161_v32  ;;  %v970_v32 = vld [vmem:[#allocation2 + $0xaa] sm:$0xff] }
 0x136   : > { %1636 = vmatprep.mubr.f32.mxu0 %v4761_v37 }
 0x137   : > { %v4299_v48 = vpop.f32.mrb[10].mxu1 }
 0x138   : > { %2447 = vmatmul.mubr.f32.gmra.mrb[116].mxu1 %v4179_v58  ;;  %v1085_v45 = vpop.f32.mrb[11].mxu1  ;;  %v4764_v58 = vld [vmem:[#allocation16_spill] sm:$0xff] }
 0x139   : > { %1637 = vmatmul.mubr.f32.gmra.mrb[52].mxu0 %v2907_v53  ;;  %2449 = vmatprep.mubr.f32.mxu1 %v4191_v20 }
 0x13a   : > { %1641 = vmatprep.mubr.f32.mxu0 %v4762_v0 }
 0x13b   : > { %v4304_v55 = vpop.f32.mrb[12].mxu1 }
 0x13c   : > { %2450 = vmatmul.mubr.f32.gmra.mrb[118].mxu1 %v4203_v49  ;;  %v1090_v1 = vpop.f32.mrb[13].mxu1  ;;  %v2910_v49 = vld [vmem:[#allocation2 + $0x171] sm:$0xff] }
 0x13d   : > { %1642 = vmatmul.mubr.f32.gmra.mrb[54].mxu0 %v2908_v23  ;;  %2452 = vmatprep.mubr.f32.mxu1 %v968_v50 }
 0x13e   : > { %1646 = vmatprep.mubr.f32.mxu0 %v4763_v30 }
 0x13f   : > { %v4308_v12 = vpop.f32.mrb[14].mxu1 }
 0x140   : > { %2453 = vmatmul.mubr.f32.gmra.mrb[120].mxu1 %v969_v33  ;;  %v1095_v46 = vpop.f32.mrb[15].mxu1 }
 0x141   : > { %1647 = vmatmul.mubr.f32.gmra.mrb[56].mxu0 %v2909_v9  ;;  %2455 = vmatprep.mubr.f32.mxu1 %v970_v32 }
 0x142   : > { %1651 = vmatprep.mubr.f32.mxu0 %v4764_v58 }
 0x143   : > { %v4313_v20 = vpop.f32.mrb[16].mxu1 }
 0x144   : > { %2456 = vmatmul.mubr.f32.gmra.mrb[122].mxu1 %v971_v35  ;;  %v1100_v54 = vpop.f32.mrb[17].mxu1 }
 0x145   : > { %1652 = vmatmul.mubr.f32.gmra.mrb[58].mxu0 %v2910_v49  ;;  %2458 = vmatprep.mubr.f32.mxu1 %v972_v61 }
 0x146   : > { %1656 = vmatprep.mubr.f32.mxu0 %v4311_v28 }
 0x147   : > { %v4318_v26 = vpop.f32.mrb[18].mxu1 }
 0x148   : > { %2459 = vmatmul.mubr.f32.gmra.mrb[124].mxu1 %v973_v40  ;;  %v1105_v31 = vpop.f32.mrb[19].mxu1 }
 0x149   : > { %1657 = vmatmul.mubr.f32.gmra.mrb[60].mxu0 %v2911_v22  ;;  %2461 = vmatprep.mubr.f32.mxu1 %v974_v62 }
 0x14a   : > { %1661 = vmatprep.mubr.f32.mxu0 %v4316_v25 }
 0x14b   : > { %v4321_v27 = vpop.f32.mrb[20].mxu1 }
 0x14c   : > { %2462 = vmatmul.mubr.f32.gmra.mrb[126].mxu1 %v975_v15  ;;  %v1110_v38 = vpop.f32.mrb[21].mxu1 }
 0x14d   : > { %1662 = vmatmul.mubr.f32.gmra.mrb[62].mxu0 %v2912_v17  ;;  %2464 = vmatprep.mubr.f32.mxu1 %v976_v16 }
 0x14e   : > { %1731 = vmatprep.mubr.f32.mxu0 %v4110_v56  ;;  %v898_v56 = vld [vmem:[#allocation2 + $0x48] sm:$0xff] }
 0x14f   : > { %v4324_v44 = vpop.f32.mrb[22].mxu1 }
 0x150   : > { %2465 = vmatmul.mubr.f32.gmra.mrb[128].mxu1 %v977_v11  ;;  %v1115_v18 = vpop.f32.mrb[23].mxu1 }
 0x151   : > { %1732 = vmatmul.mubr.f32.vlgmr.msra.gmra.mrb[0].mxu0 %v896_v10  ;;  %2467 = vmatprep.mubr.f32.mxu1 %v978_v8 }
 0x152   : > { %1736 = vmatprep.mubr.f32.mxu0 %v4125_v52  ;;  %v899_v52 = vld [vmem:[#allocation2 + $0x50] sm:$0xff] }
 0x153   : > { %v4327_v7 = vpop.f32.mrb[24].mxu1 }
 0x154   : > { %2468 = vmatmul.mubr.f32.gmra.mrb[130].mxu1 %v979_v42  ;;  %v1120_v57 = vpop.f32.mrb[25].mxu1 }
 0x155   : > { %1737 = vmatmul.mubr.f32.gmra.mrb[2].mxu0 %v897_v63  ;;  %2470 = vmatprep.mubr.f32.mxu1 %v980_v4 }
 0x156   : > { %1741 = vmatprep.mubr.f32.mxu0 %v4140_v21  ;;  %v900_v21 = vld [vmem:[#allocation2 + $0x60] sm:$0xff] }
 0x157   : > { %v4330_v5 = vpop.f32.mrb[26].mxu1 }
 0x158   : > { %2471 = vmatmul.mubr.f32.gmra.mrb[132].mxu1 %v4758_v60  ;;  %v1125_v34 = vpop.f32.mrb[27].mxu1 }
 0x159   : > { %1742 = vmatmul.mubr.f32.gmra.mrb[4].mxu0 %v898_v56  ;;  %2473 = vmatprep.mubr.f32.mxu1 %v4759_v24 }
 0x15a   : > { %1746 = vmatprep.mubr.f32.mxu0 %v4158_v19  ;;  %v901_v19 = vld [vmem:[#allocation2 + $0x68] sm:$0xff] }
 0x15b   : > { %v4335_v29 = vpop.f32.mrb[28].mxu1 }
 0x15c   : > { %2474 = vmatmul.mubr.f32.gmra.mrb[134].mxu1 %v4760_v14  ;;  %v1130_v36 = vpop.f32.mrb[29].mxu1 }
 0x15d   : > { %1747 = vmatmul.mubr.f32.gmra.mrb[6].mxu0 %v899_v52  ;;  %2476 = vmatprep.mubr.f32.mxu1 %v4761_v37  ;;  %v990_v37 = vld [vmem:[#allocation2 + $0x19a] sm:$0xff] }
 0x15e   : > { %1751 = vmatprep.mubr.f32.mxu0 %v4176_v51  ;;  %v902_v51 = vld [vmem:[#allocation2 + $0x78] sm:$0xff] }
 0x15f   : > { %v4340_v47 = vpop.f32.mrb[30].mxu1 }
 0x160   : > { %2477 = vmatmul.mubr.f32.gmra.mrb[136].mxu1 %v4762_v0  ;;  %v1135_v60 = vpop.f32.mrb[31].mxu1  ;;  %v903_v0 = vld [vmem:[#allocation2 + $0x80] sm:$0xff] }
 0x161   : > { %1752 = vmatmul.mubr.f32.gmra.mrb[8].mxu0 %v900_v21  ;;  %2479 = vmatprep.mubr.f32.mxu1 %v4763_v30 }
 0x162   : > { %1756 = vmatprep.mubr.f32.mxu0 %v4188_v43  ;;  %v991_v43 = vld [vmem:[#allocation2 + $0x1a2] sm:$0xff] }
 0x163   : > { %v4345_v24 = vpop.f32.mrb[32].mxu1 }
 0x164   : > { %2480 = vmatmul.mubr.f32.gmra.mrb[138].mxu1 %v4764_v58  ;;  %v1140_v14 = vpop.f32.mrb[33].mxu1 }
 0x165   : > { %1757 = vmatmul.mubr.f32.gmra.mrb[10].mxu0 %v901_v19  ;;  %2482 = vmatprep.mubr.f32.mxu1 %v4311_v28 }
 0x166   : > { %1761 = vmatprep.mubr.f32.mxu0 %v4200_v3 }
 0x167   : > { %v4350_v45 = vpop.f32.mrb[34].mxu1 }
 0x168   : > { %2483 = vmatmul.mubr.f32.gmra.mrb[140].mxu1 %v4316_v25  ;;  %v1145_v53 = vpop.f32.mrb[35].mxu1 }
 0x169   : > { %1762 = vmatmul.mubr.f32.gmra.mrb[12].mxu0 %v902_v51  ;;  %2485 = vmatprep.mubr.f32.mxu1 %v990_v37 }
 0x16a   : > { %1766 = vmatprep.mubr.f32.mxu0 %v4212_v41 }
 0x16b   : > { %v4354_v50 = vpop.f32.mrb[36].mxu1 }
 0x16c   : > { %2486 = vmatmul.mubr.f32.gmra.mrb[142].mxu1 %v991_v43  ;;  %v1150_v1 = vpop.f32.mrb[37].mxu1 }
 0x16d   : > { %1767 = vmatmul.mubr.f32.gmra.mrb[14].mxu0 %v903_v0 }
 0x16f   : > { %v4356_v23 = vpop.f32.mrb[38].mxu1 }
 0x170   : > { %v1155_v3 = vpop.f32.mrb[39].mxu1 }
 0x173   : > { %v4358_v33 = vpop.f32.mrb[40].mxu1 }
 0x174   : > { %v1160_v30 = vpop.f32.mrb[41].mxu1 }
 0x177   : > { %v4360_v32 = vpop.f32.mrb[42].mxu1 }
 0x178   : > { %v1165_v46 = vpop.f32.mrb[43].mxu1 }
 0x17b   : > { %v4362_v9 = vpop.f32.mrb[44].mxu1 }
 0x17c   : > { %v1170_v35 = vpop.f32.mrb[45].mxu1 }
 0x17f   : > { %v4364_v58 = vpop.f32.mrb[46].mxu1 }
 0x180   : > { %v1175_v41 = vpop.f32.mrb[47].mxu1 }
 0x183   : > { %v4366_v61 = vpop.f32.mrb[48].mxu1 }
 0x184   : > { %v1180_v28 = vpop.f32.mrb[49].mxu1 }
 0x187   : > { %v4368_v54 = vpop.f32.mrb[50].mxu1 }
 0x188   : > { %v1185_v49 = vpop.f32.mrb[51].mxu1 }
 0x18b   : > { %v4370_v40 = vpop.f32.mrb[52].mxu1 }
 0x18c   : > { %v1190_v62 = vpop.f32.mrb[53].mxu1 }
 0x18f   : > { %v4372_v25 = vpop.f32.mrb[54].mxu1 }
 0x190   : > { %v1195_v31 = vpop.f32.mrb[55].mxu1 }
 0x193   : > { %v4374_v22 = vpop.f32.mrb[56].mxu1 }
 0x194   : > { %v1200_v15 = vpop.f32.mrb[57].mxu1 }
 0x197   : > { %v4376_v16 = vpop.f32.mrb[58].mxu1 }
 0x198   : > { %v1205_v38 = vpop.f32.mrb[59].mxu1 }
 0x19b   : > { %v4378_v17 = vpop.f32.mrb[60].mxu1 }
 0x19c   : > { %v1210_v11 = vpop.f32.mrb[61].mxu1 }
 0x19f   : > { %v4380_v10 = vpop.f32.mrb[62].mxu1 }
 0x1a0   : > { %v1215_v8 = vpop.f32.mrb[63].mxu1 }
 0x1a3   : > { %v1773_v18 = vpop.f32.mrb[64].mxu1 }
 0x1a4   : > { %v1775_v42 = vpop.f32.mrb[65].mxu1 }
 0x1a7   : > { %v1778_v63 = vpop.f32.mrb[66].mxu1 }
 0x1a8   : > { %v1780_v4 = vpop.f32.mrb[67].mxu1 }
 0x1ab   : > { %v1783_v57 = vpop.f32.mrb[68].mxu1 }
 0x1ac   : > { %v1785_v56 = vpop.f32.mrb[69].mxu1 }
 0x1af   : > { %v1788_v34 = vpop.f32.mrb[70].mxu1 }
 0x1b0   : > { %v1790_v52 = vpop.f32.mrb[71].mxu1 }
 0x1b3   : > { %v1793_v36 = vpop.f32.mrb[72].mxu1 }
 0x1b4   : > { %v1795_v21 = vpop.f32.mrb[73].mxu1 }
 0x1b7   : > { %v1798_v60 = vpop.f32.mrb[74].mxu1 }
 0x1b8   : > { %v1800_v19 = vpop.f32.mrb[75].mxu1 }
 0x1bb   : > { %v1803_v14 = vpop.f32.mrb[76].mxu1 }
 0x1bc   : > { %v1805_v51 = vpop.f32.mrb[77].mxu1 }
 0x1bf   : > { %v1808_v37 = vpop.f32.mrb[78].mxu1 }
 0x1c0   : > { %v1810_v53 = vpop.f32.mrb[79].mxu1 }
 0x1c3   : > { %v1813_v43 = vpop.f32.mrb[80].mxu1 }
 0x1c4   : > { %v1548_v0 = vpop.f32.mrb[16].mxu0  ;;  %v1815_v1 = vpop.f32.mrb[81].mxu1 }
 0x1c5   : > { %v2752_v3 = vadd.f32 %v1548_v0, %v4313_v20  ;;  %v1550_v30 = vpop.f32.mrb[17].mxu0 }
 0x1c7   : > { %v4383_v46 = vadd.f32 %v2752_v3, %v1773_v18  ;;  %v1818_v35 = vpop.f32.mrb[82].mxu1 }
 0x1c8   : > { %v1553_v41 = vpop.f32.mrb[18].mxu0  ;;  %v1820_v28 = vpop.f32.mrb[83].mxu1 }
 0x1c9   : > { %v2754_v49 = vadd.f32 %v1553_v41, %v4318_v26  ;;  %v1555_v62 = vpop.f32.mrb[19].mxu0 }
 0x1cb   : > { %v4386_v31 = vadd.f32 %v2754_v49, %v1778_v63  ;;  %v1823_v15 = vpop.f32.mrb[84].mxu1 }
 0x1cc   : > { %v1558_v38 = vpop.f32.mrb[20].mxu0  ;;  %v1825_v11 = vpop.f32.mrb[85].mxu1 }
 0x1cd   : > { %v2756_v8 = vadd.f32 %v1558_v38, %v4321_v27  ;;  %v1560_v42 = vpop.f32.mrb[21].mxu0 }
 0x1cf   : > { %v4389_v4 = vadd.f32 %v2756_v8, %v1783_v57  ;;  %v1828_v20 = vpop.f32.mrb[86].mxu1 }
 0x1d0   : > { %v1563_v56 = vpop.f32.mrb[22].mxu0  ;;  %v1830_v18 = vpop.f32.mrb[87].mxu1 }
 0x1d1   : > { %v2758_v52 = vadd.f32 %v1563_v56, %v4324_v44  ;;  %v1565_v21 = vpop.f32.mrb[23].mxu0 }
 0x1d3   : > { %v4392_v19 = vadd.f32 %v2758_v52, %v1788_v34  ;;  %v1833_v26 = vpop.f32.mrb[88].mxu1 }
 0x1d4   : > { %v1568_v51 = vpop.f32.mrb[24].mxu0  ;;  %v1835_v63 = vpop.f32.mrb[89].mxu1 }
 0x1d5   : > { %v2760_v53 = vadd.f32 %v1568_v51, %v4327_v7  ;;  %v1570_v0 = vpop.f32.mrb[25].mxu0 }
 0x1d7   : > { %v4395_v1 = vadd.f32 %v2760_v53, %v1793_v36  ;;  %v1838_v27 = vpop.f32.mrb[90].mxu1 }
 0x1d8   : > { %v1573_v3 = vpop.f32.mrb[26].mxu0  ;;  %v1840_v57 = vpop.f32.mrb[91].mxu1 }
 0x1d9   : > { %v2762_v30 = vadd.f32 %v1573_v3, %v4330_v5  ;;  %v1575_v41 = vpop.f32.mrb[27].mxu0 }
 0x1db   : > { %v4398_v28 = vadd.f32 %v2762_v30, %v1798_v60  ;;  %v1843_v44 = vpop.f32.mrb[92].mxu1 }
 0x1dc   : > { %v1578_v49 = vpop.f32.mrb[28].mxu0  ;;  %v1845_v34 = vpop.f32.mrb[93].mxu1 }
 0x1dd   : > { %v2764_v62 = vadd.f32 %v1578_v49, %v4335_v29  ;;  %v1580_v38 = vpop.f32.mrb[29].mxu0 }
 0x1df   : > { %v4401_v11 = vadd.f32 %v2764_v62, %v1803_v14  ;;  %v1848_v7 = vpop.f32.mrb[94].mxu1 }
 0x1e0   : > { %v1583_v8 = vpop.f32.mrb[30].mxu0  ;;  %v1850_v36 = vpop.f32.mrb[95].mxu1 }
 0x1e1   : > { %v2766_v42 = vadd.f32 %v1583_v8, %v4340_v47  ;;  %v1585_v56 = vpop.f32.mrb[31].mxu0 }
 0x1e3   : > { %v4404_v18 = vadd.f32 %v2766_v42, %v1808_v37  ;;  %v1853_v5 = vpop.f32.mrb[96].mxu1 }
 0x1e4   : > { %v1588_v52 = vpop.f32.mrb[32].mxu0  ;;  %v1855_v60 = vpop.f32.mrb[97].mxu1 }
 0x1e5   : > { %v2768_v21 = vadd.f32 %v1588_v52, %v4345_v24  ;;  %v1590_v51 = vpop.f32.mrb[33].mxu0 }
 0x1e7   : > { %v4407_v63 = vadd.f32 %v2768_v21, %v1813_v43  ;;  %v1858_v29 = vpop.f32.mrb[98].mxu1 }
 0x1e8   : > { %v1593_v53 = vpop.f32.mrb[34].mxu0  ;;  %v1860_v14 = vpop.f32.mrb[99].mxu1 }
 0x1e9   : > { %v2770_v0 = vadd.f32 %v1593_v53, %v4350_v45  ;;  %v1595_v3 = vpop.f32.mrb[35].mxu0 }
 0x1eb   : > { %v4410_v57 = vadd.f32 %v2770_v0, %v1818_v35  ;;  %v1863_v47 = vpop.f32.mrb[100].mxu1 }
 0x1ec   : > { %v1598_v30 = vpop.f32.mrb[36].mxu0  ;;  %v1865_v37 = vpop.f32.mrb[101].mxu1 }
 0x1ed   : > { %v2772_v41 = vadd.f32 %v1598_v30, %v4354_v50  ;;  %v1600_v49 = vpop.f32.mrb[37].mxu0 }
 0x1ef   : > { %v4413_v34 = vadd.f32 %v2772_v41, %v1823_v15  ;;  %v1868_v24 = vpop.f32.mrb[102].mxu1 }
 0x1f0   : > { %v1603_v62 = vpop.f32.mrb[38].mxu0  ;;  %v1870_v43 = vpop.f32.mrb[103].mxu1 }
 0x1f1   : > { %v2774_v38 = vadd.f32 %v1603_v62, %v4356_v23  ;;  %v1605_v8 = vpop.f32.mrb[39].mxu0 }
 0x1f3   : > { %v4416_v36 = vadd.f32 %v2774_v38, %v1828_v20  ;;  %v1873_v45 = vpop.f32.mrb[104].mxu1 }
 0x1f4   : > { %v1608_v42 = vpop.f32.mrb[40].mxu0  ;;  %v1875_v35 = vpop.f32.mrb[105].mxu1 }
 0x1f5   : > { %v2776_v56 = vadd.f32 %v1608_v42, %v4358_v33  ;;  %v1610_v52 = vpop.f32.mrb[41].mxu0 }
 0x1f7   : > { %v4419_v60 = vadd.f32 %v2776_v56, %v1833_v26  ;;  %v4421_v50 = vpop.f32.mrb[106].mxu1 }
 0x1f8   : > { %v1613_v15 = vpop.f32.mrb[42].mxu0  ;;  %v1880_v21 = vpop.f32.mrb[107].mxu1 }
 0x1f9   : > { %v2778_v51 = vadd.f32 %v1613_v15, %v4360_v32  ;;  %v1615_v53 = vpop.f32.mrb[43].mxu0 }
 0x1fb   : > { %v4424_v14 = vpop.f32.mrb[108].mxu1  ;;  %v4426_v23 = vadd.f32 %v2778_v51, %v1838_v27 }
 0x1fc   : > { %v1618_v20 = vpop.f32.mrb[44].mxu0  ;;  %v1885_v0 = vpop.f32.mrb[109].mxu1 }
 0x1fd   : > { %v2780_v3 = vadd.f32 %v1618_v20, %v4362_v9  ;;  %v1620_v30 = vpop.f32.mrb[45].mxu0 }
 0x1ff   : > { %v4429_v33 = vpop.f32.mrb[110].mxu1  ;;  %v4431_v26 = vadd.f32 %v2780_v3, %v1843_v44 }
 0x200   : > { %v1623_v37 = vpop.f32.mrb[46].mxu0  ;;  %v1890_v41 = vpop.f32.mrb[111].mxu1 }
 0x201   : > { %v2782_v49 = vadd.f32 %v1623_v37, %v4364_v58  ;;  %v1625_v62 = vpop.f32.mrb[47].mxu0 }
 0x203   : > { %v4434_v32 = vpop.f32.mrb[112].mxu1  ;;  %v4436_v43 = vadd.f32 %v2782_v49, %v1848_v7 }
 0x204   : > { %v1628_v27 = vpop.f32.mrb[48].mxu0  ;;  %v4438_v38 = vpop.f32.mrb[113].mxu1 }
 0x205   : > { %v2784_v8 = vadd.f32 %v1628_v27, %v4366_v61  ;;  %v1630_v9 = vpop.f32.mrb[49].mxu0 }
 0x207   : > { %v4441_v42 = vpop.f32.mrb[114].mxu1  ;;  %v4443_v35 = vadd.f32 %v2784_v8, %v1853_v5 }
 0x208   : > { %v1633_v44 = vpop.f32.mrb[50].mxu0  ;;  %v4445_v56 = vpop.f32.mrb[115].mxu1 }
 0x209   : > { %v2786_v58 = vadd.f32 %v1633_v44, %v4368_v54  ;;  %v1635_v52 = vpop.f32.mrb[51].mxu0 }
 0x20b   : > { %v4448_v15 = vpop.f32.mrb[116].mxu1  ;;  %v4450_v7 = vadd.f32 %v2786_v58, %v1858_v29 }
 0x20c   : > { %v1638_v21 = vpop.f32.mrb[52].mxu0  ;;  %v4452_v51 = vpop.f32.mrb[117].mxu1 }
 0x20d   : > { %v2788_v61 = vadd.f32 %v1638_v21, %v4370_v40  ;;  %v1640_v53 = vpop.f32.mrb[53].mxu0 }
 0x20f   : > { %v4455_v20 = vpop.f32.mrb[118].mxu1  ;;  %v4457_v5 = vadd.f32 %v2788_v61, %v1863_v47 }
 0x210   : > { %v1643_v0 = vpop.f32.mrb[54].mxu0  ;;  %v4459_v3 = vpop.f32.mrb[119].mxu1 }
 0x211   : > { %v2790_v54 = vadd.f32 %v1643_v0, %v4372_v25  ;;  %v1645_v30 = vpop.f32.mrb[55].mxu0 }
 0x213   : > { %v2454_v40 = vpop.f32.mrb[120].mxu1  ;;  %v4469_v29 = vadd.f32 %v2790_v54, %v1868_v24 }
 0x214   : > { %v1648_v37 = vpop.f32.mrb[56].mxu0  ;;  %v4472_v47 = vadd.f32 %v4386_v31, %v2454_v40  ;;  %v1998_v41 = vpop.f32.mrb[121].mxu1 }
 0x215   : > { %v2792_v25 = vadd.f32 %v1648_v37, %v4374_v22  ;;  %v1650_v49 = vpop.f32.mrb[57].mxu0  ;;  %v4476_v62 = vadd.f32 %v4383_v46, %v1998_v41 }
 0x216   : > { %2126 = vst [vmem:[%s4467_s16 + $0x48] sm:$0xff] %v4472_v47 }
 0x217   : > { %2125 = vst [vmem:[%s4467_s16 + $0x40] sm:$0xff] %v4476_v62  ;;  %v2457_v27 = vpop.f32.mrb[122].mxu1  ;;  %v4482_v24 = vadd.f32 %v2792_v25, %v1873_v45 }
 0x218   : > { %v1653_v8 = vpop.f32.mrb[58].mxu0  ;;  %v4485_v31 = vadd.f32 %v4392_v19, %v2457_v27  ;;  %v2008_v9 = vpop.f32.mrb[123].mxu1 }
 0x219   : > { %v2794_v22 = vadd.f32 %v1653_v8, %v4376_v16  ;;  %v1655_v44 = vpop.f32.mrb[59].mxu0  ;;  %v4489_v46 = vadd.f32 %v4389_v4, %v2008_v9 }
 0x21a   : > { %2128 = vst [vmem:[%s4467_s16 + $0x58] sm:$0xff] %v4485_v31 }
 0x21b   : > { %2127 = vst [vmem:[%s4467_s16 + $0x50] sm:$0xff] %v4489_v46  ;;  %v2460_v58 = vpop.f32.mrb[124].mxu1  ;;  %v4496_v45 = vadd.f32 %v2794_v22, %v4421_v50 }
 0x21c   : > { %v1658_v52 = vpop.f32.mrb[60].mxu0  ;;  %v4499_v19 = vadd.f32 %v4398_v28, %v2460_v58  ;;  %v2018_v21 = vpop.f32.mrb[125].mxu1 }
 0x21d   : > { %v2796_v16 = vadd.f32 %v1658_v52, %v4378_v17  ;;  %v1660_v61 = vpop.f32.mrb[61].mxu0  ;;  %v4503_v4 = vadd.f32 %v4395_v1, %v2018_v21 }
 0x21e   : > { %2130 = vst [vmem:[%s4467_s16 + $0x68] sm:$0xff] %v4499_v19 }
 0x21f   : > { %2129 = vst [vmem:[%s4467_s16 + $0x60] sm:$0xff] %v4503_v4  ;;  %v2463_v53 = vpop.f32.mrb[126].mxu1  ;;  %v4510_v50 = vadd.f32 %v2796_v16, %v4424_v14 }
 0x220   : > { %v1663_v0 = vpop.f32.mrb[62].mxu0  ;;  %v4513_v28 = vadd.f32 %v4404_v18, %v2463_v53  ;;  %v2028_v54 = vpop.f32.mrb[127].mxu1 }
 0x221   : > { %v2798_v17 = vadd.f32 %v1663_v0, %v4380_v10  ;;  %v1665_v30 = vpop.f32.mrb[63].mxu0  ;;  %v4517_v1 = vadd.f32 %v4401_v11, %v2028_v54 }
 0x222   : > { %2132 = vst [vmem:[%s4467_s16 + $0x78] sm:$0xff] %v4513_v28 }
 0x223   : > { %2131 = vst [vmem:[%s4467_s16 + $0x70] sm:$0xff] %v4517_v1  ;;  %v2466_v14 = vpop.f32.mrb[128].mxu1  ;;  %v4524_v40 = vadd.f32 %v2798_v17, %v4429_v33 }
 0x224   : > { %v1733_v37 = vpop.f32.mrb[0].mxu0  ;;  %v4527_v18 = vadd.f32 %v4410_v57, %v2466_v14  ;;  %v2038_v41 = vpop.f32.mrb[129].mxu1 }
 0x225   : > { %v2744_v10 = vadd.f32 %v1733_v37, %v4276_v2  ;;  %v1735_v11 = vpop.f32.mrb[1].mxu0  ;;  %v4531_v25 = vadd.f32 %v4407_v63, %v2038_v41 }
 0x226   : > { %2134 = vst [vmem:[%s4467_s16 + $0x88] sm:$0xff] %v4527_v18 }
 0x227   : > { %v1959_v49 = vadd.f32 %v2744_v10, %v4438_v38  ;;  %2133 = vst [vmem:[%s4467_s16 + $0x80] sm:$0xff] %v4531_v25  ;;  %v2469_v33 = vpop.f32.mrb[130].mxu1 }
 0x228   : > { %v1738_v27 = vpop.f32.mrb[2].mxu0  ;;  %v4539_v57 = vadd.f32 %v4416_v36, %v2469_v33  ;;  %v2048_v8 = vpop.f32.mrb[131].mxu1 }
 0x229   : > { %2117 = vst [vmem:[%s4467_s16] sm:$0xff] %v1959_v49  ;;  %v2745_v2 = vadd.f32 %v1738_v27, %v4281_v59  ;;  %v1740_v9 = vpop.f32.mrb[3].mxu0  ;;  %v4544_v63 = vadd.f32 %v4413_v34, %v2048_v8  ;;  %v2186_v44 = vmul.f32 %v1959_v49, %v1959_v49 }
 0x22a   : > { %2136 = vst [vmem:[%s4467_s16 + $0x98] sm:$0xff] %v4539_v57 }
 0x22b   : > { %v1964_v38 = vadd.f32 %v2745_v2, %v4434_v32  ;;  %2135 = vst [vmem:[%s4467_s16 + $0x90] sm:$0xff] %v4544_v63  ;;  %v2472_v22 = vpop.f32.mrb[132].mxu1 }
 0x22c   : > { %v1743_v36 = vpop.f32.mrb[4].mxu0  ;;  %v4552_v58 = vadd.f32 %v4426_v23, %v2472_v22  ;;  %v2058_v59 = vpop.f32.mrb[133].mxu1 }
 0x22d   : > { %2118 = vst [vmem:[%s4467_s16 + $0x8] sm:$0xff] %v1964_v38  ;;  %v2149_v52 = vadd.f32 %v1964_v38, %v1959_v49  ;;  %v2187_v21 = vmul.f32 %v1964_v38, %v1964_v38  ;;  %v2746_v34 = vadd.f32 %v1743_v36, %v4285_v6  ;;  %v1745_v16 = vpop.f32.mrb[5].mxu0  ;;  %v4557_v32 = vadd.f32 %v4419_v60, %v2058_v59 }
 0x22e   : > { %2138 = vst [vmem:[%s4467_s16 + $0xa8] sm:$0xff] %v4552_v58 }
 0x22f   : > { %v2218_v61 = vadd.f32 %v2187_v21, %v2186_v44  ;;  %v1969_v53 = vadd.f32 %v2746_v34, %v4445_v56  ;;  %2137 = vst [vmem:[%s4467_s16 + $0xa0] sm:$0xff] %v4557_v32  ;;  %v2475_v23 = vpop.f32.mrb[134].mxu1 }
 0x230   : > { %v1748_v0 = vpop.f32.mrb[6].mxu0  ;;  %v4565_v54 = vadd.f32 %v4436_v43, %v2475_v23  ;;  %v2068_v6 = vpop.f32.mrb[135].mxu1 }
 0x231   : > { %2119 = vst [vmem:[%s4467_s16 + $0x10] sm:$0xff] %v1969_v53  ;;  %v2150_v17 = vadd.f32 %v2149_v52, %v1969_v53  ;;  %v2188_v30 = vmul.f32 %v1969_v53, %v1969_v53  ;;  %v2747_v60 = vadd.f32 %v1748_v0, %v4289_v13  ;;  %v1750_v14 = vpop.f32.mrb[7].mxu0  ;;  %v4570_v37 = vadd.f32 %v4431_v26, %v2068_v6 }
 0x232   : > { %2140 = vst [vmem:[%s4467_s16 + $0xb8] sm:$0xff] %v4565_v54 }
 0x233   : > { %v2219_v56 = vadd.f32 %v2218_v61, %v2188_v30  ;;  %v1974_v41 = vadd.f32 %v2747_v60, %v4441_v42  ;;  %2139 = vst [vmem:[%s4467_s16 + $0xb0] sm:$0xff] %v4570_v37  ;;  %v2478_v43 = vpop.f32.mrb[136].mxu1 }
 0x234   : > { %v1753_v10 = vpop.f32.mrb[8].mxu0  ;;  %v4578_v11 = vadd.f32 %v4450_v7, %v2478_v43  ;;  %v2078_v13 = vpop.f32.mrb[137].mxu1 }
 0x235   : > { %2120 = vst [vmem:[%s4467_s16 + $0x18] sm:$0xff] %v1974_v41  ;;  %v2151_v49 = vadd.f32 %v2150_v17, %v1974_v41  ;;  %v2189_v33 = vmul.f32 %v1974_v41, %v1974_v41  ;;  %v2748_v26 = vadd.f32 %v1753_v10, %v4294_v39  ;;  %v1755_v27 = vpop.f32.mrb[9].mxu0  ;;  %v4583_v8 = vadd.f32 %v4443_v35, %v2078_v13 }
 0x236   : > { %2142 = vst [vmem:[%s4467_s16 + $0xc8] sm:$0xff] %v4578_v11  ;;  %v2194_v10 = vmul.f32 %v4476_v62, %v4476_v62 }
 0x237   : > { %v2220_v42 = vadd.f32 %v2219_v56, %v2189_v33  ;;  %v1979_v2 = vadd.f32 %v2748_v26, %v4452_v51  ;;  %2141 = vst [vmem:[%s4467_s16 + $0xc0] sm:$0xff] %v4583_v8  ;;  %v2481_v7 = vpop.f32.mrb[138].mxu1 }
 0x238   : > { %v1758_v9 = vpop.f32.mrb[10].mxu0  ;;  %v4591_v38 = vadd.f32 %v4469_v29, %v2481_v7  ;;  %v2088_v39 = vpop.f32.mrb[139].mxu1 }
 0x239   : > { %2121 = vst [vmem:[%s4467_s16 + $0x20] sm:$0xff] %v1979_v2  ;;  %v2152_v22 = vadd.f32 %v2151_v49, %v1979_v2  ;;  %v2190_v44 = vmul.f32 %v1979_v2, %v1979_v2  ;;  %v2749_v35 = vadd.f32 %v1758_v9, %v4299_v48  ;;  %v1760_v36 = vpop.f32.mrb[11].mxu0  ;;  %v4596_v59 = vadd.f32 %v4457_v5, %v2088_v39 }
 0x23a   : > { %2144 = vst [vmem:[%s4467_s16 + $0xd8] sm:$0xff] %v4591_v38 }
 0x23b   : > { %v2221_v51 = vadd.f32 %v2220_v42, %v2190_v44  ;;  %v1984_v52 = vadd.f32 %v2749_v35, %v4448_v15  ;;  %2143 = vst [vmem:[%s4467_s16 + $0xd0] sm:$0xff] %v4596_v59  ;;  %v2484_v29 = vpop.f32.mrb[140].mxu1  ;;  %v2197_v42 = vmul.f32 %v4485_v31, %v4485_v31 }
 0x23c   : > { %v1763_v21 = vpop.f32.mrb[12].mxu0  ;;  %v4604_v34 = vadd.f32 %v4496_v45, %v2484_v29  ;;  %v2098_v48 = vpop.f32.mrb[141].mxu1 }
 0x23d   : > { %2122 = vst [vmem:[%s4467_s16 + $0x28] sm:$0xff] %v1984_v52  ;;  %v2153_v16 = vadd.f32 %v2152_v22, %v1984_v52  ;;  %v2191_v61 = vmul.f32 %v1984_v52, %v1984_v52  ;;  %v2750_v5 = vadd.f32 %v1763_v21, %v4304_v55  ;;  %v1765_v53 = vpop.f32.mrb[13].mxu0  ;;  %v4609_v23 = vadd.f32 %v4482_v24, %v2098_v48 }
 0x23e   : > { %2146 = vst [vmem:[%s4467_s16 + $0xe8] sm:$0xff] %v4604_v34 }
 0x23f   : > { %v2222_v15 = vadd.f32 %v2221_v51, %v2191_v61  ;;  %v1989_v0 = vadd.f32 %v2750_v5, %v4459_v3  ;;  %2145 = vst [vmem:[%s4467_s16 + $0xe0] sm:$0xff] %v4609_v23  ;;  %v2487_v45 = vpop.f32.mrb[142].mxu1 }
 0x240   : > { %v1768_v6 = vpop.f32.mrb[14].mxu0  ;;  %v4617_v17 = vadd.f32 %v4524_v40, %v2487_v45  ;;  %v2108_v55 = vpop.f32.mrb[143].mxu1 }
 0x241   : > { %2123 = vst [vmem:[%s4467_s16 + $0x30] sm:$0xff] %v1989_v0  ;;  %v2154_v30 = vadd.f32 %v2153_v16, %v1989_v0  ;;  %v2192_v60 = vmul.f32 %v1989_v0, %v1989_v0  ;;  %v2751_v24 = vadd.f32 %v1768_v6, %v4308_v12  ;;  %v1770_v14 = vpop.f32.mrb[15].mxu0  ;;  %v4622_v56 = vadd.f32 %v4510_v50, %v2108_v55 }
 0x242   : > { %2148 = vst [vmem:[%s4467_s16 + $0xf8] sm:$0xff] %v4617_v17  ;;  %v2195_v50 = vmul.f32 %v4472_v47, %v4472_v47 }
 0x243   : > { %v2223_v3 = vadd.f32 %v2222_v15, %v2192_v60  ;;  %v1994_v41 = vadd.f32 %v2751_v24, %v4455_v20  ;;  %2147 = vst [vmem:[%s4467_s16 + $0xf0] sm:$0xff] %v4622_v56  ;;  %v2196_v20 = vmul.f32 %v4489_v46, %v4489_v46 }
 0x245   : > { %2124 = vst [vmem:[%s4467_s16 + $0x38] sm:$0xff] %v1994_v41  ;;  %v2155_v40 = vadd.f32 %v2154_v30, %v1994_v41  ;;  %v2193_v43 = vmul.f32 %v1994_v41, %v1994_v41 }
 0x247   : > { %v2156_v13 = vadd.f32 %v2155_v40, %v4476_v62  ;;  %v2224_v12 = vadd.f32 %v2223_v3, %v2193_v43  ;;  %v2198_v62 = vmul.f32 %v4503_v4, %v4503_v4 }
 0x249   : > { %v2157_v49 = vadd.f32 %v2156_v13, %v4472_v47  ;;  %v2225_v33 = vadd.f32 %v2224_v12, %v2194_v10  ;;  %v2199_v47 = vmul.f32 %v4499_v19, %v4499_v19 }
 0x24b   : > { %v2158_v26 = vadd.f32 %v2157_v49, %v4489_v46  ;;  %v2226_v27 = vadd.f32 %v2225_v33, %v2195_v50  ;;  %v2200_v46 = vmul.f32 %v4517_v1, %v4517_v1 }
 0x24d   : > { %v2159_v2 = vadd.f32 %v2158_v26, %v4485_v31  ;;  %v2227_v7 = vadd.f32 %v2226_v27, %v2196_v20  ;;  %v2201_v31 = vmul.f32 %v4513_v28, %v4513_v28  ;;  %v2216_v27 = vmul.f32 %v4622_v56, %v4622_v56 }
 0x24f   : > { %v2160_v9 = vadd.f32 %v2159_v2, %v4503_v4  ;;  %v2228_v39 = vadd.f32 %v2227_v7, %v2197_v42  ;;  %v2202_v4 = vmul.f32 %v4531_v25, %v4531_v25  ;;  %v2217_v42 = vmul.f32 %v4617_v17, %v4617_v17 }
 0x251   : > { %v2161_v22 = vadd.f32 %v2160_v9, %v4499_v19  ;;  %v2229_v44 = vadd.f32 %v2228_v39, %v2198_v62  ;;  %v2203_v19 = vmul.f32 %v4527_v18, %v4527_v18 }
 0x253   : > { %v2162_v35 = vadd.f32 %v2161_v22, %v4517_v1  ;;  %v2230_v36 = vadd.f32 %v2229_v44, %v2199_v47  ;;  %v2204_v1 = vmul.f32 %v4544_v63, %v4544_v63 }
 0x255   : > { %v2163_v51 = vadd.f32 %v2162_v35, %v4513_v28  ;;  %v2231_v52 = vadd.f32 %v2230_v36, %v2200_v46  ;;  %v2205_v28 = vmul.f32 %v4539_v57, %v4539_v57 }
 0x257   : > { %v2164_v29 = vadd.f32 %v2163_v51, %v4531_v25  ;;  %v2232_v21 = vadd.f32 %v2231_v52, %v2201_v31  ;;  %v2206_v25 = vmul.f32 %v4557_v32, %v4557_v32 }
 0x259   : > { %v2165_v48 = vadd.f32 %v2164_v29, %v4527_v18  ;;  %v2233_v16 = vadd.f32 %v2232_v21, %v2202_v4  ;;  %v2207_v18 = vmul.f32 %v4552_v58, %v4552_v58 }
 0x25b   : > { %v2234_v61 = vadd.f32 %v2233_v16, %v2203_v19  ;;  %v2166_v5 = vadd.f32 %v2165_v48, %v4544_v63  ;;  %v2208_v63 = vmul.f32 %v4570_v37, %v4570_v37 }
 0x25d   : > { %v2167_v53 = vadd.f32 %v2166_v5, %v4539_v57  ;;  %v2235_v15 = vadd.f32 %v2234_v61, %v2204_v1  ;;  %v2209_v57 = vmul.f32 %v4565_v54, %v4565_v54 }
 0x25f   : > { %v2168_v0 = vadd.f32 %v2167_v53, %v4557_v32  ;;  %v2236_v45 = vadd.f32 %v2235_v15, %v2205_v28  ;;  %v2210_v32 = vmul.f32 %v4583_v8, %v4583_v8 }
 0x261   : > { %v2169_v6 = vadd.f32 %v2168_v0, %v4552_v58  ;;  %v2237_v55 = vadd.f32 %v2236_v45, %v2206_v25  ;;  %v2211_v58 = vmul.f32 %v4578_v11, %v4578_v11 }
 0x263   : > { %v2170_v30 = vadd.f32 %v2169_v6, %v4570_v37  ;;  %v2238_v60 = vadd.f32 %v2237_v55, %v2207_v18  ;;  %v2212_v37 = vmul.f32 %v4596_v59, %v4596_v59 }
 0x265   : > { %v2171_v24 = vadd.f32 %v2170_v30, %v4565_v54  ;;  %v2239_v14 = vadd.f32 %v2238_v60, %v2208_v63  ;;  %v2213_v54 = vmul.f32 %v4591_v38, %v4591_v38 }
 0x267   : > { %v2172_v3 = vadd.f32 %v2171_v24, %v4583_v8  ;;  %v2240_v41 = vadd.f32 %v2239_v14, %v2209_v57  ;;  %v2214_v8 = vmul.f32 %v4609_v23, %v4609_v23 }
 0x269   : > { %v2173_v40 = vadd.f32 %v2172_v3, %v4578_v11  ;;  %v2241_v43 = vadd.f32 %v2240_v41, %v2210_v32  ;;  %v2215_v11 = vmul.f32 %v4604_v34, %v4604_v34 }
 0x26b   : > { %v2174_v10 = vadd.f32 %v2173_v40, %v4596_v59  ;;  %v2242_v13 = vadd.f32 %v2241_v43, %v2211_v58 }
 0x26d   : > { %v2175_v12 = vadd.f32 %v2174_v10, %v4591_v38  ;;  %v2243_v50 = vadd.f32 %v2242_v13, %v2212_v37 }
 0x26f   : > { %v2176_v49 = vadd.f32 %v2175_v12, %v4609_v23  ;;  %v2244_v33 = vadd.f32 %v2243_v50, %v2213_v54 }
 0x271   : > { %v2177_v20 = vadd.f32 %v2176_v49, %v4604_v34  ;;  %v2245_v26 = vadd.f32 %v2244_v33, %v2214_v8 }
 0x273   : > { %v2178_v59 = vadd.f32 %v2177_v20, %v4622_v56  ;;  %v2246_v38 = vadd.f32 %v2245_v26, %v2215_v11 }
 0x275   : > { %v2179_v2 = vadd.f32 %v2178_v59, %v4617_v17  ;;  %v2247_v23 = vadd.f32 %v2246_v38, %v2216_v27 }
 0x277   : > { %v2180_v7 = vrot.slane %v2179_v2, 4  ;;  %v2248_v62 = vadd.f32 %v2247_v23, %v2217_v42 }
 0x279   : > { %v2181_v9 = vadd.f32 %v2180_v7, %v2179_v2  ;;  %v2249_v39 = vrot.slane %v2248_v62, 4 }
 0x27b   : > { %v2182_v47 = vrot.slane %v2181_v9, 2  ;;  %v2250_v34 = vadd.f32 %v2249_v39, %v2248_v62 }
 0x27d   : > { %v2183_v22 = vadd.f32 %v2182_v47, %v2181_v9  ;;  %v2251_v44 = vrot.slane %v2250_v34, 2 }
 0x27f   : > { %v2184_v46 = vrot.slane %v2183_v22, 1  ;;  %v2252_v35 = vadd.f32 %v2251_v44, %v2250_v34 }
 0x281   : > { %v2253_v36 = vrot.slane %v2252_v35, 1  ;;  %v2185_v56 = vadd.f32 %v2184_v46, %v2183_v22 }
 0x283   : > { %v2254_v17 = vadd.f32 %v2253_v36, %v2252_v35 }
 0x285   : > { %v2256_v31 = vsel %vm2255_vm0, %v2185_v56, %v2254_v17 }
 0x286   : > { %2257 = vst [vmem:[%s263_s22] sm:$0x3] %v2256_v31 }
 0x287 PF: > { %s18_s23 = sadd.s32 1, %s2919_s23  }
 0x288   : > { %p15_p4 = scmp.ge.s32.totalorder %s18_s23, 4  }
 0x28a   :  { %17 = sbr.rel (!%p15_p4) target bundleno = 2 (0x2), region = 84 }

</bundles_post_ra>
